<compile_context>
chip_gen: v7x
topology: tpu7x:2x2x1
jax: 0.10.0
libtpu: 0.0.40
codegen_flags: <defaults>
</compile_context>

<pallas_src>
import functools

import jax
import jax.numpy as jnp
import numpy as np
from jax.experimental import pallas as pl
from jax.experimental.pallas import tpu as pltpu

# -------------------- model hyper-parameters (small, deterministic) --------
VOCAB_SIZE = 50
EMB_DIM = 32        # bert.config.hidden_size stand-in
HIDDEN_DIM = 32
OUTPUT_DIM = 3
N_LAYERS = 2
BIDIRECTIONAL = True
DROPOUT_P = 0.25    # eval-mode forward -> dropout is identity
BATCH = 2
SEQ_LEN = 8
B_PAD = 8           # pad batch to the native sublane count


# ---------------------------------------------------------------------------
# Fused Pallas kernel: 2-layer bidirectional GRU (PyTorch gate order r, z, n)
# + final Linear.  Everything resident in VMEM, single grid step.
# ---------------------------------------------------------------------------
def _fused_bigru_kernel(x_ref, slab_ref, out_ref,
                        gi0f, gi0b, y0, gi1f, gi1b,
                        *, T, Bp, H, O, offs):
    f32 = jnp.float32
    H2, H3 = 2 * H, 3 * H

    def getw(name):
        # static row/col view into the single packed parameter slab
        r0, (nr, nc) = offs[name]
        return slab_ref[r0:r0 + nr, 0:nc]

    def cell(gi, gh, h_prev):
        # PyTorch GRU gate order r, z, n.
        # One wide (Bp, 3H) add + one combined r|z sigmoid; n gate separate.
        s = gi + gh
        rz = jax.nn.sigmoid(s[:, :H2])
        r, z = rz[:, :H], rz[:, H:]
        n = jnp.tanh(gi[:, H2:] + r * gh[:, H2:])
        return (1.0 - z) * n + z * h_prev

    # ---- weights carved from the single packed slab ------------------------
    wih0_f, wih0_b = getw("wih0_f"), getw("wih0_b")      # (E, 3H) each
    whh0_bd = getw("whh0_bd")                            # (2H, 6H) block-diag
    wih1_f, wih1_b = getw("wih1_f"), getw("wih1_b")      # (2H, 3H) each
    whh1_bd = getw("whh1_bd")                            # (2H, 6H) block-diag
    ow, ob = getw("ow"), getw("ob")                      # (2H, 3H) / (1, 3H), O-padded
    bih0_f, bih0_b, bhh0 = getw("bih0_f"), getw("bih0_b"), getw("bhh0")
    bih1_f, bih1_b, bhh1 = getw("bih1_f"), getw("bih1_b"), getw("bhh1")

    # ---- layer 0: input projections hoisted out of the recurrence ----------
    x2 = x_ref[...]                                                  # (T*Bp, E)
    gi0f[...] = jnp.dot(x2, wih0_f, preferred_element_type=f32) + bih0_f
    gi0b[...] = jnp.dot(x2, wih0_b, preferred_element_type=f32) + bih0_b

    def step(t, h_cat, gif, gib, whh_bd, bhh, store_y0):
        rf = t * Bp                     # static (Python int) row offsets
        rb = (T - 1 - t) * Bp
        # single block-diagonal MXU op gives gh for BOTH directions
        gh = jnp.dot(h_cat, whh_bd, preferred_element_type=f32) + bhh   # (Bp, 6H)
        h_f = cell(gif[rf:rf + Bp, :], gh[:, :H3], h_cat[:, :H])
        h_b = cell(gib[rb:rb + Bp, :], gh[:, H3:], h_cat[:, H:])
        if store_y0:
            # lane-concatenated layer-0 output: fwd in [0:H), bwd in [H:2H)
            y0[rf:rf + Bp, 0:H] = h_f
            y0[rb:rb + Bp, H:H2] = h_b
        return jnp.concatenate([h_f, h_b], axis=-1)                     # (Bp, 2H)

    h_cat = jnp.zeros((Bp, H2), f32)
    for t in range(T):                  # static unroll -> constant offsets
        h_cat = step(t, h_cat, gi0f, gi0b, whh0_bd, bhh0, store_y0=True)

    # ---- layer 1: gi from lane-concatenated y0 with un-split (2H,3H) weights
    y0_all = y0[...]                                                 # (T*Bp, 2H)
    gi1f[...] = jnp.dot(y0_all, wih1_f, preferred_element_type=f32) + bih1_f
    gi1b[...] = jnp.dot(y0_all, wih1_b, preferred_element_type=f32) + bih1_b

    h_cat = jnp.zeros((Bp, H2), f32)
    for t in range(T):
        h_cat = step(t, h_cat, gi1f, gi1b, whh1_bd, bhh1, store_y0=False)

    # ---- final Linear fused into epilogue: h_cat == [h_fwd_fin | h_bwd_fin] -
    out_full = jnp.dot(h_cat, ow, preferred_element_type=f32) + ob   # (Bp, 3H)
    out_ref[...] = out_full[:, :O].astype(out_ref.dtype)


# ---------------------------------------------------------------------------
# Host-side packing of all parameters into one contiguous f32 slab
# ---------------------------------------------------------------------------
def _pack_params(params):
    H, O = HIDDEN_DIM, OUTPUT_DIM
    f32 = jnp.float32
    W = 6 * H                       # slab lane width (192)

    def mm(w):                      # torch (out, in) -> matmul layout (in, out)
        return jnp.asarray(w, f32).T

    def bdiag(a, b):                # (H,3H),(H,3H) -> (2H,6H) block diagonal
        z = jnp.zeros_like(a)
        return jnp.concatenate(
            [jnp.concatenate([a, z], axis=1),
             jnp.concatenate([z, b], axis=1)], axis=0)

    rows, offs = [], {}
    nrows = 0

    def add(name, mat):
        nonlocal nrows
        mat = jnp.asarray(mat, f32)
        if mat.ndim == 1:
            mat = mat.reshape(1, -1)
        offs[name] = (nrows, tuple(mat.shape))
        rows.append(jnp.pad(mat, ((0, 0), (0, W - mat.shape[1]))))
        nrows += mat.shape[0]

    (wih0f, whh0f, bih0f, bhh0f) = params["gru"][0][0]
    (wih0b, whh0b, bih0b, bhh0b) = params["gru"][0][1]
    (wih1f, whh1f, bih1f, bhh1f) = params["gru"][1][0]
    (wih1b, whh1b, bih1b, bhh1b) = params["gru"][1][1]

    add("wih0_f", mm(wih0f))
    add("wih0_b", mm(wih0b))
    add("whh0_bd", bdiag(mm(whh0f), mm(whh0b)))
    add("wih1_f", mm(wih1f))
    add("wih1_b", mm(wih1b))
    add("whh1_bd", bdiag(mm(whh1f), mm(whh1b)))
    add("ow", jnp.pad(mm(params["out_w"]), ((0, 0), (0, 3 * H - O))))
    add("ob", jnp.pad(jnp.asarray(params["out_b"], f32), (0, 3 * H - O)))
    add("bih0_f", bih0f)
    add("bih0_b", bih0b)
    add("bhh0", jnp.concatenate([bhh0f, bhh0b]))
    add("bih1_f", bih1f)
    add("bih1_b", bih1b)
    add("bhh1", jnp.concatenate([bhh1f, bhh1b]))

    slab = jnp.concatenate(rows, axis=0)
    pad_r = (-slab.shape[0]) % 8
    if pad_r:
        slab = jnp.pad(slab, ((0, pad_r), (0, 0)))
    return slab, offs


def bert_gru_forward_pallas(params, text):
    """Mirrors BERTGRUSentiment.forward (eval mode) with one fused kernel."""
    assert N_LAYERS == 2 and BIDIRECTIONAL, "fused kernel is built for 2-layer bi-GRU"
    B, T = text.shape
    E, H, O = EMB_DIM, HIDDEN_DIM, OUTPUT_DIM
    Bp = B_PAD

    # embedded = self.bert(text)[0] (stand-in: embedding lookup)  -> (B, T, E)
    # TODO(synk): full pretrained BERT encoder has no clean in-script Pallas
    # equivalent; a deterministic embedding table stands in for bert(text)[0].
    embedded = params["bert_embedding"][text]
    x = jnp.transpose(embedded, (1, 0, 2)).astype(jnp.float32)   # (T, B, E)
    x = jnp.pad(x, ((0, 0), (0, Bp - B), (0, 0)))                # (T, Bp, E)
    x2d = x.reshape(T * Bp, E)                                   # sequence-major rows

    slab, offs = _pack_params(params)                            # ONE weight DMA

    kernel = functools.partial(_fused_bigru_kernel,
                               T=T, Bp=Bp, H=H, O=O, offs=offs)

    out_pad = pl.pallas_call(
        kernel,
        out_shape=jax.ShapeDtypeStruct((Bp, O), jnp.float32),
        grid=(1,),
        in_specs=[
            pl.BlockSpec(x2d.shape, lambda i: (0, 0)),           # activations
            pl.BlockSpec(slab.shape, lambda i: (0, 0)),          # packed params
        ],
        out_specs=pl.BlockSpec((Bp, O), lambda i: (0, 0)),
        scratch_shapes=[
            pltpu.VMEM((T * Bp, 3 * H), jnp.float32),   # gi layer0 fwd
            pltpu.VMEM((T * Bp, 3 * H), jnp.float32),   # gi layer0 bwd
            pltpu.VMEM((T * Bp, 2 * H), jnp.float32),   # y  layer0 (lane-concat f|b)
            pltpu.VMEM((T * Bp, 3 * H), jnp.float32),   # gi layer1 fwd
            pltpu.VMEM((T * Bp, 3 * H), jnp.float32),   # gi layer1 bwd
        ],
        compiler_params=pltpu.CompilerParams(
            dimension_semantics=("arbitrary",)),
    )(x2d, slab)

    # drop batch padding; self.dropout(hidden) is eval-mode identity.
    return out_pad[:B]


# ---------------------------------------------------------------------------
# Parameter init (deterministic, PyTorch-like uniform(-1/sqrt(H), 1/sqrt(H)))
# ---------------------------------------------------------------------------
def init_params(key):
    num_dirs = 2 if BIDIRECTIONAL else 1
    keys = iter(jax.random.split(key, 64))
    params = {}
    params["bert_embedding"] = 0.02 * jax.random.normal(
        next(keys), (VOCAB_SIZE, EMB_DIM), jnp.float32)

    bound = float(1.0 / np.sqrt(HIDDEN_DIM))
    gru = []
    for layer in range(N_LAYERS):
        in_dim = EMB_DIM if layer == 0 else HIDDEN_DIM * num_dirs
        dirs = []
        for _ in range(num_dirs):
            w_ih = jax.random.uniform(next(keys), (3 * HIDDEN_DIM, in_dim),
                                      jnp.float32, -bound, bound)
            w_hh = jax.random.uniform(next(keys), (3 * HIDDEN_DIM, HIDDEN_DIM),
                                      jnp.float32, -bound, bound)
            b_ih = jax.random.uniform(next(keys), (3 * HIDDEN_DIM,),
                                      jnp.float32, -bound, bound)
            b_hh = jax.random.uniform(next(keys), (3 * HIDDEN_DIM,),
                                      jnp.float32, -bound, bound)
            dirs.append((w_ih, w_hh, b_ih, b_hh))
        gru.append(dirs)
    params["gru"] = gru

    in_feat = HIDDEN_DIM * (2 if BIDIRECTIONAL else 1)
    bo = float(1.0 / np.sqrt(in_feat))
    params["out_w"] = jax.random.uniform(next(keys), (OUTPUT_DIM, in_feat),
                                         jnp.float32, -bo, bo)
    params["out_b"] = jax.random.uniform(next(keys), (OUTPUT_DIM,),
                                         jnp.float32, -bo, bo)
    return params


# ---------------------------------------------------------------------------
# Pure-JAX reference (lax.scan GRU) for a correctness check
# ---------------------------------------------------------------------------
def gru_ref_single(x, w_ih, w_hh, b_ih, b_hh):
    H = w_hh.shape[1]

    def step(h, x_t):
        gi = x_t @ w_ih.T + b_ih
        gh = h @ w_hh.T + b_hh
        r = jax.nn.sigmoid(gi[:, :H] + gh[:, :H])
        z = jax.nn.sigmoid(gi[:, H:2 * H] + gh[:, H:2 * H])
        n = jnp.tanh(gi[:, 2 * H:] + r * gh[:, 2 * H:])
        h_new = (1.0 - z) * n + z * h
        return h_new, h_new

    h0 = jnp.zeros((x.shape[1], H), jnp.float32)
    hT, ys = jax.lax.scan(step, h0, x.astype(jnp.float32))
    return ys, hT


def forward_ref(params, text):
    embedded = params["bert_embedding"][text]
    x = jnp.transpose(embedded, (1, 0, 2)).astype(jnp.float32)   # (T, B, E)
    finals = []
    inp = x
    for layer in range(N_LAYERS):
        dir_seqs = []
        for d in range(2 if BIDIRECTIONAL else 1):
            w_ih, w_hh, b_ih, b_hh = params["gru"][layer][d]
            xi = inp if d == 0 else jnp.flip(inp, axis=0)
            ys, hT = gru_ref_single(xi, w_ih, w_hh, b_ih, b_hh)
            if d == 1:
                ys = jnp.flip(ys, axis=0)
            dir_seqs.append(ys)
            finals.append(hT)
        inp = jnp.concatenate(dir_seqs, axis=-1) if BIDIRECTIONAL else dir_seqs[0]
    hidden = (jnp.concatenate([finals[-2], finals[-1]], axis=-1)
              if BIDIRECTIONAL else finals[-1])
    return hidden @ params["out_w"].T + params["out_b"]


# ---------------------------------------------------------------------------
if __name__ == "__main__":
    key = jax.random.PRNGKey(0)
    k_params, k_text = jax.random.split(key)

    params = init_params(k_params)
    text = jax.random.randint(k_text, (BATCH, SEQ_LEN), 0, VOCAB_SIZE,
                              dtype=jnp.int32)

    pallas_forward = jax.jit(bert_gru_forward_pallas)
    out = jax.block_until_ready(pallas_forward(params, text))

    ref = jax.block_until_ready(forward_ref(params, text))

    assert out.shape == (BATCH, OUTPUT_DIM), out.shape
    np.testing.assert_allclose(np.asarray(out), np.asarray(ref),
                               rtol=1e-4, atol=1e-4)
    print("KERNEL_OK")
</pallas_src>

<mosaic_0001>
module attributes {stable_mosaic.version = 11 : i64} {
  func.func @_fused_bigru_kernel(%arg0: i32, %arg1: memref<64x32xf32, #tpu.memory_space<vmem>>, %arg2: memref<392x192xf32, #tpu.memory_space<vmem>>, %arg3: memref<8x3xf32, #tpu.memory_space<vmem>>, %arg4: memref<64x96xf32, #tpu.memory_space<vmem>>, %arg5: memref<64x96xf32, #tpu.memory_space<vmem>>, %arg6: memref<64x64xf32, #tpu.memory_space<vmem>>, %arg7: memref<64x96xf32, #tpu.memory_space<vmem>>, %arg8: memref<64x96xf32, #tpu.memory_space<vmem>>) attributes {dimension_semantics = [#tpu.dimension_semantics<arbitrary>], iteration_bounds = array<i64: 1>, scalar_prefetch = 0 : i64, scratch_operands = 5 : i64, tpu.core_type = #tpu.core_type<tc>, window_params = [{pipeline_mode = #tpu.pipeline_mode<synchronous>, transform_indices = @transform_0, window_bounds = array<i64: 64, 32>}, {pipeline_mode = #tpu.pipeline_mode<synchronous>, transform_indices = @transform_1, window_bounds = array<i64: 392, 192>}, {pipeline_mode = #tpu.pipeline_mode<synchronous>, transform_indices = @transform_2, window_bounds = array<i64: 8, 3>}]} {
    %c0 = arith.constant 0 : index
    %c0_0 = arith.constant 0 : index
    %0 = vector.load %arg2[%c0, %c0_0] : memref<392x192xf32, #tpu.memory_space<vmem>>, vector<32x96xf32>
    %c32 = arith.constant 32 : index
    %c0_1 = arith.constant 0 : index
    %1 = vector.load %arg2[%c32, %c0_1] : memref<392x192xf32, #tpu.memory_space<vmem>>, vector<32x96xf32>
    %c64 = arith.constant 64 : index
    %c0_2 = arith.constant 0 : index
    %2 = vector.load %arg2[%c64, %c0_2] : memref<392x192xf32, #tpu.memory_space<vmem>>, vector<64x192xf32>
    %c128 = arith.constant 128 : index
    %c0_3 = arith.constant 0 : index
    %3 = vector.load %arg2[%c128, %c0_3] : memref<392x192xf32, #tpu.memory_space<vmem>>, vector<64x96xf32>
    %c192 = arith.constant 192 : index
    %c0_4 = arith.constant 0 : index
    %4 = vector.load %arg2[%c192, %c0_4] : memref<392x192xf32, #tpu.memory_space<vmem>>, vector<64x96xf32>
    %c256 = arith.constant 256 : index
    %c0_5 = arith.constant 0 : index
    %5 = vector.load %arg2[%c256, %c0_5] : memref<392x192xf32, #tpu.memory_space<vmem>>, vector<64x192xf32>
    %c320 = arith.constant 320 : index
    %c0_6 = arith.constant 0 : index
    %6 = vector.load %arg2[%c320, %c0_6] : memref<392x192xf32, #tpu.memory_space<vmem>>, vector<64x96xf32>
    %c384 = arith.constant 384 : index
    %c0_7 = arith.constant 0 : index
    %7 = vector.load %arg2[%c384, %c0_7] : memref<392x192xf32, #tpu.memory_space<vmem>>, vector<1x96xf32>
    %c385 = arith.constant 385 : index
    %c0_8 = arith.constant 0 : index
    %8 = vector.load %arg2[%c385, %c0_8] : memref<392x192xf32, #tpu.memory_space<vmem>>, vector<1x96xf32>
    %c386 = arith.constant 386 : index
    %c0_9 = arith.constant 0 : index
    %9 = vector.load %arg2[%c386, %c0_9] : memref<392x192xf32, #tpu.memory_space<vmem>>, vector<1x96xf32>
    %c387 = arith.constant 387 : index
    %c0_10 = arith.constant 0 : index
    %10 = vector.load %arg2[%c387, %c0_10] : memref<392x192xf32, #tpu.memory_space<vmem>>, vector<1x192xf32>
    %c388 = arith.constant 388 : index
    %c0_11 = arith.constant 0 : index
    %11 = vector.load %arg2[%c388, %c0_11] : memref<392x192xf32, #tpu.memory_space<vmem>>, vector<1x96xf32>
    %c389 = arith.constant 389 : index
    %c0_12 = arith.constant 0 : index
    %12 = vector.load %arg2[%c389, %c0_12] : memref<392x192xf32, #tpu.memory_space<vmem>>, vector<1x96xf32>
    %c390 = arith.constant 390 : index
    %c0_13 = arith.constant 0 : index
    %13 = vector.load %arg2[%c390, %c0_13] : memref<392x192xf32, #tpu.memory_space<vmem>>, vector<1x192xf32>
    %c0_14 = arith.constant 0 : index
    %c0_15 = arith.constant 0 : index
    %14 = vector.load %arg1[%c0_14, %c0_15] : memref<64x32xf32, #tpu.memory_space<vmem>>, vector<64x32xf32>
    %cst = arith.constant dense<0.000000e+00> : vector<64x96xf32>
    %15 = tpu.matmul %14, %0, %cst {dimension_numbers = #tpu.dot_dimension_numbers<[1], [0], [0], [1], [0, 0, 1, 1], [], []>} : vector<64x32xf32>, vector<32x96xf32>, vector<64x96xf32> -> vector<64x96xf32>
    %16 = vector.broadcast %8 : vector<1x96xf32> to vector<64x96xf32>
    %17 = arith.addf %15, %16 : vector<64x96xf32>
    %c0_16 = arith.constant 0 : index
    %c0_17 = arith.constant 0 : index
    %18 = vector.load %arg4[%c0_16, %c0_17] : memref<64x96xf32, #tpu.memory_space<vmem>>, vector<64x96xf32>
    tpu.vector_store %arg4[%c0_16, %c0_17], %17 {strides = array<i32>} : memref<64x96xf32, #tpu.memory_space<vmem>>, vector<64x96xf32>,
    %cst_18 = arith.constant dense<0.000000e+00> : vector<64x96xf32>
    %19 = tpu.matmul %14, %1, %cst_18 {dimension_numbers = #tpu.dot_dimension_numbers<[1], [0], [0], [1], [0, 0, 1, 1], [], []>} : vector<64x32xf32>, vector<32x96xf32>, vector<64x96xf32> -> vector<64x96xf32>
    %20 = vector.broadcast %9 : vector<1x96xf32> to vector<64x96xf32>
    %21 = arith.addf %19, %20 : vector<64x96xf32>
    %c0_19 = arith.constant 0 : index
    %c0_20 = arith.constant 0 : index
    %22 = vector.load %arg5[%c0_19, %c0_20] : memref<64x96xf32, #tpu.memory_space<vmem>>, vector<64x96xf32>
    tpu.vector_store %arg5[%c0_19, %c0_20], %21 {strides = array<i32>} : memref<64x96xf32, #tpu.memory_space<vmem>>, vector<64x96xf32>,
    %cst_21 = arith.constant 0.000000e+00 : f32
    %23 = vector.broadcast %cst_21 : f32 to vector<8x64xf32>
    %cst_22 = arith.constant dense<0.000000e+00> : vector<8x192xf32>
    %24 = tpu.matmul %23, %2, %cst_22 {dimension_numbers = #tpu.dot_dimension_numbers<[1], [0], [0], [1], [0, 0, 1, 1], [], []>} : vector<8x64xf32>, vector<64x192xf32>, vector<8x192xf32> -> vector<8x192xf32>
    %25 = vector.broadcast %10 : vector<1x192xf32> to vector<8x192xf32>
    %26 = arith.addf %24, %25 : vector<8x192xf32>
    %c0_23 = arith.constant 0 : index
    %c0_24 = arith.constant 0 : index
    %27 = vector.load %arg4[%c0_23, %c0_24] : memref<64x96xf32, #tpu.memory_space<vmem>>, vector<8x96xf32>
    %28 = vector.extract_strided_slice %26 {offsets = [0, 0], sizes = [8, 96], strides = [1, 1]} : vector<8x192xf32> to vector<8x96xf32>
    %29 = vector.extract_strided_slice %23 {offsets = [0, 0], sizes = [8, 32], strides = [1, 1]} : vector<8x64xf32> to vector<8x32xf32>
    %30 = arith.addf %27, %28 : vector<8x96xf32>
    %31 = vector.extract_strided_slice %30 {offsets = [0, 0], sizes = [8, 64], strides = [1, 1]} : vector<8x96xf32> to vector<8x64xf32>
    %32 = arith.negf %31 : vector<8x64xf32>
    %33 = math.exp %32 : vector<8x64xf32>
    %cst_25 = arith.constant 1.000000e+00 : f32
    %34 = vector.broadcast %cst_25 : f32 to vector<8x64xf32>
    %35 = arith.addf %34, %33 : vector<8x64xf32>
    %36 = arith.divf %34, %35 : vector<8x64xf32>
    %37 = vector.extract_strided_slice %36 {offsets = [0, 0], sizes = [8, 32], strides = [1, 1]} : vector<8x64xf32> to vector<8x32xf32>
    %38 = vector.extract_strided_slice %36 {offsets = [0, 32], sizes = [8, 32], strides = [1, 1]} : vector<8x64xf32> to vector<8x32xf32>
    %39 = vector.extract_strided_slice %27 {offsets = [0, 64], sizes = [8, 32], strides = [1, 1]} : vector<8x96xf32> to vector<8x32xf32>
    %40 = vector.extract_strided_slice %28 {offsets = [0, 64], sizes = [8, 32], strides = [1, 1]} : vector<8x96xf32> to vector<8x32xf32>
    %41 = arith.mulf %37, %40 : vector<8x32xf32>
    %42 = arith.addf %39, %41 : vector<8x32xf32>
    %43 = math.tanh %42 : vector<8x32xf32>
    %cst_26 = arith.constant 1.000000e+00 : f32
    %44 = vector.broadcast %cst_26 : f32 to vector<8x32xf32>
    %45 = arith.subf %44, %38 : vector<8x32xf32>
    %46 = arith.mulf %45, %43 : vector<8x32xf32>
    %47 = arith.mulf %38, %29 : vector<8x32xf32>
    %48 = arith.addf %46, %47 : vector<8x32xf32>
    %c56 = arith.constant 56 : index
    %c0_27 = arith.constant 0 : index
    %49 = vector.load %arg5[%c56, %c0_27] : memref<64x96xf32, #tpu.memory_space<vmem>>, vector<8x96xf32>
    %50 = vector.extract_strided_slice %26 {offsets = [0, 96], sizes = [8, 96], strides = [1, 1]} : vector<8x192xf32> to vector<8x96xf32>
    %51 = vector.extract_strided_slice %23 {offsets = [0, 32], sizes = [8, 32], strides = [1, 1]} : vector<8x64xf32> to vector<8x32xf32>
    %52 = arith.addf %49, %50 : vector<8x96xf32>
    %53 = vector.extract_strided_slice %52 {offsets = [0, 0], sizes = [8, 64], strides = [1, 1]} : vector<8x96xf32> to vector<8x64xf32>
    %54 = arith.negf %53 : vector<8x64xf32>
    %55 = math.exp %54 : vector<8x64xf32>
    %cst_28 = arith.constant 1.000000e+00 : f32
    %56 = vector.broadcast %cst_28 : f32 to vector<8x64xf32>
    %57 = arith.addf %56, %55 : vector<8x64xf32>
    %58 = arith.divf %56, %57 : vector<8x64xf32>
    %59 = vector.extract_strided_slice %58 {offsets = [0, 0], sizes = [8, 32], strides = [1, 1]} : vector<8x64xf32> to vector<8x32xf32>
    %60 = vector.extract_strided_slice %58 {offsets = [0, 32], sizes = [8, 32], strides = [1, 1]} : vector<8x64xf32> to vector<8x32xf32>
    %61 = vector.extract_strided_slice %49 {offsets = [0, 64], sizes = [8, 32], strides = [1, 1]} : vector<8x96xf32> to vector<8x32xf32>
    %62 = vector.extract_strided_slice %50 {offsets = [0, 64], sizes = [8, 32], strides = [1, 1]} : vector<8x96xf32> to vector<8x32xf32>
    %63 = arith.mulf %59, %62 : vector<8x32xf32>
    %64 = arith.addf %61, %63 : vector<8x32xf32>
    %65 = math.tanh %64 : vector<8x32xf32>
    %cst_29 = arith.constant 1.000000e+00 : f32
    %66 = vector.broadcast %cst_29 : f32 to vector<8x32xf32>
    %67 = arith.subf %66, %60 : vector<8x32xf32>
    %68 = arith.mulf %67, %65 : vector<8x32xf32>
    %69 = arith.mulf %60, %51 : vector<8x32xf32>
    %70 = arith.addf %68, %69 : vector<8x32xf32>
    %c0_30 = arith.constant 0 : index
    %c0_31 = arith.constant 0 : index
    %71 = vector.load %arg6[%c0_30, %c0_31] : memref<64x64xf32, #tpu.memory_space<vmem>>, vector<8x32xf32>
    tpu.vector_store %arg6[%c0_30, %c0_31], %48 {strides = array<i32>} : memref<64x64xf32, #tpu.memory_space<vmem>>, vector<8x32xf32>,
    %c56_32 = arith.constant 56 : index
    %c32_33 = arith.constant 32 : index
    %72 = vector.load %arg6[%c56_32, %c32_33] : memref<64x64xf32, #tpu.memory_space<vmem>>, vector<8x32xf32>
    tpu.vector_store %arg6[%c56_32, %c32_33], %70 {strides = array<i32>} : memref<64x64xf32, #tpu.memory_space<vmem>>, vector<8x32xf32>,
    %73 = tpu.concatenate %48, %70 in 1 : vector<8x32xf32>, vector<8x32xf32> -> vector<8x64xf32>
    %cst_34 = arith.constant dense<0.000000e+00> : vector<8x192xf32>
    %74 = tpu.matmul %73, %2, %cst_34 {dimension_numbers = #tpu.dot_dimension_numbers<[1], [0], [0], [1], [0, 0, 1, 1], [], []>} : vector<8x64xf32>, vector<64x192xf32>, vector<8x192xf32> -> vector<8x192xf32>
    %75 = vector.broadcast %10 : vector<1x192xf32> to vector<8x192xf32>
    %76 = arith.addf %74, %75 : vector<8x192xf32>
    %c8 = arith.constant 8 : index
    %c0_35 = arith.constant 0 : index
    %77 = vector.load %arg4[%c8, %c0_35] : memref<64x96xf32, #tpu.memory_space<vmem>>, vector<8x96xf32>
    %78 = vector.extract_strided_slice %76 {offsets = [0, 0], sizes = [8, 96], strides = [1, 1]} : vector<8x192xf32> to vector<8x96xf32>
    %79 = vector.extract_strided_slice %73 {offsets = [0, 0], sizes = [8, 32], strides = [1, 1]} : vector<8x64xf32> to vector<8x32xf32>
    %80 = arith.addf %77, %78 : vector<8x96xf32>
    %81 = vector.extract_strided_slice %80 {offsets = [0, 0], sizes = [8, 64], strides = [1, 1]} : vector<8x96xf32> to vector<8x64xf32>
    %82 = arith.negf %81 : vector<8x64xf32>
    %83 = math.exp %82 : vector<8x64xf32>
    %cst_36 = arith.constant 1.000000e+00 : f32
    %84 = vector.broadcast %cst_36 : f32 to vector<8x64xf32>
    %85 = arith.addf %84, %83 : vector<8x64xf32>
    %86 = arith.divf %84, %85 : vector<8x64xf32>
    %87 = vector.extract_strided_slice %86 {offsets = [0, 0], sizes = [8, 32], strides = [1, 1]} : vector<8x64xf32> to vector<8x32xf32>
    %88 = vector.extract_strided_slice %86 {offsets = [0, 32], sizes = [8, 32], strides = [1, 1]} : vector<8x64xf32> to vector<8x32xf32>
    %89 = vector.extract_strided_slice %77 {offsets = [0, 64], sizes = [8, 32], strides = [1, 1]} : vector<8x96xf32> to vector<8x32xf32>
    %90 = vector.extract_strided_slice %78 {offsets = [0, 64], sizes = [8, 32], strides = [1, 1]} : vector<8x96xf32> to vector<8x32xf32>
    %91 = arith.mulf %87, %90 : vector<8x32xf32>
    %92 = arith.addf %89, %91 : vector<8x32xf32>
    %93 = math.tanh %92 : vector<8x32xf32>
    %cst_37 = arith.constant 1.000000e+00 : f32
    %94 = vector.broadcast %cst_37 : f32 to vector<8x32xf32>
    %95 = arith.subf %94, %88 : vector<8x32xf32>
    %96 = arith.mulf %95, %93 : vector<8x32xf32>
    %97 = arith.mulf %88, %79 : vector<8x32xf32>
    %98 = arith.addf %96, %97 : vector<8x32xf32>
    %c48 = arith.constant 48 : index
    %c0_38 = arith.constant 0 : index
    %99 = vector.load %arg5[%c48, %c0_38] : memref<64x96xf32, #tpu.memory_space<vmem>>, vector<8x96xf32>
    %100 = vector.extract_strided_slice %76 {offsets = [0, 96], sizes = [8, 96], strides = [1, 1]} : vector<8x192xf32> to vector<8x96xf32>
    %101 = vector.extract_strided_slice %73 {offsets = [0, 32], sizes = [8, 32], strides = [1, 1]} : vector<8x64xf32> to vector<8x32xf32>
    %102 = arith.addf %99, %100 : vector<8x96xf32>
    %103 = vector.extract_strided_slice %102 {offsets = [0, 0], sizes = [8, 64], strides = [1, 1]} : vector<8x96xf32> to vector<8x64xf32>
    %104 = arith.negf %103 : vector<8x64xf32>
    %105 = math.exp %104 : vector<8x64xf32>
    %cst_39 = arith.constant 1.000000e+00 : f32
    %106 = vector.broadcast %cst_39 : f32 to vector<8x64xf32>
    %107 = arith.addf %106, %105 : vector<8x64xf32>
    %108 = arith.divf %106, %107 : vector<8x64xf32>
    %109 = vector.extract_strided_slice %108 {offsets = [0, 0], sizes = [8, 32], strides = [1, 1]} : vector<8x64xf32> to vector<8x32xf32>
    %110 = vector.extract_strided_slice %108 {offsets = [0, 32], sizes = [8, 32], strides = [1, 1]} : vector<8x64xf32> to vector<8x32xf32>
    %111 = vector.extract_strided_slice %99 {offsets = [0, 64], sizes = [8, 32], strides = [1, 1]} : vector<8x96xf32> to vector<8x32xf32>
    %112 = vector.extract_strided_slice %100 {offsets = [0, 64], sizes = [8, 32], strides = [1, 1]} : vector<8x96xf32> to vector<8x32xf32>
    %113 = arith.mulf %109, %112 : vector<8x32xf32>
    %114 = arith.addf %111, %113 : vector<8x32xf32>
    %115 = math.tanh %114 : vector<8x32xf32>
    %cst_40 = arith.constant 1.000000e+00 : f32
    %116 = vector.broadcast %cst_40 : f32 to vector<8x32xf32>
    %117 = arith.subf %116, %110 : vector<8x32xf32>
    %118 = arith.mulf %117, %115 : vector<8x32xf32>
    %119 = arith.mulf %110, %101 : vector<8x32xf32>
    %120 = arith.addf %118, %119 : vector<8x32xf32>
    %c8_41 = arith.constant 8 : index
    %c0_42 = arith.constant 0 : index
    %121 = vector.load %arg6[%c8_41, %c0_42] : memref<64x64xf32, #tpu.memory_space<vmem>>, vector<8x32xf32>
    tpu.vector_store %arg6[%c8_41, %c0_42], %98 {strides = array<i32>} : memref<64x64xf32, #tpu.memory_space<vmem>>, vector<8x32xf32>,
    %c48_43 = arith.constant 48 : index
    %c32_44 = arith.constant 32 : index
    %122 = vector.load %arg6[%c48_43, %c32_44] : memref<64x64xf32, #tpu.memory_space<vmem>>, vector<8x32xf32>
    tpu.vector_store %arg6[%c48_43, %c32_44], %120 {strides = array<i32>} : memref<64x64xf32, #tpu.memory_space<vmem>>, vector<8x32xf32>,
    %123 = tpu.concatenate %98, %120 in 1 : vector<8x32xf32>, vector<8x32xf32> -> vector<8x64xf32>
    %cst_45 = arith.constant dense<0.000000e+00> : vector<8x192xf32>
    %124 = tpu.matmul %123, %2, %cst_45 {dimension_numbers = #tpu.dot_dimension_numbers<[1], [0], [0], [1], [0, 0, 1, 1], [], []>} : vector<8x64xf32>, vector<64x192xf32>, vector<8x192xf32> -> vector<8x192xf32>
    %125 = vector.broadcast %10 : vector<1x192xf32> to vector<8x192xf32>
    %126 = arith.addf %124, %125 : vector<8x192xf32>
    %c16 = arith.constant 16 : index
    %c0_46 = arith.constant 0 : index
    %127 = vector.load %arg4[%c16, %c0_46] : memref<64x96xf32, #tpu.memory_space<vmem>>, vector<8x96xf32>
    %128 = vector.extract_strided_slice %126 {offsets = [0, 0], sizes = [8, 96], strides = [1, 1]} : vector<8x192xf32> to vector<8x96xf32>
    %129 = vector.extract_strided_slice %123 {offsets = [0, 0], sizes = [8, 32], strides = [1, 1]} : vector<8x64xf32> to vector<8x32xf32>
    %130 = arith.addf %127, %128 : vector<8x96xf32>
    %131 = vector.extract_strided_slice %130 {offsets = [0, 0], sizes = [8, 64], strides = [1, 1]} : vector<8x96xf32> to vector<8x64xf32>
    %132 = arith.negf %131 : vector<8x64xf32>
    %133 = math.exp %132 : vector<8x64xf32>
    %cst_47 = arith.constant 1.000000e+00 : f32
    %134 = vector.broadcast %cst_47 : f32 to vector<8x64xf32>
    %135 = arith.addf %134, %133 : vector<8x64xf32>
    %136 = arith.divf %134, %135 : vector<8x64xf32>
    %137 = vector.extract_strided_slice %136 {offsets = [0, 0], sizes = [8, 32], strides = [1, 1]} : vector<8x64xf32> to vector<8x32xf32>
    %138 = vector.extract_strided_slice %136 {offsets = [0, 32], sizes = [8, 32], strides = [1, 1]} : vector<8x64xf32> to vector<8x32xf32>
    %139 = vector.extract_strided_slice %127 {offsets = [0, 64], sizes = [8, 32], strides = [1, 1]} : vector<8x96xf32> to vector<8x32xf32>
    %140 = vector.extract_strided_slice %128 {offsets = [0, 64], sizes = [8, 32], strides = [1, 1]} : vector<8x96xf32> to vector<8x32xf32>
    %141 = arith.mulf %137, %140 : vector<8x32xf32>
    %142 = arith.addf %139, %141 : vector<8x32xf32>
    %143 = math.tanh %142 : vector<8x32xf32>
    %cst_48 = arith.constant 1.000000e+00 : f32
    %144 = vector.broadcast %cst_48 : f32 to vector<8x32xf32>
    %145 = arith.subf %144, %138 : vector<8x32xf32>
    %146 = arith.mulf %145, %143 : vector<8x32xf32>
    %147 = arith.mulf %138, %129 : vector<8x32xf32>
    %148 = arith.addf %146, %147 : vector<8x32xf32>
    %c40 = arith.constant 40 : index
    %c0_49 = arith.constant 0 : index
    %149 = vector.load %arg5[%c40, %c0_49] : memref<64x96xf32, #tpu.memory_space<vmem>>, vector<8x96xf32>
    %150 = vector.extract_strided_slice %126 {offsets = [0, 96], sizes = [8, 96], strides = [1, 1]} : vector<8x192xf32> to vector<8x96xf32>
    %151 = vector.extract_strided_slice %123 {offsets = [0, 32], sizes = [8, 32], strides = [1, 1]} : vector<8x64xf32> to vector<8x32xf32>
    %152 = arith.addf %149, %150 : vector<8x96xf32>
    %153 = vector.extract_strided_slice %152 {offsets = [0, 0], sizes = [8, 64], strides = [1, 1]} : vector<8x96xf32> to vector<8x64xf32>
    %154 = arith.negf %153 : vector<8x64xf32>
    %155 = math.exp %154 : vector<8x64xf32>
    %cst_50 = arith.constant 1.000000e+00 : f32
    %156 = vector.broadcast %cst_50 : f32 to vector<8x64xf32>
    %157 = arith.addf %156, %155 : vector<8x64xf32>
    %158 = arith.divf %156, %157 : vector<8x64xf32>
    %159 = vector.extract_strided_slice %158 {offsets = [0, 0], sizes = [8, 32], strides = [1, 1]} : vector<8x64xf32> to vector<8x32xf32>
    %160 = vector.extract_strided_slice %158 {offsets = [0, 32], sizes = [8, 32], strides = [1, 1]} : vector<8x64xf32> to vector<8x32xf32>
    %161 = vector.extract_strided_slice %149 {offsets = [0, 64], sizes = [8, 32], strides = [1, 1]} : vector<8x96xf32> to vector<8x32xf32>
    %162 = vector.extract_strided_slice %150 {offsets = [0, 64], sizes = [8, 32], strides = [1, 1]} : vector<8x96xf32> to vector<8x32xf32>
    %163 = arith.mulf %159, %162 : vector<8x32xf32>
    %164 = arith.addf %161, %163 : vector<8x32xf32>
    %165 = math.tanh %164 : vector<8x32xf32>
    %cst_51 = arith.constant 1.000000e+00 : f32
    %166 = vector.broadcast %cst_51 : f32 to vector<8x32xf32>
    %167 = arith.subf %166, %160 : vector<8x32xf32>
    %168 = arith.mulf %167, %165 : vector<8x32xf32>
    %169 = arith.mulf %160, %151 : vector<8x32xf32>
    %170 = arith.addf %168, %169 : vector<8x32xf32>
    %c16_52 = arith.constant 16 : index
    %c0_53 = arith.constant 0 : index
    %171 = vector.load %arg6[%c16_52, %c0_53] : memref<64x64xf32, #tpu.memory_space<vmem>>, vector<8x32xf32>
    tpu.vector_store %arg6[%c16_52, %c0_53], %148 {strides = array<i32>} : memref<64x64xf32, #tpu.memory_space<vmem>>, vector<8x32xf32>,
    %c40_54 = arith.constant 40 : index
    %c32_55 = arith.constant 32 : index
    %172 = vector.load %arg6[%c40_54, %c32_55] : memref<64x64xf32, #tpu.memory_space<vmem>>, vector<8x32xf32>
    tpu.vector_store %arg6[%c40_54, %c32_55], %170 {strides = array<i32>} : memref<64x64xf32, #tpu.memory_space<vmem>>, vector<8x32xf32>,
    %173 = tpu.concatenate %148, %170 in 1 : vector<8x32xf32>, vector<8x32xf32> -> vector<8x64xf32>
    %cst_56 = arith.constant dense<0.000000e+00> : vector<8x192xf32>
    %174 = tpu.matmul %173, %2, %cst_56 {dimension_numbers = #tpu.dot_dimension_numbers<[1], [0], [0], [1], [0, 0, 1, 1], [], []>} : vector<8x64xf32>, vector<64x192xf32>, vector<8x192xf32> -> vector<8x192xf32>
    %175 = vector.broadcast %10 : vector<1x192xf32> to vector<8x192xf32>
    %176 = arith.addf %174, %175 : vector<8x192xf32>
    %c24 = arith.constant 24 : index
    %c0_57 = arith.constant 0 : index
    %177 = vector.load %arg4[%c24, %c0_57] : memref<64x96xf32, #tpu.memory_space<vmem>>, vector<8x96xf32>
    %178 = vector.extract_strided_slice %176 {offsets = [0, 0], sizes = [8, 96], strides = [1, 1]} : vector<8x192xf32> to vector<8x96xf32>
    %179 = vector.extract_strided_slice %173 {offsets = [0, 0], sizes = [8, 32], strides = [1, 1]} : vector<8x64xf32> to vector<8x32xf32>
    %180 = arith.addf %177, %178 : vector<8x96xf32>
    %181 = vector.extract_strided_slice %180 {offsets = [0, 0], sizes = [8, 64], strides = [1, 1]} : vector<8x96xf32> to vector<8x64xf32>
    %182 = arith.negf %181 : vector<8x64xf32>
    %183 = math.exp %182 : vector<8x64xf32>
    %cst_58 = arith.constant 1.000000e+00 : f32
    %184 = vector.broadcast %cst_58 : f32 to vector<8x64xf32>
    %185 = arith.addf %184, %183 : vector<8x64xf32>
    %186 = arith.divf %184, %185 : vector<8x64xf32>
    %187 = vector.extract_strided_slice %186 {offsets = [0, 0], sizes = [8, 32], strides = [1, 1]} : vector<8x64xf32> to vector<8x32xf32>
    %188 = vector.extract_strided_slice %186 {offsets = [0, 32], sizes = [8, 32], strides = [1, 1]} : vector<8x64xf32> to vector<8x32xf32>
    %189 = vector.extract_strided_slice %177 {offsets = [0, 64], sizes = [8, 32], strides = [1, 1]} : vector<8x96xf32> to vector<8x32xf32>
    %190 = vector.extract_strided_slice %178 {offsets = [0, 64], sizes = [8, 32], strides = [1, 1]} : vector<8x96xf32> to vector<8x32xf32>
    %191 = arith.mulf %187, %190 : vector<8x32xf32>
    %192 = arith.addf %189, %191 : vector<8x32xf32>
    %193 = math.tanh %192 : vector<8x32xf32>
    %cst_59 = arith.constant 1.000000e+00 : f32
    %194 = vector.broadcast %cst_59 : f32 to vector<8x32xf32>
    %195 = arith.subf %194, %188 : vector<8x32xf32>
    %196 = arith.mulf %195, %193 : vector<8x32xf32>
    %197 = arith.mulf %188, %179 : vector<8x32xf32>
    %198 = arith.addf %196, %197 : vector<8x32xf32>
    %c32_60 = arith.constant 32 : index
    %c0_61 = arith.constant 0 : index
    %199 = vector.load %arg5[%c32_60, %c0_61] : memref<64x96xf32, #tpu.memory_space<vmem>>, vector<8x96xf32>
    %200 = vector.extract_strided_slice %176 {offsets = [0, 96], sizes = [8, 96], strides = [1, 1]} : vector<8x192xf32> to vector<8x96xf32>
    %201 = vector.extract_strided_slice %173 {offsets = [0, 32], sizes = [8, 32], strides = [1, 1]} : vector<8x64xf32> to vector<8x32xf32>
    %202 = arith.addf %199, %200 : vector<8x96xf32>
    %203 = vector.extract_strided_slice %202 {offsets = [0, 0], sizes = [8, 64], strides = [1, 1]} : vector<8x96xf32> to vector<8x64xf32>
    %204 = arith.negf %203 : vector<8x64xf32>
    %205 = math.exp %204 : vector<8x64xf32>
    %cst_62 = arith.constant 1.000000e+00 : f32
    %206 = vector.broadcast %cst_62 : f32 to vector<8x64xf32>
    %207 = arith.addf %206, %205 : vector<8x64xf32>
    %208 = arith.divf %206, %207 : vector<8x64xf32>
    %209 = vector.extract_strided_slice %208 {offsets = [0, 0], sizes = [8, 32], strides = [1, 1]} : vector<8x64xf32> to vector<8x32xf32>
    %210 = vector.extract_strided_slice %208 {offsets = [0, 32], sizes = [8, 32], strides = [1, 1]} : vector<8x64xf32> to vector<8x32xf32>
    %211 = vector.extract_strided_slice %199 {offsets = [0, 64], sizes = [8, 32], strides = [1, 1]} : vector<8x96xf32> to vector<8x32xf32>
    %212 = vector.extract_strided_slice %200 {offsets = [0, 64], sizes = [8, 32], strides = [1, 1]} : vector<8x96xf32> to vector<8x32xf32>
    %213 = arith.mulf %209, %212 : vector<8x32xf32>
    %214 = arith.addf %211, %213 : vector<8x32xf32>
    %215 = math.tanh %214 : vector<8x32xf32>
    %cst_63 = arith.constant 1.000000e+00 : f32
    %216 = vector.broadcast %cst_63 : f32 to vector<8x32xf32>
    %217 = arith.subf %216, %210 : vector<8x32xf32>
    %218 = arith.mulf %217, %215 : vector<8x32xf32>
    %219 = arith.mulf %210, %201 : vector<8x32xf32>
    %220 = arith.addf %218, %219 : vector<8x32xf32>
    %c24_64 = arith.constant 24 : index
    %c0_65 = arith.constant 0 : index
    %221 = vector.load %arg6[%c24_64, %c0_65] : memref<64x64xf32, #tpu.memory_space<vmem>>, vector<8x32xf32>
    tpu.vector_store %arg6[%c24_64, %c0_65], %198 {strides = array<i32>} : memref<64x64xf32, #tpu.memory_space<vmem>>, vector<8x32xf32>,
    %c32_66 = arith.constant 32 : index
    %c32_67 = arith.constant 32 : index
    %222 = vector.load %arg6[%c32_66, %c32_67] : memref<64x64xf32, #tpu.memory_space<vmem>>, vector<8x32xf32>
    tpu.vector_store %arg6[%c32_66, %c32_67], %220 {strides = array<i32>} : memref<64x64xf32, #tpu.memory_space<vmem>>, vector<8x32xf32>,
    %223 = tpu.concatenate %198, %220 in 1 : vector<8x32xf32>, vector<8x32xf32> -> vector<8x64xf32>
    %cst_68 = arith.constant dense<0.000000e+00> : vector<8x192xf32>
    %224 = tpu.matmul %223, %2, %cst_68 {dimension_numbers = #tpu.dot_dimension_numbers<[1], [0], [0], [1], [0, 0, 1, 1], [], []>} : vector<8x64xf32>, vector<64x192xf32>, vector<8x192xf32> -> vector<8x192xf32>
    %225 = vector.broadcast %10 : vector<1x192xf32> to vector<8x192xf32>
    %226 = arith.addf %224, %225 : vector<8x192xf32>
    %c32_69 = arith.constant 32 : index
    %c0_70 = arith.constant 0 : index
    %227 = vector.load %arg4[%c32_69, %c0_70] : memref<64x96xf32, #tpu.memory_space<vmem>>, vector<8x96xf32>
    %228 = vector.extract_strided_slice %226 {offsets = [0, 0], sizes = [8, 96], strides = [1, 1]} : vector<8x192xf32> to vector<8x96xf32>
    %229 = vector.extract_strided_slice %223 {offsets = [0, 0], sizes = [8, 32], strides = [1, 1]} : vector<8x64xf32> to vector<8x32xf32>
    %230 = arith.addf %227, %228 : vector<8x96xf32>
    %231 = vector.extract_strided_slice %230 {offsets = [0, 0], sizes = [8, 64], strides = [1, 1]} : vector<8x96xf32> to vector<8x64xf32>
    %232 = arith.negf %231 : vector<8x64xf32>
    %233 = math.exp %232 : vector<8x64xf32>
    %cst_71 = arith.constant 1.000000e+00 : f32
    %234 = vector.broadcast %cst_71 : f32 to vector<8x64xf32>
    %235 = arith.addf %234, %233 : vector<8x64xf32>
    %236 = arith.divf %234, %235 : vector<8x64xf32>
    %237 = vector.extract_strided_slice %236 {offsets = [0, 0], sizes = [8, 32], strides = [1, 1]} : vector<8x64xf32> to vector<8x32xf32>
    %238 = vector.extract_strided_slice %236 {offsets = [0, 32], sizes = [8, 32], strides = [1, 1]} : vector<8x64xf32> to vector<8x32xf32>
    %239 = vector.extract_strided_slice %227 {offsets = [0, 64], sizes = [8, 32], strides = [1, 1]} : vector<8x96xf32> to vector<8x32xf32>
    %240 = vector.extract_strided_slice %228 {offsets = [0, 64], sizes = [8, 32], strides = [1, 1]} : vector<8x96xf32> to vector<8x32xf32>
    %241 = arith.mulf %237, %240 : vector<8x32xf32>
    %242 = arith.addf %239, %241 : vector<8x32xf32>
    %243 = math.tanh %242 : vector<8x32xf32>
    %cst_72 = arith.constant 1.000000e+00 : f32
    %244 = vector.broadcast %cst_72 : f32 to vector<8x32xf32>
    %245 = arith.subf %244, %238 : vector<8x32xf32>
    %246 = arith.mulf %245, %243 : vector<8x32xf32>
    %247 = arith.mulf %238, %229 : vector<8x32xf32>
    %248 = arith.addf %246, %247 : vector<8x32xf32>
    %c24_73 = arith.constant 24 : index
    %c0_74 = arith.constant 0 : index
    %249 = vector.load %arg5[%c24_73, %c0_74] : memref<64x96xf32, #tpu.memory_space<vmem>>, vector<8x96xf32>
    %250 = vector.extract_strided_slice %226 {offsets = [0, 96], sizes = [8, 96], strides = [1, 1]} : vector<8x192xf32> to vector<8x96xf32>
    %251 = vector.extract_strided_slice %223 {offsets = [0, 32], sizes = [8, 32], strides = [1, 1]} : vector<8x64xf32> to vector<8x32xf32>
    %252 = arith.addf %249, %250 : vector<8x96xf32>
    %253 = vector.extract_strided_slice %252 {offsets = [0, 0], sizes = [8, 64], strides = [1, 1]} : vector<8x96xf32> to vector<8x64xf32>
    %254 = arith.negf %253 : vector<8x64xf32>
    %255 = math.exp %254 : vector<8x64xf32>
    %cst_75 = arith.constant 1.000000e+00 : f32
    %256 = vector.broadcast %cst_75 : f32 to vector<8x64xf32>
    %257 = arith.addf %256, %255 : vector<8x64xf32>
    %258 = arith.divf %256, %257 : vector<8x64xf32>
    %259 = vector.extract_strided_slice %258 {offsets = [0, 0], sizes = [8, 32], strides = [1, 1]} : vector<8x64xf32> to vector<8x32xf32>
    %260 = vector.extract_strided_slice %258 {offsets = [0, 32], sizes = [8, 32], strides = [1, 1]} : vector<8x64xf32> to vector<8x32xf32>
    %261 = vector.extract_strided_slice %249 {offsets = [0, 64], sizes = [8, 32], strides = [1, 1]} : vector<8x96xf32> to vector<8x32xf32>
    %262 = vector.extract_strided_slice %250 {offsets = [0, 64], sizes = [8, 32], strides = [1, 1]} : vector<8x96xf32> to vector<8x32xf32>
    %263 = arith.mulf %259, %262 : vector<8x32xf32>
    %264 = arith.addf %261, %263 : vector<8x32xf32>
    %265 = math.tanh %264 : vector<8x32xf32>
    %cst_76 = arith.constant 1.000000e+00 : f32
    %266 = vector.broadcast %cst_76 : f32 to vector<8x32xf32>
    %267 = arith.subf %266, %260 : vector<8x32xf32>
    %268 = arith.mulf %267, %265 : vector<8x32xf32>
    %269 = arith.mulf %260, %251 : vector<8x32xf32>
    %270 = arith.addf %268, %269 : vector<8x32xf32>
    %c32_77 = arith.constant 32 : index
    %c0_78 = arith.constant 0 : index
    %271 = vector.load %arg6[%c32_77, %c0_78] : memref<64x64xf32, #tpu.memory_space<vmem>>, vector<8x32xf32>
    tpu.vector_store %arg6[%c32_77, %c0_78], %248 {strides = array<i32>} : memref<64x64xf32, #tpu.memory_space<vmem>>, vector<8x32xf32>,
    %c24_79 = arith.constant 24 : index
    %c32_80 = arith.constant 32 : index
    %272 = vector.load %arg6[%c24_79, %c32_80] : memref<64x64xf32, #tpu.memory_space<vmem>>, vector<8x32xf32>
    tpu.vector_store %arg6[%c24_79, %c32_80], %270 {strides = array<i32>} : memref<64x64xf32, #tpu.memory_space<vmem>>, vector<8x32xf32>,
    %273 = tpu.concatenate %248, %270 in 1 : vector<8x32xf32>, vector<8x32xf32> -> vector<8x64xf32>
    %cst_81 = arith.constant dense<0.000000e+00> : vector<8x192xf32>
    %274 = tpu.matmul %273, %2, %cst_81 {dimension_numbers = #tpu.dot_dimension_numbers<[1], [0], [0], [1], [0, 0, 1, 1], [], []>} : vector<8x64xf32>, vector<64x192xf32>, vector<8x192xf32> -> vector<8x192xf32>
    %275 = vector.broadcast %10 : vector<1x192xf32> to vector<8x192xf32>
    %276 = arith.addf %274, %275 : vector<8x192xf32>
    %c40_82 = arith.constant 40 : index
    %c0_83 = arith.constant 0 : index
    %277 = vector.load %arg4[%c40_82, %c0_83] : memref<64x96xf32, #tpu.memory_space<vmem>>, vector<8x96xf32>
    %278 = vector.extract_strided_slice %276 {offsets = [0, 0], sizes = [8, 96], strides = [1, 1]} : vector<8x192xf32> to vector<8x96xf32>
    %279 = vector.extract_strided_slice %273 {offsets = [0, 0], sizes = [8, 32], strides = [1, 1]} : vector<8x64xf32> to vector<8x32xf32>
    %280 = arith.addf %277, %278 : vector<8x96xf32>
    %281 = vector.extract_strided_slice %280 {offsets = [0, 0], sizes = [8, 64], strides = [1, 1]} : vector<8x96xf32> to vector<8x64xf32>
    %282 = arith.negf %281 : vector<8x64xf32>
    %283 = math.exp %282 : vector<8x64xf32>
    %cst_84 = arith.constant 1.000000e+00 : f32
    %284 = vector.broadcast %cst_84 : f32 to vector<8x64xf32>
    %285 = arith.addf %284, %283 : vector<8x64xf32>
    %286 = arith.divf %284, %285 : vector<8x64xf32>
    %287 = vector.extract_strided_slice %286 {offsets = [0, 0], sizes = [8, 32], strides = [1, 1]} : vector<8x64xf32> to vector<8x32xf32>
    %288 = vector.extract_strided_slice %286 {offsets = [0, 32], sizes = [8, 32], strides = [1, 1]} : vector<8x64xf32> to vector<8x32xf32>
    %289 = vector.extract_strided_slice %277 {offsets = [0, 64], sizes = [8, 32], strides = [1, 1]} : vector<8x96xf32> to vector<8x32xf32>
    %290 = vector.extract_strided_slice %278 {offsets = [0, 64], sizes = [8, 32], strides = [1, 1]} : vector<8x96xf32> to vector<8x32xf32>
    %291 = arith.mulf %287, %290 : vector<8x32xf32>
    %292 = arith.addf %289, %291 : vector<8x32xf32>
    %293 = math.tanh %292 : vector<8x32xf32>
    %cst_85 = arith.constant 1.000000e+00 : f32
    %294 = vector.broadcast %cst_85 : f32 to vector<8x32xf32>
    %295 = arith.subf %294, %288 : vector<8x32xf32>
    %296 = arith.mulf %295, %293 : vector<8x32xf32>
    %297 = arith.mulf %288, %279 : vector<8x32xf32>
    %298 = arith.addf %296, %297 : vector<8x32xf32>
    %c16_86 = arith.constant 16 : index
    %c0_87 = arith.constant 0 : index
    %299 = vector.load %arg5[%c16_86, %c0_87] : memref<64x96xf32, #tpu.memory_space<vmem>>, vector<8x96xf32>
    %300 = vector.extract_strided_slice %276 {offsets = [0, 96], sizes = [8, 96], strides = [1, 1]} : vector<8x192xf32> to vector<8x96xf32>
    %301 = vector.extract_strided_slice %273 {offsets = [0, 32], sizes = [8, 32], strides = [1, 1]} : vector<8x64xf32> to vector<8x32xf32>
    %302 = arith.addf %299, %300 : vector<8x96xf32>
    %303 = vector.extract_strided_slice %302 {offsets = [0, 0], sizes = [8, 64], strides = [1, 1]} : vector<8x96xf32> to vector<8x64xf32>
    %304 = arith.negf %303 : vector<8x64xf32>
    %305 = math.exp %304 : vector<8x64xf32>
    %cst_88 = arith.constant 1.000000e+00 : f32
    %306 = vector.broadcast %cst_88 : f32 to vector<8x64xf32>
    %307 = arith.addf %306, %305 : vector<8x64xf32>
    %308 = arith.divf %306, %307 : vector<8x64xf32>
    %309 = vector.extract_strided_slice %308 {offsets = [0, 0], sizes = [8, 32], strides = [1, 1]} : vector<8x64xf32> to vector<8x32xf32>
    %310 = vector.extract_strided_slice %308 {offsets = [0, 32], sizes = [8, 32], strides = [1, 1]} : vector<8x64xf32> to vector<8x32xf32>
    %311 = vector.extract_strided_slice %299 {offsets = [0, 64], sizes = [8, 32], strides = [1, 1]} : vector<8x96xf32> to vector<8x32xf32>
    %312 = vector.extract_strided_slice %300 {offsets = [0, 64], sizes = [8, 32], strides = [1, 1]} : vector<8x96xf32> to vector<8x32xf32>
    %313 = arith.mulf %309, %312 : vector<8x32xf32>
    %314 = arith.addf %311, %313 : vector<8x32xf32>
    %315 = math.tanh %314 : vector<8x32xf32>
    %cst_89 = arith.constant 1.000000e+00 : f32
    %316 = vector.broadcast %cst_89 : f32 to vector<8x32xf32>
    %317 = arith.subf %316, %310 : vector<8x32xf32>
    %318 = arith.mulf %317, %315 : vector<8x32xf32>
    %319 = arith.mulf %310, %301 : vector<8x32xf32>
    %320 = arith.addf %318, %319 : vector<8x32xf32>
    %c40_90 = arith.constant 40 : index
    %c0_91 = arith.constant 0 : index
    %321 = vector.load %arg6[%c40_90, %c0_91] : memref<64x64xf32, #tpu.memory_space<vmem>>, vector<8x32xf32>
    tpu.vector_store %arg6[%c40_90, %c0_91], %298 {strides = array<i32>} : memref<64x64xf32, #tpu.memory_space<vmem>>, vector<8x32xf32>,
    %c16_92 = arith.constant 16 : index
    %c32_93 = arith.constant 32 : index
    %322 = vector.load %arg6[%c16_92, %c32_93] : memref<64x64xf32, #tpu.memory_space<vmem>>, vector<8x32xf32>
    tpu.vector_store %arg6[%c16_92, %c32_93], %320 {strides = array<i32>} : memref<64x64xf32, #tpu.memory_space<vmem>>, vector<8x32xf32>,
    %323 = tpu.concatenate %298, %320 in 1 : vector<8x32xf32>, vector<8x32xf32> -> vector<8x64xf32>
    %cst_94 = arith.constant dense<0.000000e+00> : vector<8x192xf32>
    %324 = tpu.matmul %323, %2, %cst_94 {dimension_numbers = #tpu.dot_dimension_numbers<[1], [0], [0], [1], [0, 0, 1, 1], [], []>} : vector<8x64xf32>, vector<64x192xf32>, vector<8x192xf32> -> vector<8x192xf32>
    %325 = vector.broadcast %10 : vector<1x192xf32> to vector<8x192xf32>
    %326 = arith.addf %324, %325 : vector<8x192xf32>
    %c48_95 = arith.constant 48 : index
    %c0_96 = arith.constant 0 : index
    %327 = vector.load %arg4[%c48_95, %c0_96] : memref<64x96xf32, #tpu.memory_space<vmem>>, vector<8x96xf32>
    %328 = vector.extract_strided_slice %326 {offsets = [0, 0], sizes = [8, 96], strides = [1, 1]} : vector<8x192xf32> to vector<8x96xf32>
    %329 = vector.extract_strided_slice %323 {offsets = [0, 0], sizes = [8, 32], strides = [1, 1]} : vector<8x64xf32> to vector<8x32xf32>
    %330 = arith.addf %327, %328 : vector<8x96xf32>
    %331 = vector.extract_strided_slice %330 {offsets = [0, 0], sizes = [8, 64], strides = [1, 1]} : vector<8x96xf32> to vector<8x64xf32>
    %332 = arith.negf %331 : vector<8x64xf32>
    %333 = math.exp %332 : vector<8x64xf32>
    %cst_97 = arith.constant 1.000000e+00 : f32
    %334 = vector.broadcast %cst_97 : f32 to vector<8x64xf32>
    %335 = arith.addf %334, %333 : vector<8x64xf32>
    %336 = arith.divf %334, %335 : vector<8x64xf32>
    %337 = vector.extract_strided_slice %336 {offsets = [0, 0], sizes = [8, 32], strides = [1, 1]} : vector<8x64xf32> to vector<8x32xf32>
    %338 = vector.extract_strided_slice %336 {offsets = [0, 32], sizes = [8, 32], strides = [1, 1]} : vector<8x64xf32> to vector<8x32xf32>
    %339 = vector.extract_strided_slice %327 {offsets = [0, 64], sizes = [8, 32], strides = [1, 1]} : vector<8x96xf32> to vector<8x32xf32>
    %340 = vector.extract_strided_slice %328 {offsets = [0, 64], sizes = [8, 32], strides = [1, 1]} : vector<8x96xf32> to vector<8x32xf32>
    %341 = arith.mulf %337, %340 : vector<8x32xf32>
    %342 = arith.addf %339, %341 : vector<8x32xf32>
    %343 = math.tanh %342 : vector<8x32xf32>
    %cst_98 = arith.constant 1.000000e+00 : f32
    %344 = vector.broadcast %cst_98 : f32 to vector<8x32xf32>
    %345 = arith.subf %344, %338 : vector<8x32xf32>
    %346 = arith.mulf %345, %343 : vector<8x32xf32>
    %347 = arith.mulf %338, %329 : vector<8x32xf32>
    %348 = arith.addf %346, %347 : vector<8x32xf32>
    %c8_99 = arith.constant 8 : index
    %c0_100 = arith.constant 0 : index
    %349 = vector.load %arg5[%c8_99, %c0_100] : memref<64x96xf32, #tpu.memory_space<vmem>>, vector<8x96xf32>
    %350 = vector.extract_strided_slice %326 {offsets = [0, 96], sizes = [8, 96], strides = [1, 1]} : vector<8x192xf32> to vector<8x96xf32>
    %351 = vector.extract_strided_slice %323 {offsets = [0, 32], sizes = [8, 32], strides = [1, 1]} : vector<8x64xf32> to vector<8x32xf32>
    %352 = arith.addf %349, %350 : vector<8x96xf32>
    %353 = vector.extract_strided_slice %352 {offsets = [0, 0], sizes = [8, 64], strides = [1, 1]} : vector<8x96xf32> to vector<8x64xf32>
    %354 = arith.negf %353 : vector<8x64xf32>
    %355 = math.exp %354 : vector<8x64xf32>
    %cst_101 = arith.constant 1.000000e+00 : f32
    %356 = vector.broadcast %cst_101 : f32 to vector<8x64xf32>
    %357 = arith.addf %356, %355 : vector<8x64xf32>
    %358 = arith.divf %356, %357 : vector<8x64xf32>
    %359 = vector.extract_strided_slice %358 {offsets = [0, 0], sizes = [8, 32], strides = [1, 1]} : vector<8x64xf32> to vector<8x32xf32>
    %360 = vector.extract_strided_slice %358 {offsets = [0, 32], sizes = [8, 32], strides = [1, 1]} : vector<8x64xf32> to vector<8x32xf32>
    %361 = vector.extract_strided_slice %349 {offsets = [0, 64], sizes = [8, 32], strides = [1, 1]} : vector<8x96xf32> to vector<8x32xf32>
    %362 = vector.extract_strided_slice %350 {offsets = [0, 64], sizes = [8, 32], strides = [1, 1]} : vector<8x96xf32> to vector<8x32xf32>
    %363 = arith.mulf %359, %362 : vector<8x32xf32>
    %364 = arith.addf %361, %363 : vector<8x32xf32>
    %365 = math.tanh %364 : vector<8x32xf32>
    %cst_102 = arith.constant 1.000000e+00 : f32
    %366 = vector.broadcast %cst_102 : f32 to vector<8x32xf32>
    %367 = arith.subf %366, %360 : vector<8x32xf32>
    %368 = arith.mulf %367, %365 : vector<8x32xf32>
    %369 = arith.mulf %360, %351 : vector<8x32xf32>
    %370 = arith.addf %368, %369 : vector<8x32xf32>
    %c48_103 = arith.constant 48 : index
    %c0_104 = arith.constant 0 : index
    %371 = vector.load %arg6[%c48_103, %c0_104] : memref<64x64xf32, #tpu.memory_space<vmem>>, vector<8x32xf32>
    tpu.vector_store %arg6[%c48_103, %c0_104], %348 {strides = array<i32>} : memref<64x64xf32, #tpu.memory_space<vmem>>, vector<8x32xf32>,
    %c8_105 = arith.constant 8 : index
    %c32_106 = arith.constant 32 : index
    %372 = vector.load %arg6[%c8_105, %c32_106] : memref<64x64xf32, #tpu.memory_space<vmem>>, vector<8x32xf32>
    tpu.vector_store %arg6[%c8_105, %c32_106], %370 {strides = array<i32>} : memref<64x64xf32, #tpu.memory_space<vmem>>, vector<8x32xf32>,
    %373 = tpu.concatenate %348, %370 in 1 : vector<8x32xf32>, vector<8x32xf32> -> vector<8x64xf32>
    %cst_107 = arith.constant dense<0.000000e+00> : vector<8x192xf32>
    %374 = tpu.matmul %373, %2, %cst_107 {dimension_numbers = #tpu.dot_dimension_numbers<[1], [0], [0], [1], [0, 0, 1, 1], [], []>} : vector<8x64xf32>, vector<64x192xf32>, vector<8x192xf32> -> vector<8x192xf32>
    %375 = vector.broadcast %10 : vector<1x192xf32> to vector<8x192xf32>
    %376 = arith.addf %374, %375 : vector<8x192xf32>
    %c56_108 = arith.constant 56 : index
    %c0_109 = arith.constant 0 : index
    %377 = vector.load %arg4[%c56_108, %c0_109] : memref<64x96xf32, #tpu.memory_space<vmem>>, vector<8x96xf32>
    %378 = vector.extract_strided_slice %376 {offsets = [0, 0], sizes = [8, 96], strides = [1, 1]} : vector<8x192xf32> to vector<8x96xf32>
    %379 = vector.extract_strided_slice %373 {offsets = [0, 0], sizes = [8, 32], strides = [1, 1]} : vector<8x64xf32> to vector<8x32xf32>
    %380 = arith.addf %377, %378 : vector<8x96xf32>
    %381 = vector.extract_strided_slice %380 {offsets = [0, 0], sizes = [8, 64], strides = [1, 1]} : vector<8x96xf32> to vector<8x64xf32>
    %382 = arith.negf %381 : vector<8x64xf32>
    %383 = math.exp %382 : vector<8x64xf32>
    %cst_110 = arith.constant 1.000000e+00 : f32
    %384 = vector.broadcast %cst_110 : f32 to vector<8x64xf32>
    %385 = arith.addf %384, %383 : vector<8x64xf32>
    %386 = arith.divf %384, %385 : vector<8x64xf32>
    %387 = vector.extract_strided_slice %386 {offsets = [0, 0], sizes = [8, 32], strides = [1, 1]} : vector<8x64xf32> to vector<8x32xf32>
    %388 = vector.extract_strided_slice %386 {offsets = [0, 32], sizes = [8, 32], strides = [1, 1]} : vector<8x64xf32> to vector<8x32xf32>
    %389 = vector.extract_strided_slice %377 {offsets = [0, 64], sizes = [8, 32], strides = [1, 1]} : vector<8x96xf32> to vector<8x32xf32>
    %390 = vector.extract_strided_slice %378 {offsets = [0, 64], sizes = [8, 32], strides = [1, 1]} : vector<8x96xf32> to vector<8x32xf32>
    %391 = arith.mulf %387, %390 : vector<8x32xf32>
    %392 = arith.addf %389, %391 : vector<8x32xf32>
    %393 = math.tanh %392 : vector<8x32xf32>
    %cst_111 = arith.constant 1.000000e+00 : f32
    %394 = vector.broadcast %cst_111 : f32 to vector<8x32xf32>
    %395 = arith.subf %394, %388 : vector<8x32xf32>
    %396 = arith.mulf %395, %393 : vector<8x32xf32>
    %397 = arith.mulf %388, %379 : vector<8x32xf32>
    %398 = arith.addf %396, %397 : vector<8x32xf32>
    %c0_112 = arith.constant 0 : index
    %c0_113 = arith.constant 0 : index
    %399 = vector.load %arg5[%c0_112, %c0_113] : memref<64x96xf32, #tpu.memory_space<vmem>>, vector<8x96xf32>
    %400 = vector.extract_strided_slice %376 {offsets = [0, 96], sizes = [8, 96], strides = [1, 1]} : vector<8x192xf32> to vector<8x96xf32>
    %401 = vector.extract_strided_slice %373 {offsets = [0, 32], sizes = [8, 32], strides = [1, 1]} : vector<8x64xf32> to vector<8x32xf32>
    %402 = arith.addf %399, %400 : vector<8x96xf32>
    %403 = vector.extract_strided_slice %402 {offsets = [0, 0], sizes = [8, 64], strides = [1, 1]} : vector<8x96xf32> to vector<8x64xf32>
    %404 = arith.negf %403 : vector<8x64xf32>
    %405 = math.exp %404 : vector<8x64xf32>
    %cst_114 = arith.constant 1.000000e+00 : f32
    %406 = vector.broadcast %cst_114 : f32 to vector<8x64xf32>
    %407 = arith.addf %406, %405 : vector<8x64xf32>
    %408 = arith.divf %406, %407 : vector<8x64xf32>
    %409 = vector.extract_strided_slice %408 {offsets = [0, 0], sizes = [8, 32], strides = [1, 1]} : vector<8x64xf32> to vector<8x32xf32>
    %410 = vector.extract_strided_slice %408 {offsets = [0, 32], sizes = [8, 32], strides = [1, 1]} : vector<8x64xf32> to vector<8x32xf32>
    %411 = vector.extract_strided_slice %399 {offsets = [0, 64], sizes = [8, 32], strides = [1, 1]} : vector<8x96xf32> to vector<8x32xf32>
    %412 = vector.extract_strided_slice %400 {offsets = [0, 64], sizes = [8, 32], strides = [1, 1]} : vector<8x96xf32> to vector<8x32xf32>
    %413 = arith.mulf %409, %412 : vector<8x32xf32>
    %414 = arith.addf %411, %413 : vector<8x32xf32>
    %415 = math.tanh %414 : vector<8x32xf32>
    %cst_115 = arith.constant 1.000000e+00 : f32
    %416 = vector.broadcast %cst_115 : f32 to vector<8x32xf32>
    %417 = arith.subf %416, %410 : vector<8x32xf32>
    %418 = arith.mulf %417, %415 : vector<8x32xf32>
    %419 = arith.mulf %410, %401 : vector<8x32xf32>
    %420 = arith.addf %418, %419 : vector<8x32xf32>
    %c56_116 = arith.constant 56 : index
    %c0_117 = arith.constant 0 : index
    %421 = vector.load %arg6[%c56_116, %c0_117] : memref<64x64xf32, #tpu.memory_space<vmem>>, vector<8x32xf32>
    tpu.vector_store %arg6[%c56_116, %c0_117], %398 {strides = array<i32>} : memref<64x64xf32, #tpu.memory_space<vmem>>, vector<8x32xf32>,
    %c0_118 = arith.constant 0 : index
    %c32_119 = arith.constant 32 : index
    %422 = vector.load %arg6[%c0_118, %c32_119] : memref<64x64xf32, #tpu.memory_space<vmem>>, vector<8x32xf32>
    tpu.vector_store %arg6[%c0_118, %c32_119], %420 {strides = array<i32>} : memref<64x64xf32, #tpu.memory_space<vmem>>, vector<8x32xf32>,
    %c0_120 = arith.constant 0 : index
    %c0_121 = arith.constant 0 : index
    %423 = vector.load %arg6[%c0_120, %c0_121] : memref<64x64xf32, #tpu.memory_space<vmem>>, vector<64x64xf32>
    %cst_122 = arith.constant dense<0.000000e+00> : vector<64x96xf32>
    %424 = tpu.matmul %423, %3, %cst_122 {dimension_numbers = #tpu.dot_dimension_numbers<[1], [0], [0], [1], [0, 0, 1, 1], [], []>} : vector<64x64xf32>, vector<64x96xf32>, vector<64x96xf32> -> vector<64x96xf32>
    %425 = vector.broadcast %11 : vector<1x96xf32> to vector<64x96xf32>
    %426 = arith.addf %424, %425 : vector<64x96xf32>
    %c0_123 = arith.constant 0 : index
    %c0_124 = arith.constant 0 : index
    %427 = vector.load %arg7[%c0_123, %c0_124] : memref<64x96xf32, #tpu.memory_space<vmem>>, vector<64x96xf32>
    tpu.vector_store %arg7[%c0_123, %c0_124], %426 {strides = array<i32>} : memref<64x96xf32, #tpu.memory_space<vmem>>, vector<64x96xf32>,
    %cst_125 = arith.constant dense<0.000000e+00> : vector<64x96xf32>
    %428 = tpu.matmul %423, %4, %cst_125 {dimension_numbers = #tpu.dot_dimension_numbers<[1], [0], [0], [1], [0, 0, 1, 1], [], []>} : vector<64x64xf32>, vector<64x96xf32>, vector<64x96xf32> -> vector<64x96xf32>
    %429 = vector.broadcast %12 : vector<1x96xf32> to vector<64x96xf32>
    %430 = arith.addf %428, %429 : vector<64x96xf32>
    %c0_126 = arith.constant 0 : index
    %c0_127 = arith.constant 0 : index
    %431 = vector.load %arg8[%c0_126, %c0_127] : memref<64x96xf32, #tpu.memory_space<vmem>>, vector<64x96xf32>
    tpu.vector_store %arg8[%c0_126, %c0_127], %430 {strides = array<i32>} : memref<64x96xf32, #tpu.memory_space<vmem>>, vector<64x96xf32>,
    %cst_128 = arith.constant 0.000000e+00 : f32
    %432 = vector.broadcast %cst_128 : f32 to vector<8x64xf32>
    %cst_129 = arith.constant dense<0.000000e+00> : vector<8x192xf32>
    %433 = tpu.matmul %432, %5, %cst_129 {dimension_numbers = #tpu.dot_dimension_numbers<[1], [0], [0], [1], [0, 0, 1, 1], [], []>} : vector<8x64xf32>, vector<64x192xf32>, vector<8x192xf32> -> vector<8x192xf32>
    %434 = vector.broadcast %13 : vector<1x192xf32> to vector<8x192xf32>
    %435 = arith.addf %433, %434 : vector<8x192xf32>
    %c0_130 = arith.constant 0 : index
    %c0_131 = arith.constant 0 : index
    %436 = vector.load %arg7[%c0_130, %c0_131] : memref<64x96xf32, #tpu.memory_space<vmem>>, vector<8x96xf32>
    %437 = vector.extract_strided_slice %435 {offsets = [0, 0], sizes = [8, 96], strides = [1, 1]} : vector<8x192xf32> to vector<8x96xf32>
    %438 = vector.extract_strided_slice %432 {offsets = [0, 0], sizes = [8, 32], strides = [1, 1]} : vector<8x64xf32> to vector<8x32xf32>
    %439 = arith.addf %436, %437 : vector<8x96xf32>
    %440 = vector.extract_strided_slice %439 {offsets = [0, 0], sizes = [8, 64], strides = [1, 1]} : vector<8x96xf32> to vector<8x64xf32>
    %441 = arith.negf %440 : vector<8x64xf32>
    %442 = math.exp %441 : vector<8x64xf32>
    %cst_132 = arith.constant 1.000000e+00 : f32
    %443 = vector.broadcast %cst_132 : f32 to vector<8x64xf32>
    %444 = arith.addf %443, %442 : vector<8x64xf32>
    %445 = arith.divf %443, %444 : vector<8x64xf32>
    %446 = vector.extract_strided_slice %445 {offsets = [0, 0], sizes = [8, 32], strides = [1, 1]} : vector<8x64xf32> to vector<8x32xf32>
    %447 = vector.extract_strided_slice %445 {offsets = [0, 32], sizes = [8, 32], strides = [1, 1]} : vector<8x64xf32> to vector<8x32xf32>
    %448 = vector.extract_strided_slice %436 {offsets = [0, 64], sizes = [8, 32], strides = [1, 1]} : vector<8x96xf32> to vector<8x32xf32>
    %449 = vector.extract_strided_slice %437 {offsets = [0, 64], sizes = [8, 32], strides = [1, 1]} : vector<8x96xf32> to vector<8x32xf32>
    %450 = arith.mulf %446, %449 : vector<8x32xf32>
    %451 = arith.addf %448, %450 : vector<8x32xf32>
    %452 = math.tanh %451 : vector<8x32xf32>
    %cst_133 = arith.constant 1.000000e+00 : f32
    %453 = vector.broadcast %cst_133 : f32 to vector<8x32xf32>
    %454 = arith.subf %453, %447 : vector<8x32xf32>
    %455 = arith.mulf %454, %452 : vector<8x32xf32>
    %456 = arith.mulf %447, %438 : vector<8x32xf32>
    %457 = arith.addf %455, %456 : vector<8x32xf32>
    %c56_134 = arith.constant 56 : index
    %c0_135 = arith.constant 0 : index
    %458 = vector.load %arg8[%c56_134, %c0_135] : memref<64x96xf32, #tpu.memory_space<vmem>>, vector<8x96xf32>
    %459 = vector.extract_strided_slice %435 {offsets = [0, 96], sizes = [8, 96], strides = [1, 1]} : vector<8x192xf32> to vector<8x96xf32>
    %460 = vector.extract_strided_slice %432 {offsets = [0, 32], sizes = [8, 32], strides = [1, 1]} : vector<8x64xf32> to vector<8x32xf32>
    %461 = arith.addf %458, %459 : vector<8x96xf32>
    %462 = vector.extract_strided_slice %461 {offsets = [0, 0], sizes = [8, 64], strides = [1, 1]} : vector<8x96xf32> to vector<8x64xf32>
    %463 = arith.negf %462 : vector<8x64xf32>
    %464 = math.exp %463 : vector<8x64xf32>
    %cst_136 = arith.constant 1.000000e+00 : f32
    %465 = vector.broadcast %cst_136 : f32 to vector<8x64xf32>
    %466 = arith.addf %465, %464 : vector<8x64xf32>
    %467 = arith.divf %465, %466 : vector<8x64xf32>
    %468 = vector.extract_strided_slice %467 {offsets = [0, 0], sizes = [8, 32], strides = [1, 1]} : vector<8x64xf32> to vector<8x32xf32>
    %469 = vector.extract_strided_slice %467 {offsets = [0, 32], sizes = [8, 32], strides = [1, 1]} : vector<8x64xf32> to vector<8x32xf32>
    %470 = vector.extract_strided_slice %458 {offsets = [0, 64], sizes = [8, 32], strides = [1, 1]} : vector<8x96xf32> to vector<8x32xf32>
    %471 = vector.extract_strided_slice %459 {offsets = [0, 64], sizes = [8, 32], strides = [1, 1]} : vector<8x96xf32> to vector<8x32xf32>
    %472 = arith.mulf %468, %471 : vector<8x32xf32>
    %473 = arith.addf %470, %472 : vector<8x32xf32>
    %474 = math.tanh %473 : vector<8x32xf32>
    %cst_137 = arith.constant 1.000000e+00 : f32
    %475 = vector.broadcast %cst_137 : f32 to vector<8x32xf32>
    %476 = arith.subf %475, %469 : vector<8x32xf32>
    %477 = arith.mulf %476, %474 : vector<8x32xf32>
    %478 = arith.mulf %469, %460 : vector<8x32xf32>
    %479 = arith.addf %477, %478 : vector<8x32xf32>
    %480 = tpu.concatenate %457, %479 in 1 : vector<8x32xf32>, vector<8x32xf32> -> vector<8x64xf32>
    %cst_138 = arith.constant dense<0.000000e+00> : vector<8x192xf32>
    %481 = tpu.matmul %480, %5, %cst_138 {dimension_numbers = #tpu.dot_dimension_numbers<[1], [0], [0], [1], [0, 0, 1, 1], [], []>} : vector<8x64xf32>, vector<64x192xf32>, vector<8x192xf32> -> vector<8x192xf32>
    %482 = vector.broadcast %13 : vector<1x192xf32> to vector<8x192xf32>
    %483 = arith.addf %481, %482 : vector<8x192xf32>
    %c8_139 = arith.constant 8 : index
    %c0_140 = arith.constant 0 : index
    %484 = vector.load %arg7[%c8_139, %c0_140] : memref<64x96xf32, #tpu.memory_space<vmem>>, vector<8x96xf32>
    %485 = vector.extract_strided_slice %483 {offsets = [0, 0], sizes = [8, 96], strides = [1, 1]} : vector<8x192xf32> to vector<8x96xf32>
    %486 = vector.extract_strided_slice %480 {offsets = [0, 0], sizes = [8, 32], strides = [1, 1]} : vector<8x64xf32> to vector<8x32xf32>
    %487 = arith.addf %484, %485 : vector<8x96xf32>
    %488 = vector.extract_strided_slice %487 {offsets = [0, 0], sizes = [8, 64], strides = [1, 1]} : vector<8x96xf32> to vector<8x64xf32>
    %489 = arith.negf %488 : vector<8x64xf32>
    %490 = math.exp %489 : vector<8x64xf32>
    %cst_141 = arith.constant 1.000000e+00 : f32
    %491 = vector.broadcast %cst_141 : f32 to vector<8x64xf32>
    %492 = arith.addf %491, %490 : vector<8x64xf32>
    %493 = arith.divf %491, %492 : vector<8x64xf32>
    %494 = vector.extract_strided_slice %493 {offsets = [0, 0], sizes = [8, 32], strides = [1, 1]} : vector<8x64xf32> to vector<8x32xf32>
    %495 = vector.extract_strided_slice %493 {offsets = [0, 32], sizes = [8, 32], strides = [1, 1]} : vector<8x64xf32> to vector<8x32xf32>
    %496 = vector.extract_strided_slice %484 {offsets = [0, 64], sizes = [8, 32], strides = [1, 1]} : vector<8x96xf32> to vector<8x32xf32>
    %497 = vector.extract_strided_slice %485 {offsets = [0, 64], sizes = [8, 32], strides = [1, 1]} : vector<8x96xf32> to vector<8x32xf32>
    %498 = arith.mulf %494, %497 : vector<8x32xf32>
    %499 = arith.addf %496, %498 : vector<8x32xf32>
    %500 = math.tanh %499 : vector<8x32xf32>
    %cst_142 = arith.constant 1.000000e+00 : f32
    %501 = vector.broadcast %cst_142 : f32 to vector<8x32xf32>
    %502 = arith.subf %501, %495 : vector<8x32xf32>
    %503 = arith.mulf %502, %500 : vector<8x32xf32>
    %504 = arith.mulf %495, %486 : vector<8x32xf32>
    %505 = arith.addf %503, %504 : vector<8x32xf32>
    %c48_143 = arith.constant 48 : index
    %c0_144 = arith.constant 0 : index
    %506 = vector.load %arg8[%c48_143, %c0_144] : memref<64x96xf32, #tpu.memory_space<vmem>>, vector<8x96xf32>
    %507 = vector.extract_strided_slice %483 {offsets = [0, 96], sizes = [8, 96], strides = [1, 1]} : vector<8x192xf32> to vector<8x96xf32>
    %508 = vector.extract_strided_slice %480 {offsets = [0, 32], sizes = [8, 32], strides = [1, 1]} : vector<8x64xf32> to vector<8x32xf32>
    %509 = arith.addf %506, %507 : vector<8x96xf32>
    %510 = vector.extract_strided_slice %509 {offsets = [0, 0], sizes = [8, 64], strides = [1, 1]} : vector<8x96xf32> to vector<8x64xf32>
    %511 = arith.negf %510 : vector<8x64xf32>
    %512 = math.exp %511 : vector<8x64xf32>
    %cst_145 = arith.constant 1.000000e+00 : f32
    %513 = vector.broadcast %cst_145 : f32 to vector<8x64xf32>
    %514 = arith.addf %513, %512 : vector<8x64xf32>
    %515 = arith.divf %513, %514 : vector<8x64xf32>
    %516 = vector.extract_strided_slice %515 {offsets = [0, 0], sizes = [8, 32], strides = [1, 1]} : vector<8x64xf32> to vector<8x32xf32>
    %517 = vector.extract_strided_slice %515 {offsets = [0, 32], sizes = [8, 32], strides = [1, 1]} : vector<8x64xf32> to vector<8x32xf32>
    %518 = vector.extract_strided_slice %506 {offsets = [0, 64], sizes = [8, 32], strides = [1, 1]} : vector<8x96xf32> to vector<8x32xf32>
    %519 = vector.extract_strided_slice %507 {offsets = [0, 64], sizes = [8, 32], strides = [1, 1]} : vector<8x96xf32> to vector<8x32xf32>
    %520 = arith.mulf %516, %519 : vector<8x32xf32>
    %521 = arith.addf %518, %520 : vector<8x32xf32>
    %522 = math.tanh %521 : vector<8x32xf32>
    %cst_146 = arith.constant 1.000000e+00 : f32
    %523 = vector.broadcast %cst_146 : f32 to vector<8x32xf32>
    %524 = arith.subf %523, %517 : vector<8x32xf32>
    %525 = arith.mulf %524, %522 : vector<8x32xf32>
    %526 = arith.mulf %517, %508 : vector<8x32xf32>
    %527 = arith.addf %525, %526 : vector<8x32xf32>
    %528 = tpu.concatenate %505, %527 in 1 : vector<8x32xf32>, vector<8x32xf32> -> vector<8x64xf32>
    %cst_147 = arith.constant dense<0.000000e+00> : vector<8x192xf32>
    %529 = tpu.matmul %528, %5, %cst_147 {dimension_numbers = #tpu.dot_dimension_numbers<[1], [0], [0], [1], [0, 0, 1, 1], [], []>} : vector<8x64xf32>, vector<64x192xf32>, vector<8x192xf32> -> vector<8x192xf32>
    %530 = vector.broadcast %13 : vector<1x192xf32> to vector<8x192xf32>
    %531 = arith.addf %529, %530 : vector<8x192xf32>
    %c16_148 = arith.constant 16 : index
    %c0_149 = arith.constant 0 : index
    %532 = vector.load %arg7[%c16_148, %c0_149] : memref<64x96xf32, #tpu.memory_space<vmem>>, vector<8x96xf32>
    %533 = vector.extract_strided_slice %531 {offsets = [0, 0], sizes = [8, 96], strides = [1, 1]} : vector<8x192xf32> to vector<8x96xf32>
    %534 = vector.extract_strided_slice %528 {offsets = [0, 0], sizes = [8, 32], strides = [1, 1]} : vector<8x64xf32> to vector<8x32xf32>
    %535 = arith.addf %532, %533 : vector<8x96xf32>
    %536 = vector.extract_strided_slice %535 {offsets = [0, 0], sizes = [8, 64], strides = [1, 1]} : vector<8x96xf32> to vector<8x64xf32>
    %537 = arith.negf %536 : vector<8x64xf32>
    %538 = math.exp %537 : vector<8x64xf32>
    %cst_150 = arith.constant 1.000000e+00 : f32
    %539 = vector.broadcast %cst_150 : f32 to vector<8x64xf32>
    %540 = arith.addf %539, %538 : vector<8x64xf32>
    %541 = arith.divf %539, %540 : vector<8x64xf32>
    %542 = vector.extract_strided_slice %541 {offsets = [0, 0], sizes = [8, 32], strides = [1, 1]} : vector<8x64xf32> to vector<8x32xf32>
    %543 = vector.extract_strided_slice %541 {offsets = [0, 32], sizes = [8, 32], strides = [1, 1]} : vector<8x64xf32> to vector<8x32xf32>
    %544 = vector.extract_strided_slice %532 {offsets = [0, 64], sizes = [8, 32], strides = [1, 1]} : vector<8x96xf32> to vector<8x32xf32>
    %545 = vector.extract_strided_slice %533 {offsets = [0, 64], sizes = [8, 32], strides = [1, 1]} : vector<8x96xf32> to vector<8x32xf32>
    %546 = arith.mulf %542, %545 : vector<8x32xf32>
    %547 = arith.addf %544, %546 : vector<8x32xf32>
    %548 = math.tanh %547 : vector<8x32xf32>
    %cst_151 = arith.constant 1.000000e+00 : f32
    %549 = vector.broadcast %cst_151 : f32 to vector<8x32xf32>
    %550 = arith.subf %549, %543 : vector<8x32xf32>
    %551 = arith.mulf %550, %548 : vector<8x32xf32>
    %552 = arith.mulf %543, %534 : vector<8x32xf32>
    %553 = arith.addf %551, %552 : vector<8x32xf32>
    %c40_152 = arith.constant 40 : index
    %c0_153 = arith.constant 0 : index
    %554 = vector.load %arg8[%c40_152, %c0_153] : memref<64x96xf32, #tpu.memory_space<vmem>>, vector<8x96xf32>
    %555 = vector.extract_strided_slice %531 {offsets = [0, 96], sizes = [8, 96], strides = [1, 1]} : vector<8x192xf32> to vector<8x96xf32>
    %556 = vector.extract_strided_slice %528 {offsets = [0, 32], sizes = [8, 32], strides = [1, 1]} : vector<8x64xf32> to vector<8x32xf32>
    %557 = arith.addf %554, %555 : vector<8x96xf32>
    %558 = vector.extract_strided_slice %557 {offsets = [0, 0], sizes = [8, 64], strides = [1, 1]} : vector<8x96xf32> to vector<8x64xf32>
    %559 = arith.negf %558 : vector<8x64xf32>
    %560 = math.exp %559 : vector<8x64xf32>
    %cst_154 = arith.constant 1.000000e+00 : f32
    %561 = vector.broadcast %cst_154 : f32 to vector<8x64xf32>
    %562 = arith.addf %561, %560 : vector<8x64xf32>
    %563 = arith.divf %561, %562 : vector<8x64xf32>
    %564 = vector.extract_strided_slice %563 {offsets = [0, 0], sizes = [8, 32], strides = [1, 1]} : vector<8x64xf32> to vector<8x32xf32>
    %565 = vector.extract_strided_slice %563 {offsets = [0, 32], sizes = [8, 32], strides = [1, 1]} : vector<8x64xf32> to vector<8x32xf32>
    %566 = vector.extract_strided_slice %554 {offsets = [0, 64], sizes = [8, 32], strides = [1, 1]} : vector<8x96xf32> to vector<8x32xf32>
    %567 = vector.extract_strided_slice %555 {offsets = [0, 64], sizes = [8, 32], strides = [1, 1]} : vector<8x96xf32> to vector<8x32xf32>
    %568 = arith.mulf %564, %567 : vector<8x32xf32>
    %569 = arith.addf %566, %568 : vector<8x32xf32>
    %570 = math.tanh %569 : vector<8x32xf32>
    %cst_155 = arith.constant 1.000000e+00 : f32
    %571 = vector.broadcast %cst_155 : f32 to vector<8x32xf32>
    %572 = arith.subf %571, %565 : vector<8x32xf32>
    %573 = arith.mulf %572, %570 : vector<8x32xf32>
    %574 = arith.mulf %565, %556 : vector<8x32xf32>
    %575 = arith.addf %573, %574 : vector<8x32xf32>
    %576 = tpu.concatenate %553, %575 in 1 : vector<8x32xf32>, vector<8x32xf32> -> vector<8x64xf32>
    %cst_156 = arith.constant dense<0.000000e+00> : vector<8x192xf32>
    %577 = tpu.matmul %576, %5, %cst_156 {dimension_numbers = #tpu.dot_dimension_numbers<[1], [0], [0], [1], [0, 0, 1, 1], [], []>} : vector<8x64xf32>, vector<64x192xf32>, vector<8x192xf32> -> vector<8x192xf32>
    %578 = vector.broadcast %13 : vector<1x192xf32> to vector<8x192xf32>
    %579 = arith.addf %577, %578 : vector<8x192xf32>
    %c24_157 = arith.constant 24 : index
    %c0_158 = arith.constant 0 : index
    %580 = vector.load %arg7[%c24_157, %c0_158] : memref<64x96xf32, #tpu.memory_space<vmem>>, vector<8x96xf32>
    %581 = vector.extract_strided_slice %579 {offsets = [0, 0], sizes = [8, 96], strides = [1, 1]} : vector<8x192xf32> to vector<8x96xf32>
    %582 = vector.extract_strided_slice %576 {offsets = [0, 0], sizes = [8, 32], strides = [1, 1]} : vector<8x64xf32> to vector<8x32xf32>
    %583 = arith.addf %580, %581 : vector<8x96xf32>
    %584 = vector.extract_strided_slice %583 {offsets = [0, 0], sizes = [8, 64], strides = [1, 1]} : vector<8x96xf32> to vector<8x64xf32>
    %585 = arith.negf %584 : vector<8x64xf32>
    %586 = math.exp %585 : vector<8x64xf32>
    %cst_159 = arith.constant 1.000000e+00 : f32
    %587 = vector.broadcast %cst_159 : f32 to vector<8x64xf32>
    %588 = arith.addf %587, %586 : vector<8x64xf32>
    %589 = arith.divf %587, %588 : vector<8x64xf32>
    %590 = vector.extract_strided_slice %589 {offsets = [0, 0], sizes = [8, 32], strides = [1, 1]} : vector<8x64xf32> to vector<8x32xf32>
    %591 = vector.extract_strided_slice %589 {offsets = [0, 32], sizes = [8, 32], strides = [1, 1]} : vector<8x64xf32> to vector<8x32xf32>
    %592 = vector.extract_strided_slice %580 {offsets = [0, 64], sizes = [8, 32], strides = [1, 1]} : vector<8x96xf32> to vector<8x32xf32>
    %593 = vector.extract_strided_slice %581 {offsets = [0, 64], sizes = [8, 32], strides = [1, 1]} : vector<8x96xf32> to vector<8x32xf32>
    %594 = arith.mulf %590, %593 : vector<8x32xf32>
    %595 = arith.addf %592, %594 : vector<8x32xf32>
    %596 = math.tanh %595 : vector<8x32xf32>
    %cst_160 = arith.constant 1.000000e+00 : f32
    %597 = vector.broadcast %cst_160 : f32 to vector<8x32xf32>
    %598 = arith.subf %597, %591 : vector<8x32xf32>
    %599 = arith.mulf %598, %596 : vector<8x32xf32>
    %600 = arith.mulf %591, %582 : vector<8x32xf32>
    %601 = arith.addf %599, %600 : vector<8x32xf32>
    %c32_161 = arith.constant 32 : index
    %c0_162 = arith.constant 0 : index
    %602 = vector.load %arg8[%c32_161, %c0_162] : memref<64x96xf32, #tpu.memory_space<vmem>>, vector<8x96xf32>
    %603 = vector.extract_strided_slice %579 {offsets = [0, 96], sizes = [8, 96], strides = [1, 1]} : vector<8x192xf32> to vector<8x96xf32>
    %604 = vector.extract_strided_slice %576 {offsets = [0, 32], sizes = [8, 32], strides = [1, 1]} : vector<8x64xf32> to vector<8x32xf32>
    %605 = arith.addf %602, %603 : vector<8x96xf32>
    %606 = vector.extract_strided_slice %605 {offsets = [0, 0], sizes = [8, 64], strides = [1, 1]} : vector<8x96xf32> to vector<8x64xf32>
    %607 = arith.negf %606 : vector<8x64xf32>
    %608 = math.exp %607 : vector<8x64xf32>
    %cst_163 = arith.constant 1.000000e+00 : f32
    %609 = vector.broadcast %cst_163 : f32 to vector<8x64xf32>
    %610 = arith.addf %609, %608 : vector<8x64xf32>
    %611 = arith.divf %609, %610 : vector<8x64xf32>
    %612 = vector.extract_strided_slice %611 {offsets = [0, 0], sizes = [8, 32], strides = [1, 1]} : vector<8x64xf32> to vector<8x32xf32>
    %613 = vector.extract_strided_slice %611 {offsets = [0, 32], sizes = [8, 32], strides = [1, 1]} : vector<8x64xf32> to vector<8x32xf32>
    %614 = vector.extract_strided_slice %602 {offsets = [0, 64], sizes = [8, 32], strides = [1, 1]} : vector<8x96xf32> to vector<8x32xf32>
    %615 = vector.extract_strided_slice %603 {offsets = [0, 64], sizes = [8, 32], strides = [1, 1]} : vector<8x96xf32> to vector<8x32xf32>
    %616 = arith.mulf %612, %615 : vector<8x32xf32>
    %617 = arith.addf %614, %616 : vector<8x32xf32>
    %618 = math.tanh %617 : vector<8x32xf32>
    %cst_164 = arith.constant 1.000000e+00 : f32
    %619 = vector.broadcast %cst_164 : f32 to vector<8x32xf32>
    %620 = arith.subf %619, %613 : vector<8x32xf32>
    %621 = arith.mulf %620, %618 : vector<8x32xf32>
    %622 = arith.mulf %613, %604 : vector<8x32xf32>
    %623 = arith.addf %621, %622 : vector<8x32xf32>
    %624 = tpu.concatenate %601, %623 in 1 : vector<8x32xf32>, vector<8x32xf32> -> vector<8x64xf32>
    %cst_165 = arith.constant dense<0.000000e+00> : vector<8x192xf32>
    %625 = tpu.matmul %624, %5, %cst_165 {dimension_numbers = #tpu.dot_dimension_numbers<[1], [0], [0], [1], [0, 0, 1, 1], [], []>} : vector<8x64xf32>, vector<64x192xf32>, vector<8x192xf32> -> vector<8x192xf32>
    %626 = vector.broadcast %13 : vector<1x192xf32> to vector<8x192xf32>
    %627 = arith.addf %625, %626 : vector<8x192xf32>
    %c32_166 = arith.constant 32 : index
    %c0_167 = arith.constant 0 : index
    %628 = vector.load %arg7[%c32_166, %c0_167] : memref<64x96xf32, #tpu.memory_space<vmem>>, vector<8x96xf32>
    %629 = vector.extract_strided_slice %627 {offsets = [0, 0], sizes = [8, 96], strides = [1, 1]} : vector<8x192xf32> to vector<8x96xf32>
    %630 = vector.extract_strided_slice %624 {offsets = [0, 0], sizes = [8, 32], strides = [1, 1]} : vector<8x64xf32> to vector<8x32xf32>
    %631 = arith.addf %628, %629 : vector<8x96xf32>
    %632 = vector.extract_strided_slice %631 {offsets = [0, 0], sizes = [8, 64], strides = [1, 1]} : vector<8x96xf32> to vector<8x64xf32>
    %633 = arith.negf %632 : vector<8x64xf32>
    %634 = math.exp %633 : vector<8x64xf32>
    %cst_168 = arith.constant 1.000000e+00 : f32
    %635 = vector.broadcast %cst_168 : f32 to vector<8x64xf32>
    %636 = arith.addf %635, %634 : vector<8x64xf32>
    %637 = arith.divf %635, %636 : vector<8x64xf32>
    %638 = vector.extract_strided_slice %637 {offsets = [0, 0], sizes = [8, 32], strides = [1, 1]} : vector<8x64xf32> to vector<8x32xf32>
    %639 = vector.extract_strided_slice %637 {offsets = [0, 32], sizes = [8, 32], strides = [1, 1]} : vector<8x64xf32> to vector<8x32xf32>
    %640 = vector.extract_strided_slice %628 {offsets = [0, 64], sizes = [8, 32], strides = [1, 1]} : vector<8x96xf32> to vector<8x32xf32>
    %641 = vector.extract_strided_slice %629 {offsets = [0, 64], sizes = [8, 32], strides = [1, 1]} : vector<8x96xf32> to vector<8x32xf32>
    %642 = arith.mulf %638, %641 : vector<8x32xf32>
    %643 = arith.addf %640, %642 : vector<8x32xf32>
    %644 = math.tanh %643 : vector<8x32xf32>
    %cst_169 = arith.constant 1.000000e+00 : f32
    %645 = vector.broadcast %cst_169 : f32 to vector<8x32xf32>
    %646 = arith.subf %645, %639 : vector<8x32xf32>
    %647 = arith.mulf %646, %644 : vector<8x32xf32>
    %648 = arith.mulf %639, %630 : vector<8x32xf32>
    %649 = arith.addf %647, %648 : vector<8x32xf32>
    %c24_170 = arith.constant 24 : index
    %c0_171 = arith.constant 0 : index
    %650 = vector.load %arg8[%c24_170, %c0_171] : memref<64x96xf32, #tpu.memory_space<vmem>>, vector<8x96xf32>
    %651 = vector.extract_strided_slice %627 {offsets = [0, 96], sizes = [8, 96], strides = [1, 1]} : vector<8x192xf32> to vector<8x96xf32>
    %652 = vector.extract_strided_slice %624 {offsets = [0, 32], sizes = [8, 32], strides = [1, 1]} : vector<8x64xf32> to vector<8x32xf32>
    %653 = arith.addf %650, %651 : vector<8x96xf32>
    %654 = vector.extract_strided_slice %653 {offsets = [0, 0], sizes = [8, 64], strides = [1, 1]} : vector<8x96xf32> to vector<8x64xf32>
    %655 = arith.negf %654 : vector<8x64xf32>
    %656 = math.exp %655 : vector<8x64xf32>
    %cst_172 = arith.constant 1.000000e+00 : f32
    %657 = vector.broadcast %cst_172 : f32 to vector<8x64xf32>
    %658 = arith.addf %657, %656 : vector<8x64xf32>
    %659 = arith.divf %657, %658 : vector<8x64xf32>
    %660 = vector.extract_strided_slice %659 {offsets = [0, 0], sizes = [8, 32], strides = [1, 1]} : vector<8x64xf32> to vector<8x32xf32>
    %661 = vector.extract_strided_slice %659 {offsets = [0, 32], sizes = [8, 32], strides = [1, 1]} : vector<8x64xf32> to vector<8x32xf32>
    %662 = vector.extract_strided_slice %650 {offsets = [0, 64], sizes = [8, 32], strides = [1, 1]} : vector<8x96xf32> to vector<8x32xf32>
    %663 = vector.extract_strided_slice %651 {offsets = [0, 64], sizes = [8, 32], strides = [1, 1]} : vector<8x96xf32> to vector<8x32xf32>
    %664 = arith.mulf %660, %663 : vector<8x32xf32>
    %665 = arith.addf %662, %664 : vector<8x32xf32>
    %666 = math.tanh %665 : vector<8x32xf32>
    %cst_173 = arith.constant 1.000000e+00 : f32
    %667 = vector.broadcast %cst_173 : f32 to vector<8x32xf32>
    %668 = arith.subf %667, %661 : vector<8x32xf32>
    %669 = arith.mulf %668, %666 : vector<8x32xf32>
    %670 = arith.mulf %661, %652 : vector<8x32xf32>
    %671 = arith.addf %669, %670 : vector<8x32xf32>
    %672 = tpu.concatenate %649, %671 in 1 : vector<8x32xf32>, vector<8x32xf32> -> vector<8x64xf32>
    %cst_174 = arith.constant dense<0.000000e+00> : vector<8x192xf32>
    %673 = tpu.matmul %672, %5, %cst_174 {dimension_numbers = #tpu.dot_dimension_numbers<[1], [0], [0], [1], [0, 0, 1, 1], [], []>} : vector<8x64xf32>, vector<64x192xf32>, vector<8x192xf32> -> vector<8x192xf32>
    %674 = vector.broadcast %13 : vector<1x192xf32> to vector<8x192xf32>
    %675 = arith.addf %673, %674 : vector<8x192xf32>
    %c40_175 = arith.constant 40 : index
    %c0_176 = arith.constant 0 : index
    %676 = vector.load %arg7[%c40_175, %c0_176] : memref<64x96xf32, #tpu.memory_space<vmem>>, vector<8x96xf32>
    %677 = vector.extract_strided_slice %675 {offsets = [0, 0], sizes = [8, 96], strides = [1, 1]} : vector<8x192xf32> to vector<8x96xf32>
    %678 = vector.extract_strided_slice %672 {offsets = [0, 0], sizes = [8, 32], strides = [1, 1]} : vector<8x64xf32> to vector<8x32xf32>
    %679 = arith.addf %676, %677 : vector<8x96xf32>
    %680 = vector.extract_strided_slice %679 {offsets = [0, 0], sizes = [8, 64], strides = [1, 1]} : vector<8x96xf32> to vector<8x64xf32>
    %681 = arith.negf %680 : vector<8x64xf32>
    %682 = math.exp %681 : vector<8x64xf32>
    %cst_177 = arith.constant 1.000000e+00 : f32
    %683 = vector.broadcast %cst_177 : f32 to vector<8x64xf32>
    %684 = arith.addf %683, %682 : vector<8x64xf32>
    %685 = arith.divf %683, %684 : vector<8x64xf32>
    %686 = vector.extract_strided_slice %685 {offsets = [0, 0], sizes = [8, 32], strides = [1, 1]} : vector<8x64xf32> to vector<8x32xf32>
    %687 = vector.extract_strided_slice %685 {offsets = [0, 32], sizes = [8, 32], strides = [1, 1]} : vector<8x64xf32> to vector<8x32xf32>
    %688 = vector.extract_strided_slice %676 {offsets = [0, 64], sizes = [8, 32], strides = [1, 1]} : vector<8x96xf32> to vector<8x32xf32>
    %689 = vector.extract_strided_slice %677 {offsets = [0, 64], sizes = [8, 32], strides = [1, 1]} : vector<8x96xf32> to vector<8x32xf32>
    %690 = arith.mulf %686, %689 : vector<8x32xf32>
    %691 = arith.addf %688, %690 : vector<8x32xf32>
    %692 = math.tanh %691 : vector<8x32xf32>
    %cst_178 = arith.constant 1.000000e+00 : f32
    %693 = vector.broadcast %cst_178 : f32 to vector<8x32xf32>
    %694 = arith.subf %693, %687 : vector<8x32xf32>
    %695 = arith.mulf %694, %692 : vector<8x32xf32>
    %696 = arith.mulf %687, %678 : vector<8x32xf32>
    %697 = arith.addf %695, %696 : vector<8x32xf32>
    %c16_179 = arith.constant 16 : index
    %c0_180 = arith.constant 0 : index
    %698 = vector.load %arg8[%c16_179, %c0_180] : memref<64x96xf32, #tpu.memory_space<vmem>>, vector<8x96xf32>
    %699 = vector.extract_strided_slice %675 {offsets = [0, 96], sizes = [8, 96], strides = [1, 1]} : vector<8x192xf32> to vector<8x96xf32>
    %700 = vector.extract_strided_slice %672 {offsets = [0, 32], sizes = [8, 32], strides = [1, 1]} : vector<8x64xf32> to vector<8x32xf32>
    %701 = arith.addf %698, %699 : vector<8x96xf32>
    %702 = vector.extract_strided_slice %701 {offsets = [0, 0], sizes = [8, 64], strides = [1, 1]} : vector<8x96xf32> to vector<8x64xf32>
    %703 = arith.negf %702 : vector<8x64xf32>
    %704 = math.exp %703 : vector<8x64xf32>
    %cst_181 = arith.constant 1.000000e+00 : f32
    %705 = vector.broadcast %cst_181 : f32 to vector<8x64xf32>
    %706 = arith.addf %705, %704 : vector<8x64xf32>
    %707 = arith.divf %705, %706 : vector<8x64xf32>
    %708 = vector.extract_strided_slice %707 {offsets = [0, 0], sizes = [8, 32], strides = [1, 1]} : vector<8x64xf32> to vector<8x32xf32>
    %709 = vector.extract_strided_slice %707 {offsets = [0, 32], sizes = [8, 32], strides = [1, 1]} : vector<8x64xf32> to vector<8x32xf32>
    %710 = vector.extract_strided_slice %698 {offsets = [0, 64], sizes = [8, 32], strides = [1, 1]} : vector<8x96xf32> to vector<8x32xf32>
    %711 = vector.extract_strided_slice %699 {offsets = [0, 64], sizes = [8, 32], strides = [1, 1]} : vector<8x96xf32> to vector<8x32xf32>
    %712 = arith.mulf %708, %711 : vector<8x32xf32>
    %713 = arith.addf %710, %712 : vector<8x32xf32>
    %714 = math.tanh %713 : vector<8x32xf32>
    %cst_182 = arith.constant 1.000000e+00 : f32
    %715 = vector.broadcast %cst_182 : f32 to vector<8x32xf32>
    %716 = arith.subf %715, %709 : vector<8x32xf32>
    %717 = arith.mulf %716, %714 : vector<8x32xf32>
    %718 = arith.mulf %709, %700 : vector<8x32xf32>
    %719 = arith.addf %717, %718 : vector<8x32xf32>
    %720 = tpu.concatenate %697, %719 in 1 : vector<8x32xf32>, vector<8x32xf32> -> vector<8x64xf32>
    %cst_183 = arith.constant dense<0.000000e+00> : vector<8x192xf32>
    %721 = tpu.matmul %720, %5, %cst_183 {dimension_numbers = #tpu.dot_dimension_numbers<[1], [0], [0], [1], [0, 0, 1, 1], [], []>} : vector<8x64xf32>, vector<64x192xf32>, vector<8x192xf32> -> vector<8x192xf32>
    %722 = vector.broadcast %13 : vector<1x192xf32> to vector<8x192xf32>
    %723 = arith.addf %721, %722 : vector<8x192xf32>
    %c48_184 = arith.constant 48 : index
    %c0_185 = arith.constant 0 : index
    %724 = vector.load %arg7[%c48_184, %c0_185] : memref<64x96xf32, #tpu.memory_space<vmem>>, vector<8x96xf32>
    %725 = vector.extract_strided_slice %723 {offsets = [0, 0], sizes = [8, 96], strides = [1, 1]} : vector<8x192xf32> to vector<8x96xf32>
    %726 = vector.extract_strided_slice %720 {offsets = [0, 0], sizes = [8, 32], strides = [1, 1]} : vector<8x64xf32> to vector<8x32xf32>
    %727 = arith.addf %724, %725 : vector<8x96xf32>
    %728 = vector.extract_strided_slice %727 {offsets = [0, 0], sizes = [8, 64], strides = [1, 1]} : vector<8x96xf32> to vector<8x64xf32>
    %729 = arith.negf %728 : vector<8x64xf32>
    %730 = math.exp %729 : vector<8x64xf32>
    %cst_186 = arith.constant 1.000000e+00 : f32
    %731 = vector.broadcast %cst_186 : f32 to vector<8x64xf32>
    %732 = arith.addf %731, %730 : vector<8x64xf32>
    %733 = arith.divf %731, %732 : vector<8x64xf32>
    %734 = vector.extract_strided_slice %733 {offsets = [0, 0], sizes = [8, 32], strides = [1, 1]} : vector<8x64xf32> to vector<8x32xf32>
    %735 = vector.extract_strided_slice %733 {offsets = [0, 32], sizes = [8, 32], strides = [1, 1]} : vector<8x64xf32> to vector<8x32xf32>
    %736 = vector.extract_strided_slice %724 {offsets = [0, 64], sizes = [8, 32], strides = [1, 1]} : vector<8x96xf32> to vector<8x32xf32>
    %737 = vector.extract_strided_slice %725 {offsets = [0, 64], sizes = [8, 32], strides = [1, 1]} : vector<8x96xf32> to vector<8x32xf32>
    %738 = arith.mulf %734, %737 : vector<8x32xf32>
    %739 = arith.addf %736, %738 : vector<8x32xf32>
    %740 = math.tanh %739 : vector<8x32xf32>
    %cst_187 = arith.constant 1.000000e+00 : f32
    %741 = vector.broadcast %cst_187 : f32 to vector<8x32xf32>
    %742 = arith.subf %741, %735 : vector<8x32xf32>
    %743 = arith.mulf %742, %740 : vector<8x32xf32>
    %744 = arith.mulf %735, %726 : vector<8x32xf32>
    %745 = arith.addf %743, %744 : vector<8x32xf32>
    %c8_188 = arith.constant 8 : index
    %c0_189 = arith.constant 0 : index
    %746 = vector.load %arg8[%c8_188, %c0_189] : memref<64x96xf32, #tpu.memory_space<vmem>>, vector<8x96xf32>
    %747 = vector.extract_strided_slice %723 {offsets = [0, 96], sizes = [8, 96], strides = [1, 1]} : vector<8x192xf32> to vector<8x96xf32>
    %748 = vector.extract_strided_slice %720 {offsets = [0, 32], sizes = [8, 32], strides = [1, 1]} : vector<8x64xf32> to vector<8x32xf32>
    %749 = arith.addf %746, %747 : vector<8x96xf32>
    %750 = vector.extract_strided_slice %749 {offsets = [0, 0], sizes = [8, 64], strides = [1, 1]} : vector<8x96xf32> to vector<8x64xf32>
    %751 = arith.negf %750 : vector<8x64xf32>
    %752 = math.exp %751 : vector<8x64xf32>
    %cst_190 = arith.constant 1.000000e+00 : f32
    %753 = vector.broadcast %cst_190 : f32 to vector<8x64xf32>
    %754 = arith.addf %753, %752 : vector<8x64xf32>
    %755 = arith.divf %753, %754 : vector<8x64xf32>
    %756 = vector.extract_strided_slice %755 {offsets = [0, 0], sizes = [8, 32], strides = [1, 1]} : vector<8x64xf32> to vector<8x32xf32>
    %757 = vector.extract_strided_slice %755 {offsets = [0, 32], sizes = [8, 32], strides = [1, 1]} : vector<8x64xf32> to vector<8x32xf32>
    %758 = vector.extract_strided_slice %746 {offsets = [0, 64], sizes = [8, 32], strides = [1, 1]} : vector<8x96xf32> to vector<8x32xf32>
    %759 = vector.extract_strided_slice %747 {offsets = [0, 64], sizes = [8, 32], strides = [1, 1]} : vector<8x96xf32> to vector<8x32xf32>
    %760 = arith.mulf %756, %759 : vector<8x32xf32>
    %761 = arith.addf %758, %760 : vector<8x32xf32>
    %762 = math.tanh %761 : vector<8x32xf32>
    %cst_191 = arith.constant 1.000000e+00 : f32
    %763 = vector.broadcast %cst_191 : f32 to vector<8x32xf32>
    %764 = arith.subf %763, %757 : vector<8x32xf32>
    %765 = arith.mulf %764, %762 : vector<8x32xf32>
    %766 = arith.mulf %757, %748 : vector<8x32xf32>
    %767 = arith.addf %765, %766 : vector<8x32xf32>
    %768 = tpu.concatenate %745, %767 in 1 : vector<8x32xf32>, vector<8x32xf32> -> vector<8x64xf32>
    %cst_192 = arith.constant dense<0.000000e+00> : vector<8x192xf32>
    %769 = tpu.matmul %768, %5, %cst_192 {dimension_numbers = #tpu.dot_dimension_numbers<[1], [0], [0], [1], [0, 0, 1, 1], [], []>} : vector<8x64xf32>, vector<64x192xf32>, vector<8x192xf32> -> vector<8x192xf32>
    %770 = vector.broadcast %13 : vector<1x192xf32> to vector<8x192xf32>
    %771 = arith.addf %769, %770 : vector<8x192xf32>
    %c56_193 = arith.constant 56 : index
    %c0_194 = arith.constant 0 : index
    %772 = vector.load %arg7[%c56_193, %c0_194] : memref<64x96xf32, #tpu.memory_space<vmem>>, vector<8x96xf32>
    %773 = vector.extract_strided_slice %771 {offsets = [0, 0], sizes = [8, 96], strides = [1, 1]} : vector<8x192xf32> to vector<8x96xf32>
    %774 = vector.extract_strided_slice %768 {offsets = [0, 0], sizes = [8, 32], strides = [1, 1]} : vector<8x64xf32> to vector<8x32xf32>
    %775 = arith.addf %772, %773 : vector<8x96xf32>
    %776 = vector.extract_strided_slice %775 {offsets = [0, 0], sizes = [8, 64], strides = [1, 1]} : vector<8x96xf32> to vector<8x64xf32>
    %777 = arith.negf %776 : vector<8x64xf32>
    %778 = math.exp %777 : vector<8x64xf32>
    %cst_195 = arith.constant 1.000000e+00 : f32
    %779 = vector.broadcast %cst_195 : f32 to vector<8x64xf32>
    %780 = arith.addf %779, %778 : vector<8x64xf32>
    %781 = arith.divf %779, %780 : vector<8x64xf32>
    %782 = vector.extract_strided_slice %781 {offsets = [0, 0], sizes = [8, 32], strides = [1, 1]} : vector<8x64xf32> to vector<8x32xf32>
    %783 = vector.extract_strided_slice %781 {offsets = [0, 32], sizes = [8, 32], strides = [1, 1]} : vector<8x64xf32> to vector<8x32xf32>
    %784 = vector.extract_strided_slice %772 {offsets = [0, 64], sizes = [8, 32], strides = [1, 1]} : vector<8x96xf32> to vector<8x32xf32>
    %785 = vector.extract_strided_slice %773 {offsets = [0, 64], sizes = [8, 32], strides = [1, 1]} : vector<8x96xf32> to vector<8x32xf32>
    %786 = arith.mulf %782, %785 : vector<8x32xf32>
    %787 = arith.addf %784, %786 : vector<8x32xf32>
    %788 = math.tanh %787 : vector<8x32xf32>
    %cst_196 = arith.constant 1.000000e+00 : f32
    %789 = vector.broadcast %cst_196 : f32 to vector<8x32xf32>
    %790 = arith.subf %789, %783 : vector<8x32xf32>
    %791 = arith.mulf %790, %788 : vector<8x32xf32>
    %792 = arith.mulf %783, %774 : vector<8x32xf32>
    %793 = arith.addf %791, %792 : vector<8x32xf32>
    %c0_197 = arith.constant 0 : index
    %c0_198 = arith.constant 0 : index
    %794 = vector.load %arg8[%c0_197, %c0_198] : memref<64x96xf32, #tpu.memory_space<vmem>>, vector<8x96xf32>
    %795 = vector.extract_strided_slice %771 {offsets = [0, 96], sizes = [8, 96], strides = [1, 1]} : vector<8x192xf32> to vector<8x96xf32>
    %796 = vector.extract_strided_slice %768 {offsets = [0, 32], sizes = [8, 32], strides = [1, 1]} : vector<8x64xf32> to vector<8x32xf32>
    %797 = arith.addf %794, %795 : vector<8x96xf32>
    %798 = vector.extract_strided_slice %797 {offsets = [0, 0], sizes = [8, 64], strides = [1, 1]} : vector<8x96xf32> to vector<8x64xf32>
    %799 = arith.negf %798 : vector<8x64xf32>
    %800 = math.exp %799 : vector<8x64xf32>
    %cst_199 = arith.constant 1.000000e+00 : f32
    %801 = vector.broadcast %cst_199 : f32 to vector<8x64xf32>
    %802 = arith.addf %801, %800 : vector<8x64xf32>
    %803 = arith.divf %801, %802 : vector<8x64xf32>
    %804 = vector.extract_strided_slice %803 {offsets = [0, 0], sizes = [8, 32], strides = [1, 1]} : vector<8x64xf32> to vector<8x32xf32>
    %805 = vector.extract_strided_slice %803 {offsets = [0, 32], sizes = [8, 32], strides = [1, 1]} : vector<8x64xf32> to vector<8x32xf32>
    %806 = vector.extract_strided_slice %794 {offsets = [0, 64], sizes = [8, 32], strides = [1, 1]} : vector<8x96xf32> to vector<8x32xf32>
    %807 = vector.extract_strided_slice %795 {offsets = [0, 64], sizes = [8, 32], strides = [1, 1]} : vector<8x96xf32> to vector<8x32xf32>
    %808 = arith.mulf %804, %807 : vector<8x32xf32>
    %809 = arith.addf %806, %808 : vector<8x32xf32>
    %810 = math.tanh %809 : vector<8x32xf32>
    %cst_200 = arith.constant 1.000000e+00 : f32
    %811 = vector.broadcast %cst_200 : f32 to vector<8x32xf32>
    %812 = arith.subf %811, %805 : vector<8x32xf32>
    %813 = arith.mulf %812, %810 : vector<8x32xf32>
    %814 = arith.mulf %805, %796 : vector<8x32xf32>
    %815 = arith.addf %813, %814 : vector<8x32xf32>
    %816 = tpu.concatenate %793, %815 in 1 : vector<8x32xf32>, vector<8x32xf32> -> vector<8x64xf32>
    %cst_201 = arith.constant dense<0.000000e+00> : vector<8x96xf32>
    %817 = tpu.matmul %816, %6, %cst_201 {dimension_numbers = #tpu.dot_dimension_numbers<[1], [0], [0], [1], [0, 0, 1, 1], [], []>} : vector<8x64xf32>, vector<64x96xf32>, vector<8x96xf32> -> vector<8x96xf32>
    %818 = vector.broadcast %7 : vector<1x96xf32> to vector<8x96xf32>
    %819 = arith.addf %817, %818 : vector<8x96xf32>
    %820 = vector.extract_strided_slice %819 {offsets = [0, 0], sizes = [8, 3], strides = [1, 1]} : vector<8x96xf32> to vector<8x3xf32>
    %c0_202 = arith.constant 0 : index
    %c0_203 = arith.constant 0 : index
    %821 = vector.load %arg3[%c0_202, %c0_203] : memref<8x3xf32, #tpu.memory_space<vmem>>, vector<8x3xf32>
    tpu.vector_store %arg3[%c0_202, %c0_203], %820 {strides = array<i32>} : memref<8x3xf32, #tpu.memory_space<vmem>>, vector<8x3xf32>,
    return
  }
  func.func @transform_0(%arg0: i32) -> (i32, i32) {
    %c0_i32 = arith.constant 0 : i32
    %c0_i32_0 = arith.constant 0 : i32
    %c0_i32_1 = arith.constant 0 : i32
    return %c0_i32, %c0_i32_0 : i32, i32
  }
  func.func @transform_1(%arg0: i32) -> (i32, i32) {
    %c0_i32 = arith.constant 0 : i32
    %c0_i32_0 = arith.constant 0 : i32
    %c0_i32_1 = arith.constant 0 : i32
    return %c0_i32, %c0_i32_0 : i32, i32
  }
  func.func @transform_2(%arg0: i32) -> (i32, i32) {
    %c0_i32 = arith.constant 0 : i32
    %c0_i32_0 = arith.constant 0 : i32
    %c0_i32_1 = arith.constant 0 : i32
    return %c0_i32, %c0_i32_0 : i32, i32
  }
}

</mosaic_0001>

<bundles_post_ra>
// kernel: bert_gru_forward_pallas.1
= control target key start
LH: loop header
LB: loop body
LE: loop exit
PB: predicated region body
PF: predicated region fallthrough
CT: control target
= control target key end

     0   :  { %vm92_vm0 = vcmask 261120   ;;  %v3758_v44 = vmov 0.0   ;;  %vm222_vm1 = vcmask 785408   ;;  %v345_v49 = vlaneseq  ;;  %s3759_s22 = smov 64   ;;  %s3760_s23 = smov 32   ;;  %s4604_s1 = inlined_call_operand.vmem [shape: f32[392,192], index: 1, kind: input, shape index: {}]   ;;  %s4605_s0 = inlined_call_operand.vmem [shape: f32[64,32], index: 0, kind: input, shape index: {}]   ;;  %s4606_s2 = inlined_call_operand.vmem [shape: f32[8,3], index: 2, kind: output, shape index: {}]  }
   0x1   :  { %v11_v0 = vld [vmem:[%s4604_s1] sm:$0xff]  ;;  %v12_v1 = vld [vmem:[%s4604_s1 + $0x10] sm:$0xff]  ;;  %v20_v7 = vld [vmem:[%s4604_s1 + $0x88] sm:$0xff]  ;;  %s3761_s24 = smov 96   ;;  %vm495_vm2 = vcmask 523520   ;;  %vm355_vm3 = vcmask 523264  }
   0x2   :  { %v13_v2 = vld [vmem:[%s4604_s1 + $0x20] sm:$0xff]  ;;  %v3244_v3 = vpack.c.bf16 %v12_v1, %v11_v0  ;;  %v14_v4 = vld [vmem:[%s4604_s1 + $0x30] sm:$0xff]  ;;  %v22_v8 = vld [vmem:[%s4604_s1 + $0x98] sm:$0xff]  ;;  %v3942_v54 = vshrl.u32 %v345_v49, 7  ;;  %vm3763_vm4 = vmmov 0   ;;  %vm2977_vm5 = vcmask 23552  }
   0x3   :  { %v84_v5 = vld [vmem:[%s4605_s0] sm:$0xff]  ;;  %v3248_v6 = vpack.c.bf16 %v14_v4, %v13_v2  ;;  %v3802_v9 = vpack.c.bf16 %v22_v8, %v20_v7  ;;  %v21_v11 = vld [vmem:[%s4604_s1 + $0x90] sm:$0xff]  ;;  %v24_v12 = vld [vmem:[%s4604_s1 + $0xa8] sm:$0xff] }
   0x4   :  { %3137 = vmatprep.mubr.msk.f32.mxu0 %vm92_vm0, %v84_v5  ;;  %3157 = vmatprep.mubr.msk.f32.mxu1 %vm92_vm0, %v84_v5  ;;  %v19_v10 = vld [vmem:[%s4604_s1 + $0x80] sm:$0xff]  ;;  %v26_v13 = vld [vmem:[%s4604_s1 + $0xb8] sm:$0xff]  ;;  %v85_v14 = vld [vmem:[%s4605_s0 + $0x8] sm:$0xff]  ;;  %v347_v60 = vsub.s32 0, %v3942_v54  ;;  %v351_v62 = vsub.s32 1, %v3942_v54 }
   0x5   :  { %3245 = vmatprep.subr.bf16.mxu0 %v3244_v3  ;;  %v3819_v15 = vpack.c.bf16 %v21_v11, %v19_v10  ;;  %v86_v16 = vld [vmem:[%s4605_s0 + $0x10] sm:$0xff]  ;;  %v23_v17 = vld [vmem:[%s4604_s1 + $0xa0] sm:$0xff]  ;;  %v3831_v19 = vpack.c.bf16 %v26_v13, %v24_v12  ;;  %v28_v20 = vld [vmem:[%s4604_s1 + $0xc8] sm:$0xff] }
   0x6   :  { %3247 = vmatpush3.bf16.msra.mxu0 %v3244_v3  ;;  %v25_v18 = vld [vmem:[%s4604_s1 + $0xb0] sm:$0xff]  ;;  %v15_v21 = vld [vmem:[%s4604_s1 + $0x40] sm:$0xff]  ;;  %v30_v23 = vld [vmem:[%s4604_s1 + $0xd8] sm:$0xff] }
   0x7   :  { %3249 = vmatprep.subr.bf16.mxu0 %v3248_v6  ;;  %v16_v22 = vld [vmem:[%s4604_s1 + $0x50] sm:$0xff]  ;;  %v17_v25 = vld [vmem:[%s4604_s1 + $0x60] sm:$0xff]  ;;  %v87_v28 = vld [vmem:[%s4605_s0 + $0x18] sm:$0xff]  ;;  %v3857_v29 = vpack.c.bf16 %v25_v18, %v23_v17  ;;  %v3863_v31 = vpack.c.bf16 %v30_v23, %v28_v20 }
   0x8   :  { %v3252_v24 = vpack.c.bf16 %v16_v22, %v15_v21  ;;  %v18_v26 = vld [vmem:[%s4604_s1 + $0x70] sm:$0xff]  ;;  %v88_v30 = vld [vmem:[%s4605_s0 + $0x20] sm:$0xff]  ;;  %v32_v34 = vld [vmem:[%s4604_s1 + $0xe8] sm:$0xff] }
   0x9   :  { %v3256_v27 = vpack.c.bf16 %v18_v26, %v17_v25  ;;  %v27_v32 = vld [vmem:[%s4604_s1 + $0xc0] sm:$0xff]  ;;  %v29_v33 = vld [vmem:[%s4604_s1 + $0xd0] sm:$0xff]  ;;  %v34_v35 = vld [vmem:[%s4604_s1 + $0xf8] sm:$0xff] }
   0xa   :  { %3251 = vmatpush3.bf16.msra.mxu0 %v3248_v6  ;;  %3253 = vmatprep.subr.bf16.mxu1 %v3252_v24  ;;  %v89_v36 = vld [vmem:[%s4605_s0 + $0x28] sm:$0xff]  ;;  %v3883_v37 = vpack.c.bf16 %v29_v33, %v27_v32  ;;  %v90_v38 = vld [vmem:[%s4605_s0 + $0x30] sm:$0xff]  ;;  %v3889_v39 = vpack.c.bf16 %v34_v35, %v32_v34  ;;  %v31_v40 = vld [vmem:[%s4604_s1 + $0xe0] sm:$0xff] }
   0xb   :  { %3261 = vmatprep.subr.bf16.mxu0 %v3802_v9  ;;  %3255 = vmatpush3.bf16.msra.mxu1 %v3252_v24  ;;  %v33_v41 = vld [vmem:[%s4604_s1 + $0xf0] sm:$0xff]  ;;  %v91_v42 = vld [vmem:[%s4605_s0 + $0x38] sm:$0xff]  ;;  %v76_v45 = vld [vmem:[%s4604_s1 + $0x301] ss:$0 sm:$0xff] }
   0xc   :  { %3257 = vmatprep.subr.bf16.mxu1 %v3256_v27  ;;  %v3904_v43 = vpack.c.bf16 %v33_v41, %v31_v40  ;;  %v2983_v59 = vld [vmem:[%s4604_s1 + $0x303] ss:$8 sm:$0x3]  ;;  %v77_v0 = vld [vmem:[%s4604_s1 + $0x302] ss:$0 sm:$0xff] }
   0xd   :  { %3138 = vmatmul.mubr.msk.f32.vlgmr.msra.gmra.mrb[0].mxu0 %vm92_vm0, %v85_v14  ;;  %v3958_v7 = vrot.slane %v2983_v59, %v347_v60  ;;  %v3963_v10 = vrot.slane %v2983_v59, %v351_v62 }
   0xe   :  { %3263 = vmatpush1.bf16.msra.mxu0 %v3819_v15  ;;  %3140 = vmatprep.mubr.msk.f32.mxu0 %vm92_vm0, %v86_v16 }
   0xf   :  { %3265 = vmatprep.subr.bf16.mxu0 %v3831_v19  ;;  %3259 = vmatpush3.bf16.msra.mxu1 %v3256_v27 }
  0x10   :  { %3277 = vmatprep.subr.bf16.mxu1 %v3802_v9 }
  0x11   :  { %3141 = vmatmul.mubr.msk.f32.gmra.mrb[2].mxu0 %vm92_vm0, %v87_v28 }
  0x12   :  { %3267 = vmatpush1.bf16.msra.mxu0 %v3857_v29  ;;  %3143 = vmatprep.mubr.msk.f32.mxu0 %vm92_vm0, %v88_v30 }
  0x13   :  { %3269 = vmatprep.subr.bf16.mxu0 %v3863_v31  ;;  %3158 = vmatmul.mubr.msk.f32.vlgmr.msra.gmra.mrb[0].mxu1 %vm92_vm0, %v85_v14 }
  0x14   :  { %3160 = vmatprep.mubr.msk.f32.mxu1 %vm92_vm0, %v86_v16  ;;  %3279 = vmatpush1.bf16.msra.mxu1 %v3819_v15 }
  0x15   :  { %3144 = vmatmul.mubr.msk.f32.gmra.mrb[4].mxu0 %vm92_vm0, %v89_v36  ;;  %3281 = vmatprep.subr.bf16.mxu1 %v3831_v19 }
  0x16   :  { %3271 = vmatpush1.bf16.msra.mxu0 %v3883_v37  ;;  %3146 = vmatprep.mubr.msk.f32.mxu0 %vm92_vm0, %v90_v38 }
  0x17   :  { %3273 = vmatprep.subr.bf16.mxu0 %v3889_v39  ;;  %3161 = vmatmul.mubr.msk.f32.gmra.mrb[2].mxu1 %vm92_vm0, %v87_v28 }
  0x18   :  { %3163 = vmatprep.mubr.msk.f32.mxu1 %vm92_vm0, %v88_v30  ;;  %3283 = vmatpush1.bf16.msra.mxu1 %v3857_v29 }
  0x19   :  { %3147 = vmatmul.mubr.msk.f32.gmra.mrb[6].mxu0 %vm92_vm0, %v91_v42  ;;  %3285 = vmatprep.subr.bf16.mxu1 %v3863_v31 }
  0x1a   :  { %3275 = vmatpush1.bf16.msra.mxu0 %v3904_v43  ;;  %423 = vmatprep.mubr.f32.mxu0 %v3758_v44 }
  0x1b   :  { %3293 = vmatprep.subr.bf16.mxu0 %v3802_v9  ;;  %3164 = vmatmul.mubr.msk.f32.gmra.mrb[4].mxu1 %vm92_vm0, %v89_v36 }
  0x1c   :  { %3166 = vmatprep.mubr.msk.f32.mxu1 %vm92_vm0, %v90_v38  ;;  %3287 = vmatpush1.bf16.msra.mxu1 %v3883_v37 }
  0x1d   :  { %424 = vmatmul.mubr.f32.vlgmr.msra.gmra.mrb[8].mxu0 %v3758_v44  ;;  %3289 = vmatprep.subr.bf16.mxu1 %v3889_v39 }
  0x1e   :  { %3295 = vmatpush1.bf16.msra.mxu0 %v3819_v15  ;;  %709 = vmatprep.mubr.f32.mxu0 %v3758_v44 }
  0x1f   :  { %3297 = vmatprep.subr.bf16.mxu0 %v3831_v19  ;;  %3167 = vmatmul.mubr.msk.f32.gmra.mrb[6].mxu1 %vm92_vm0, %v91_v42 }
  0x20   :  { %3291 = vmatpush1.bf16.msra.mxu1 %v3904_v43  ;;  %565 = vmatprep.mubr.f32.mxu1 %v3758_v44 }
  0x21   :  { %3309 = vmatprep.subr.bf16.mxu1 %v3802_v9 }
  0x22   :  { %3299 = vmatpush1.bf16.msra.mxu0 %v3857_v29 }
  0x23   :  { %3301 = vmatprep.subr.bf16.mxu0 %v3863_v31 }
  0x26   :  { %3303 = vmatpush1.bf16.msra.mxu0 %v3883_v37 }
  0x27   :  { %3305 = vmatprep.subr.bf16.mxu0 %v3889_v39 }
  0x2a   :  { %3307 = vmatpush1.bf16.msra.mxu0 %v3904_v43 }
  0x2b   :  { %3325 = vmatprep.subr.bf16.mxu0 %v3802_v9 }
  0xe0   :  { %v3139_v46 = vpop.f32.mrb[0].mxu0 }
  0xe1   :  { %v189_v47 = vadd.f32 %v3139_v46, %v76_v45  ;;  %v183_v48 = vpop.f32.mrb[1].mxu0 }
  0xe2   :  { %v184_v50 = vadd.f32 %v183_v48, %v76_v45 }
  0xe3   :  { %224 = vst.msk [vmem:[#allocation2 + $0x8] sm:$0xff] %vm222_vm1, %v189_v47 }
  0xe4   :  { %223 = vst.msk [vmem:[#allocation2] sm:$0xff] %vm222_vm1, %v184_v50  ;;  %v3142_v51 = vpop.f32.mrb[2].mxu0 }
  0xe5   :  { %v199_v52 = vadd.f32 %v3142_v51, %v76_v45  ;;  %v193_v53 = vpop.f32.mrb[3].mxu0 }
  0xe6   :  { %v194_v55 = vadd.f32 %v193_v53, %v76_v45  ;;  %v3159_v63 = vpop.f32.mrb[0].mxu1 }
  0xe7   :  { %226 = vst.msk [vmem:[#allocation2 + $0x18] sm:$0xff] %vm222_vm1, %v199_v52  ;;  %v303_v1 = vadd.f32 %v3159_v63, %v77_v0  ;;  %v297_v2 = vpop.f32.mrb[1].mxu1 }
  0xe8   :  { %225 = vst.msk [vmem:[#allocation2 + $0x10] sm:$0xff] %vm222_vm1, %v194_v55  ;;  %v3145_v56 = vpop.f32.mrb[4].mxu0  ;;  %v298_v4 = vadd.f32 %v297_v2, %v77_v0 }
  0xe9   :  { %v209_v57 = vadd.f32 %v3145_v56, %v76_v45  ;;  %v203_v58 = vpop.f32.mrb[5].mxu0  ;;  %337 = vst.msk [vmem:[#allocation3 + $0x8] sm:$0xff] %vm222_vm1, %v303_v1 }
  0xea   :  { %v204_v61 = vadd.f32 %v203_v58, %v76_v45  ;;  %336 = vst.msk [vmem:[#allocation3] sm:$0xff] %vm222_vm1, %v298_v4  ;;  %v3162_v11 = vpop.f32.mrb[2].mxu1 }
  0xeb   :  { %228 = vst.msk [vmem:[#allocation2 + $0x28] sm:$0xff] %vm222_vm1, %v209_v57  ;;  %v313_v12 = vadd.f32 %v3162_v11, %v77_v0  ;;  %v307_v13 = vpop.f32.mrb[3].mxu1  ;;  %v430_v30 = vld [vmem:[#allocation2] sm:$0xff] }
  0xec   :  { %227 = vst.msk [vmem:[#allocation2 + $0x20] sm:$0xff] %vm222_vm1, %v204_v61  ;;  %v3148_v3 = vpop.f32.mrb[6].mxu0  ;;  %v308_v16 = vadd.f32 %v307_v13, %v77_v0 }
  0xed   :  { %v219_v5 = vadd.f32 %v3148_v3, %v76_v45  ;;  %v213_v6 = vpop.f32.mrb[7].mxu0  ;;  %339 = vst.msk [vmem:[#allocation3 + $0x18] sm:$0xff] %vm222_vm1, %v313_v12 }
  0xee   :  { %v214_v8 = vadd.f32 %v213_v6, %v76_v45  ;;  %338 = vst.msk [vmem:[#allocation3 + $0x10] sm:$0xff] %vm222_vm1, %v308_v16  ;;  %v3165_v21 = vpop.f32.mrb[4].mxu1 }
  0xef   :  { %230 = vst.msk [vmem:[#allocation2 + $0x38] sm:$0xff] %vm222_vm1, %v219_v5  ;;  %v323_v22 = vadd.f32 %v3165_v21, %v77_v0  ;;  %v317_v23 = vpop.f32.mrb[5].mxu1 }
  0xf0   :  { %229 = vst.msk [vmem:[#allocation2 + $0x30] sm:$0xff] %vm222_vm1, %v214_v8  ;;  %v425_v14 = vpop.f32.mrb[8].mxu0  ;;  %v318_v24 = vadd.f32 %v317_v23, %v77_v0 }
  0xf1   :  { %v426_v17 = vadd.f32 %v425_v14, %v3958_v7  ;;  %v427_v18 = vpop.f32.mrb[9].mxu0  ;;  %341 = vst.msk [vmem:[#allocation3 + $0x28] sm:$0xff] %vm222_vm1, %v323_v22 }
  0xf2   :  { %v428_v20 = vadd.f32 %v427_v18, %v3963_v10  ;;  %340 = vst.msk [vmem:[#allocation3 + $0x20] sm:$0xff] %vm222_vm1, %v318_v24  ;;  %v3168_v25 = vpop.f32.mrb[6].mxu1 }
  0xf3   :  { %439 = vrot.lane.b32.xlu0 %v426_v17, %s3759_s22  ;;  %v333_v26 = vadd.f32 %v3168_v25, %v77_v0  ;;  %v327_v27 = vpop.f32.mrb[7].mxu1  ;;  %v431_v32 = vadd.f32 %v430_v30, %v426_v17 }
  0xf4   :  { %461 = vrot.lane.b32.xlu1 %v428_v20, %s3760_s23  ;;  %v328_v28 = vadd.f32 %v327_v27, %v77_v0 }
  0xf5   :  { %343 = vst.msk [vmem:[#allocation3 + $0x38] sm:$0xff] %vm222_vm1, %v333_v26  ;;  %v3001_v33 = vmul.f32 -1.442695, %v431_v32 }
  0xf6   :  { %342 = vst.msk [vmem:[#allocation3 + $0x30] sm:$0xff] %vm222_vm1, %v328_v28 }
  0xf7   :  { %459 = vrot.lane.b32.xlu0 %v426_v17, %s3760_s23  ;;  %3566 = vpow2.f32 %v3001_v33 }
  0xf8   :  { %472 = vrot.lane.b32.xlu1 %v428_v20, %s3761_s24  ;;  %v572_v20 = vld [vmem:[#allocation2 + $0x8] sm:$0xff] }
  0xfc   :  { %v457_v41 = vld [vmem:[#allocation3 + $0x38] sm:$0xff] }
  0xfd   :  { %v602_v32 = vld [vmem:[#allocation3 + $0x30] sm:$0xff] }
 0x101   :  { %v3567_v34 = vpop.eup %3566 }
 0x102   :  { %v435_v35 = vadd.f32 1.0, %v3567_v34 }
 0x104   :  { %3568 = vrcp.f32 %v435_v35 }
 0x10e   :  { %v3569_v36 = vpop.eup %3568 }
 0x10f   :  { %v449_v63 = vsub.f32 1.0, %v3569_v36  ;;  %v455_v1 = vmul.f32 0.0, %v3569_v36 }
 0x165   :  { %v440_v38 = vpop.permute.xlu0 %439 }
 0x166   :  { %v442_v40 = vmul.f32 %v3569_v36, %v440_v38  ;;  %v462_v42 = vpop.permute.xlu1 %461 }
 0x168   :  { %444 = vrot.lane.b32.xlu0 %v442_v40, %s3759_s22 }
 0x169   :  { %v460_v45 = vpop.permute.xlu0 %459 }
 0x16a   :  { %v463_v46 = vsel %vm92_vm0, %v460_v45, %v462_v42  ;;  %v473_v52 = vpop.permute.xlu1 %472 }
 0x16b   :  { %v465_v47 = vadd.f32 %v463_v46, %v457_v41 }
 0x16d   :  { %v3002_v48 = vmul.f32 -1.442695, %v465_v47 }
 0x16f   :  { %3570 = vpow2.f32 %v3002_v48 }
 0x179   :  { %v3571_v49 = vpop.eup %3570 }
 0x17a   :  { %v469_v50 = vadd.f32 1.0, %v3571_v49 }
 0x17c   :  { %3572 = vrcp.f32 %v469_v50 }
 0x186   :  { %v3573_v51 = vpop.eup %3572 }
 0x187   :  { %v475_v53 = vmul.f32 %v3573_v51, %v473_v52  ;;  %v482_v4 = vsub.f32 1.0, %v3573_v51  ;;  %v488_v6 = vmul.f32 0.0, %v3573_v51 }
 0x189   :  { %477 = vrot.lane.b32.xlu1 %v475_v53, %s3759_s22 }
 0x1da   :  { %v445_v55 = vpop.permute.xlu0 %444 }
 0x1db   :  { %v447_v56 = vadd.f32 %v445_v55, %v430_v30 }
 0x1dd   :  { %3574 = vtanh.f32 %v447_v56 }
 0x1e7   :  { %v3575_v57 = vpop.eup %3574 }
 0x1e8   :  { %451 = vrot.lane.b32.xlu0 %v3575_v57, %s3761_s24 }
 0x1fb   :  { %v478_v58 = vpop.permute.xlu1 %477 }
 0x1fc   :  { %v480_v59 = vadd.f32 %v478_v58, %v457_v41 }
 0x1fe   :  { %3576 = vtanh.f32 %v480_v59 }
 0x208   :  { %v3577_v61 = vpop.eup %3576 }
 0x209   :  { %484 = vrot.lane.b32.xlu1 %v3577_v61, %s3761_s24 }
 0x25a   :  { %v452_v0 = vpop.permute.xlu0 %451 }
 0x25b   :  { %v454_v2 = vmul.f32 %v452_v0, %v449_v63 }
 0x25d   :  { %v456_v3 = vadd.f32 %v455_v1, %v454_v2 }
 0x25f   :  { %491 = vrot.lane.b32.xlu0 %v456_v3, %s3761_s24 }
 0x27b   :  { %v485_v5 = vpop.permute.xlu1 %484 }
 0x27c   :  { %v487_v8 = vmul.f32 %v485_v5, %v482_v4 }
 0x27e   :  { %v489_v11 = vadd.f32 %v488_v6, %v487_v8  ;;  %v716_v8 = vld [vmem:[#allocation2 + $0x10] sm:$0xff] }
 0x280   :  { %496 = vst.msk [vmem:[#allocation4 + $0x38] sm:$0xff] %vm495_vm2, %v489_v11 }
 0x2d1   :  { %v492_v12 = vpop.permute.xlu0 %491 }
 0x2d2   :  { %494 = vst.msk [vmem:[#allocation4] sm:$0xff] %vm92_vm0, %v492_v12  ;;  %v3989_v13 = vsel %vm92_vm0, %v492_v12, %v489_v11 }
 0x2d3   :  { %3003 = vmatmul.mubr.msk.f32.vlgmr.msra.gmra.mrb[8].mxu1 %vm355_vm3, %v3989_v13 }
 0x2d4   :  { %3311 = vmatpush1.bf16.msra.mxu1 %v3819_v15  ;;  %853 = vmatprep.mubr.f32.mxu1 %v3758_v44 }
 0x2d5   :  { %3313 = vmatprep.subr.bf16.mxu1 %v3831_v19 }
 0x2d8   :  { %3315 = vmatpush1.bf16.msra.mxu1 %v3857_v29 }
 0x2d9   :  { %3317 = vmatprep.subr.bf16.mxu1 %v3863_v31 }
 0x2dc   :  { %3319 = vmatpush1.bf16.msra.mxu1 %v3883_v37 }
 0x2dd   :  { %3321 = vmatprep.subr.bf16.mxu1 %v3889_v39 }
 0x2e0   :  { %3323 = vmatpush1.bf16.msra.mxu1 %v3904_v43 }
 0x2e1   :  { %3341 = vmatprep.subr.bf16.mxu1 %v3802_v9 }
 0x3a6   :  { %v567_v14 = vpop.f32.mrb[8].mxu1 }
 0x3a7   :  { %v568_v16 = vadd.f32 %v567_v14, %v3958_v7  ;;  %v569_v17 = vpop.f32.mrb[9].mxu1 }
 0x3a8   :  { %v570_v18 = vadd.f32 %v569_v17, %v3963_v10 }
 0x3a9   :  { %604 = vrot.lane.b32.xlu0 %v568_v16, %s3760_s23  ;;  %581 = vrot.lane.b32.xlu1 %v568_v16, %s3759_s22  ;;  %v573_v21 = vadd.f32 %v572_v20, %v568_v16 }
 0x3ab   :  { %v3004_v22 = vmul.f32 -1.442695, %v573_v21 }
 0x3ad   :  { %617 = vrot.lane.b32.xlu0 %v570_v18, %s3761_s24  ;;  %606 = vrot.lane.b32.xlu1 %v570_v18, %s3760_s23  ;;  %3578 = vpow2.f32 %v3004_v22  ;;  %v746_v22 = vld [vmem:[#allocation3 + $0x28] sm:$0xff] }
 0x3b7   :  { %v3579_v23 = vpop.eup %3578 }
 0x3b8   :  { %v577_v24 = vadd.f32 1.0, %v3579_v23 }
 0x3ba   :  { %3580 = vrcp.f32 %v577_v24 }
 0x3c4   :  { %v3581_v25 = vpop.eup %3580 }
 0x3c5   :  { %v591_v52 = vsub.f32 1.0, %v3581_v25 }
 0x41b   :  { %v582_v26 = vpop.permute.xlu1 %581  ;;  %v605_v28 = vpop.permute.xlu0 %604 }
 0x41c   :  { %v584_v27 = vmul.f32 %v3581_v25, %v582_v26 }
 0x41e   :  { %586 = vrot.lane.b32.xlu1 %v584_v27, %s3759_s22 }
 0x41f   :  { %v607_v30 = vpop.permute.xlu1 %606  ;;  %v618_v41 = vpop.permute.xlu0 %617 }
 0x420   :  { %v608_v33 = vsel %vm92_vm0, %v605_v28, %v607_v30 }
 0x421   :  { %v610_v34 = vadd.f32 %v608_v33, %v602_v32 }
 0x423   :  { %v3005_v35 = vmul.f32 -1.442695, %v610_v34 }
 0x425   :  { %3582 = vpow2.f32 %v3005_v35 }
 0x42f   :  { %v3583_v36 = vpop.eup %3582 }
 0x430   :  { %v614_v38 = vadd.f32 1.0, %v3583_v36 }
 0x432   :  { %3584 = vrcp.f32 %v614_v38 }
 0x43c   :  { %v3585_v40 = vpop.eup %3584 }
 0x43d   :  { %v620_v42 = vmul.f32 %v3585_v40, %v618_v41  ;;  %v627_v58 = vsub.f32 1.0, %v3585_v40  ;;  %v633_v61 = vmul.f32 %v3585_v40, %v3989_v13 }
 0x43f   :  { %622 = vrot.lane.b32.xlu0 %v620_v42, %s3759_s22 }
 0x443   :  { %597 = vrot.lane.b32.xlu0 %v3989_v13, %s3760_s23 }
 0x490   :  { %v587_v45 = vpop.permute.xlu1 %586 }
 0x491   :  { %v589_v46 = vadd.f32 %v587_v45, %v572_v20 }
 0x493   :  { %3586 = vtanh.f32 %v589_v46 }
 0x49d   :  { %v3587_v47 = vpop.eup %3586 }
 0x49e   :  { %593 = vrot.lane.b32.xlu1 %v3587_v47, %s3761_s24 }
 0x4b1   :  { %v623_v48 = vpop.permute.xlu0 %622 }
 0x4b2   :  { %v625_v49 = vadd.f32 %v623_v48, %v602_v32 }
 0x4b4   :  { %3588 = vtanh.f32 %v625_v49 }
 0x4b5   :  { %v598_v51 = vpop.permute.xlu0 %597 }
 0x4b6   :  { %v600_v55 = vmul.f32 %v3581_v25, %v598_v51 }
 0x4be   :  { %v3589_v50 = vpop.eup %3588 }
 0x4bf   :  { %629 = vrot.lane.b32.xlu1 %v3589_v50, %s3761_s24 }
 0x510   :  { %v594_v53 = vpop.permute.xlu1 %593 }
 0x511   :  { %v596_v56 = vmul.f32 %v594_v53, %v591_v52 }
 0x513   :  { %v601_v57 = vadd.f32 %v600_v55, %v596_v56 }
 0x515   :  { %636 = vrot.lane.b32.xlu0 %v601_v57, %s3761_s24 }
 0x531   :  { %v630_v59 = vpop.permute.xlu1 %629 }
 0x532   :  { %v632_v63 = vmul.f32 %v630_v59, %v627_v58 }
 0x534   :  { %v634_v0 = vadd.f32 %v633_v61, %v632_v63  ;;  %v860_v63 = vld [vmem:[#allocation2 + $0x18] sm:$0xff] }
 0x536   :  { %640 = vst.msk [vmem:[#allocation4 + $0x30] sm:$0xff] %vm495_vm2, %v634_v0 }
 0x587   :  { %v637_v1 = vpop.permute.xlu0 %636 }
 0x588   :  { %639 = vst.msk [vmem:[#allocation4 + $0x8] sm:$0xff] %vm92_vm0, %v637_v1  ;;  %v4020_v2 = vsel %vm92_vm0, %v637_v1, %v634_v0 }
 0x589   :  { %3006 = vmatmul.mubr.msk.f32.vlgmr.msra.gmra.mrb[10].mxu0 %vm355_vm3, %v4020_v2 }
 0x58a   :  { %3327 = vmatpush1.bf16.msra.mxu0 %v3819_v15  ;;  %997 = vmatprep.mubr.f32.mxu0 %v3758_v44 }
 0x58b   :  { %3329 = vmatprep.subr.bf16.mxu0 %v3831_v19 }
 0x58e   :  { %3331 = vmatpush1.bf16.msra.mxu0 %v3857_v29 }
 0x58f   :  { %3333 = vmatprep.subr.bf16.mxu0 %v3863_v31 }
 0x592   :  { %3335 = vmatpush1.bf16.msra.mxu0 %v3883_v37 }
 0x593   :  { %3337 = vmatprep.subr.bf16.mxu0 %v3889_v39 }
 0x596   :  { %3339 = vmatpush1.bf16.msra.mxu0 %v3904_v43 }
 0x597   :  { %3357 = vmatprep.subr.bf16.mxu0 %v3802_v9 }
 0x65c   :  { %v711_v3 = vpop.f32.mrb[10].mxu0 }
 0x65d   :  { %v712_v4 = vadd.f32 %v711_v3, %v3958_v7  ;;  %v713_v5 = vpop.f32.mrb[11].mxu0 }
 0x65e   :  { %v714_v6 = vadd.f32 %v713_v5, %v3963_v10 }
 0x65f   :  { %748 = vrot.lane.b32.xlu0 %v712_v4, %s3760_s23  ;;  %725 = vrot.lane.b32.xlu1 %v712_v4, %s3759_s22  ;;  %v717_v11 = vadd.f32 %v716_v8, %v712_v4 }
 0x661   :  { %v3007_v12 = vmul.f32 -1.442695, %v717_v11  ;;  %v890_v11 = vld [vmem:[#allocation3 + $0x20] sm:$0xff] }
 0x663   :  { %761 = vrot.lane.b32.xlu0 %v714_v6, %s3761_s24  ;;  %750 = vrot.lane.b32.xlu1 %v714_v6, %s3760_s23  ;;  %3590 = vpow2.f32 %v3007_v12 }
 0x66d   :  { %v3591_v13 = vpop.eup %3590 }
 0x66e   :  { %v721_v14 = vadd.f32 1.0, %v3591_v13 }
 0x670   :  { %3592 = vrcp.f32 %v721_v14 }
 0x67a   :  { %v3593_v16 = vpop.eup %3592 }
 0x67b   :  { %v735_v42 = vsub.f32 1.0, %v3593_v16 }
 0x6d1   :  { %v726_v17 = vpop.permute.xlu1 %725  ;;  %v749_v20 = vpop.permute.xlu0 %748 }
 0x6d2   :  { %v728_v18 = vmul.f32 %v3593_v16, %v726_v17 }
 0x6d4   :  { %730 = vrot.lane.b32.xlu1 %v728_v18, %s3759_s22 }
 0x6d5   :  { %v751_v21 = vpop.permute.xlu1 %750  ;;  %v762_v30 = vpop.permute.xlu0 %761 }
 0x6d6   :  { %v752_v23 = vsel %vm92_vm0, %v749_v20, %v751_v21 }
 0x6d7   :  { %v754_v24 = vadd.f32 %v752_v23, %v746_v22 }
 0x6d9   :  { %v3008_v25 = vmul.f32 -1.442695, %v754_v24 }
 0x6db   :  { %3594 = vpow2.f32 %v3008_v25 }
 0x6e5   :  { %v3595_v26 = vpop.eup %3594 }
 0x6e6   :  { %v758_v27 = vadd.f32 1.0, %v3595_v26 }
 0x6e8   :  { %3596 = vrcp.f32 %v758_v27 }
 0x6f2   :  { %v3597_v28 = vpop.eup %3596 }
 0x6f3   :  { %v764_v32 = vmul.f32 %v3597_v28, %v762_v30  ;;  %v771_v49 = vsub.f32 1.0, %v3597_v28  ;;  %v777_v51 = vmul.f32 %v3597_v28, %v4020_v2 }
 0x6f5   :  { %766 = vrot.lane.b32.xlu0 %v764_v32, %s3759_s22 }
 0x6f9   :  { %741 = vrot.lane.b32.xlu0 %v4020_v2, %s3760_s23 }
 0x746   :  { %v731_v33 = vpop.permute.xlu1 %730 }
 0x747   :  { %v733_v34 = vadd.f32 %v731_v33, %v716_v8 }
 0x749   :  { %3598 = vtanh.f32 %v733_v34 }
 0x753   :  { %v3599_v35 = vpop.eup %3598 }
 0x754   :  { %737 = vrot.lane.b32.xlu1 %v3599_v35, %s3761_s24 }
 0x767   :  { %v767_v36 = vpop.permute.xlu0 %766 }
 0x768   :  { %v769_v38 = vadd.f32 %v767_v36, %v746_v22 }
 0x76a   :  { %3600 = vtanh.f32 %v769_v38 }
 0x76b   :  { %v742_v41 = vpop.permute.xlu0 %741 }
 0x76c   :  { %v744_v46 = vmul.f32 %v3593_v16, %v742_v41 }
 0x774   :  { %v3601_v40 = vpop.eup %3600 }
 0x775   :  { %773 = vrot.lane.b32.xlu1 %v3601_v40, %s3761_s24 }
 0x7c6   :  { %v738_v45 = vpop.permute.xlu1 %737 }
 0x7c7   :  { %v740_v47 = vmul.f32 %v738_v45, %v735_v42 }
 0x7c9   :  { %v745_v48 = vadd.f32 %v744_v46, %v740_v47 }
 0x7cb   :  { %780 = vrot.lane.b32.xlu0 %v745_v48, %s3761_s24 }
 0x7e7   :  { %v774_v50 = vpop.permute.xlu1 %773 }
 0x7e8   :  { %v776_v52 = vmul.f32 %v774_v50, %v771_v49 }
 0x7ea   :  { %v778_v53 = vadd.f32 %v777_v51, %v776_v52  ;;  %v1004_v51 = vld [vmem:[#allocation2 + $0x20] sm:$0xff] }
 0x7ec   :  { %784 = vst.msk [vmem:[#allocation4 + $0x28] sm:$0xff] %vm495_vm2, %v778_v53 }
 0x83d   :  { %v781_v55 = vpop.permute.xlu0 %780 }
 0x83e   :  { %783 = vst.msk [vmem:[#allocation4 + $0x10] sm:$0xff] %vm92_vm0, %v781_v55  ;;  %v4051_v56 = vsel %vm92_vm0, %v781_v55, %v778_v53 }
 0x83f   :  { %3009 = vmatmul.mubr.msk.f32.vlgmr.msra.gmra.mrb[10].mxu1 %vm355_vm3, %v4051_v56 }
 0x840   :  { %3343 = vmatpush1.bf16.msra.mxu1 %v3819_v15  ;;  %1141 = vmatprep.mubr.f32.mxu1 %v3758_v44 }
 0x841   :  { %3345 = vmatprep.subr.bf16.mxu1 %v3831_v19 }
 0x844   :  { %3347 = vmatpush1.bf16.msra.mxu1 %v3857_v29 }
 0x845   :  { %3349 = vmatprep.subr.bf16.mxu1 %v3863_v31 }
 0x848   :  { %3351 = vmatpush1.bf16.msra.mxu1 %v3883_v37 }
 0x849   :  { %3353 = vmatprep.subr.bf16.mxu1 %v3889_v39 }
 0x84c   :  { %3355 = vmatpush1.bf16.msra.mxu1 %v3904_v43 }
 0x84d   :  { %3373 = vmatprep.subr.bf16.mxu1 %v3802_v9 }
 0x912   :  { %v855_v57 = vpop.f32.mrb[10].mxu1 }
 0x913   :  { %v856_v58 = vadd.f32 %v855_v57, %v3958_v7  ;;  %v857_v59 = vpop.f32.mrb[11].mxu1 }
 0x914   :  { %v858_v61 = vadd.f32 %v857_v59, %v3963_v10 }
 0x915   :  { %892 = vrot.lane.b32.xlu0 %v856_v58, %s3760_s23  ;;  %869 = vrot.lane.b32.xlu1 %v856_v58, %s3759_s22  ;;  %v861_v0 = vadd.f32 %v860_v63, %v856_v58 }
 0x917   :  { %v3010_v1 = vmul.f32 -1.442695, %v861_v0  ;;  %v1034_v0 = vld [vmem:[#allocation3 + $0x18] sm:$0xff] }
 0x919   :  { %905 = vrot.lane.b32.xlu0 %v858_v61, %s3761_s24  ;;  %894 = vrot.lane.b32.xlu1 %v858_v61, %s3760_s23  ;;  %3602 = vpow2.f32 %v3010_v1 }
 0x923   :  { %v3603_v2 = vpop.eup %3602 }
 0x924   :  { %v865_v9 = vadd.f32 1.0, %v3603_v2 }
 0x926   :  { %3604 = vrcp.f32 %v865_v9 }
 0x930   :  { %v3605_v3 = vpop.eup %3604 }
 0x931   :  { %v879_v30 = vsub.f32 1.0, %v3605_v3 }
 0x987   :  { %v870_v4 = vpop.permute.xlu1 %869  ;;  %v893_v6 = vpop.permute.xlu0 %892 }
 0x988   :  { %v872_v5 = vmul.f32 %v3605_v3, %v870_v4 }
 0x98a   :  { %874 = vrot.lane.b32.xlu1 %v872_v5, %s3759_s22 }
 0x98b   :  { %v895_v8 = vpop.permute.xlu1 %894  ;;  %v906_v20 = vpop.permute.xlu0 %905 }
 0x98c   :  { %v896_v12 = vsel %vm92_vm0, %v893_v6, %v895_v8 }
 0x98d   :  { %v898_v13 = vadd.f32 %v896_v12, %v890_v11 }
 0x98f   :  { %v3011_v14 = vmul.f32 -1.442695, %v898_v13 }
 0x991   :  { %3606 = vpow2.f32 %v3011_v14 }
 0x99b   :  { %v3607_v16 = vpop.eup %3606 }
 0x99c   :  { %v902_v17 = vadd.f32 1.0, %v3607_v16 }
 0x99e   :  { %3608 = vrcp.f32 %v902_v17 }
 0x9a8   :  { %v3609_v18 = vpop.eup %3608 }
 0x9a9   :  { %v908_v21 = vmul.f32 %v3609_v18, %v906_v20  ;;  %v915_v36 = vsub.f32 1.0, %v3609_v18  ;;  %v921_v40 = vmul.f32 %v3609_v18, %v4051_v56 }
 0x9ab   :  { %910 = vrot.lane.b32.xlu0 %v908_v21, %s3759_s22 }
 0x9af   :  { %885 = vrot.lane.b32.xlu0 %v4051_v56, %s3760_s23 }
 0x9fc   :  { %v875_v22 = vpop.permute.xlu1 %874 }
 0x9fd   :  { %v877_v23 = vadd.f32 %v875_v22, %v860_v63 }
 0x9ff   :  { %3610 = vtanh.f32 %v877_v23 }
 0xa09   :  { %v3611_v24 = vpop.eup %3610 }
 0xa0a   :  { %881 = vrot.lane.b32.xlu1 %v3611_v24, %s3761_s24 }
 0xa1d   :  { %v911_v25 = vpop.permute.xlu0 %910 }
 0xa1e   :  { %v913_v26 = vadd.f32 %v911_v25, %v890_v11 }
 0xa20   :  { %3612 = vtanh.f32 %v913_v26 }
 0xa21   :  { %v886_v28 = vpop.permute.xlu0 %885 }
 0xa22   :  { %v888_v33 = vmul.f32 %v3605_v3, %v886_v28 }
 0xa2a   :  { %v3613_v27 = vpop.eup %3612 }
 0xa2b   :  { %917 = vrot.lane.b32.xlu1 %v3613_v27, %s3761_s24 }
 0xa7c   :  { %v882_v32 = vpop.permute.xlu1 %881 }
 0xa7d   :  { %v884_v34 = vmul.f32 %v882_v32, %v879_v30 }
 0xa7f   :  { %v889_v35 = vadd.f32 %v888_v33, %v884_v34 }
 0xa81   :  { %924 = vrot.lane.b32.xlu0 %v889_v35, %s3761_s24 }
 0xa9d   :  { %v918_v38 = vpop.permute.xlu1 %917 }
 0xa9e   :  { %v920_v41 = vmul.f32 %v918_v38, %v915_v36 }
 0xaa0   :  { %v922_v42 = vadd.f32 %v921_v40, %v920_v41 }
 0xaa2   :  { %928 = vst.msk [vmem:[#allocation4 + $0x20] sm:$0xff] %vm495_vm2, %v922_v42 }
 0xaf3   :  { %v925_v45 = vpop.permute.xlu0 %924 }
 0xaf4   :  { %927 = vst.msk [vmem:[#allocation4 + $0x18] sm:$0xff] %vm92_vm0, %v925_v45  ;;  %v4082_v46 = vsel %vm92_vm0, %v925_v45, %v922_v42  ;;  %v1178_v45 = vld [vmem:[#allocation3 + $0x10] sm:$0xff] }
 0xaf5   :  { %3012 = vmatmul.mubr.msk.f32.vlgmr.msra.gmra.mrb[12].mxu0 %vm355_vm3, %v4082_v46 }
 0xaf6   :  { %3359 = vmatpush1.bf16.msra.mxu0 %v3819_v15  ;;  %1285 = vmatprep.mubr.f32.mxu0 %v3758_v44 }
 0xaf7   :  { %3361 = vmatprep.subr.bf16.mxu0 %v3831_v19 }
 0xafa   :  { %3363 = vmatpush1.bf16.msra.mxu0 %v3857_v29 }
 0xafb   :  { %3365 = vmatprep.subr.bf16.mxu0 %v3863_v31 }
 0xafe   :  { %3367 = vmatpush1.bf16.msra.mxu0 %v3883_v37 }
 0xaff   :  { %3369 = vmatprep.subr.bf16.mxu0 %v3889_v39 }
 0xb02   :  { %3371 = vmatpush1.bf16.msra.mxu0 %v3904_v43 }
 0xbc8   :  { %v999_v47 = vpop.f32.mrb[12].mxu0 }
 0xbc9   :  { %v1000_v48 = vadd.f32 %v999_v47, %v3958_v7  ;;  %v1001_v49 = vpop.f32.mrb[13].mxu0 }
 0xbca   :  { %v1002_v50 = vadd.f32 %v1001_v49, %v3963_v10 }
 0xbcb   :  { %1036 = vrot.lane.b32.xlu0 %v1000_v48, %s3760_s23  ;;  %1013 = vrot.lane.b32.xlu1 %v1000_v48, %s3759_s22  ;;  %v1005_v52 = vadd.f32 %v1004_v51, %v1000_v48 }
 0xbcd   :  { %v3013_v53 = vmul.f32 -1.442695, %v1005_v52 }
 0xbcf   :  { %1049 = vrot.lane.b32.xlu0 %v1002_v50, %s3761_s24  ;;  %1038 = vrot.lane.b32.xlu1 %v1002_v50, %s3760_s23  ;;  %3614 = vpow2.f32 %v3013_v53 }
 0xbd9   :  { %v3615_v55 = vpop.eup %3614 }
 0xbda   :  { %v1009_v56 = vadd.f32 1.0, %v3615_v55 }
 0xbdc   :  { %3616 = vrcp.f32 %v1009_v56 }
 0xbe6   :  { %v3617_v57 = vpop.eup %3616 }
 0xbe7   :  { %v1023_v20 = vsub.f32 1.0, %v3617_v57 }
 0xc3d   :  { %v1014_v58 = vpop.permute.xlu1 %1013  ;;  %v1037_v61 = vpop.permute.xlu0 %1036 }
 0xc3e   :  { %v1016_v59 = vmul.f32 %v3617_v57, %v1014_v58 }
 0xc40   :  { %1018 = vrot.lane.b32.xlu1 %v1016_v59, %s3759_s22 }
 0xc41   :  { %v1039_v63 = vpop.permute.xlu1 %1038  ;;  %v1050_v6 = vpop.permute.xlu0 %1049 }
 0xc42   :  { %v1040_v1 = vsel %vm92_vm0, %v1037_v61, %v1039_v63 }
 0xc43   :  { %v1042_v2 = vadd.f32 %v1040_v1, %v1034_v0 }
 0xc45   :  { %v3014_v9 = vmul.f32 -1.442695, %v1042_v2 }
 0xc47   :  { %3618 = vpow2.f32 %v3014_v9 }
 0xc51   :  { %v3619_v3 = vpop.eup %3618 }
 0xc52   :  { %v1046_v4 = vadd.f32 1.0, %v3619_v3 }
 0xc54   :  { %3620 = vrcp.f32 %v1046_v4 }
 0xc5e   :  { %v3621_v5 = vpop.eup %3620 }
 0xc5f   :  { %v1052_v8 = vmul.f32 %v3621_v5, %v1050_v6  ;;  %v1059_v25 = vsub.f32 1.0, %v3621_v5  ;;  %v1065_v27 = vmul.f32 %v3621_v5, %v4082_v46 }
 0xc61   :  { %1054 = vrot.lane.b32.xlu0 %v1052_v8, %s3759_s22 }
 0xc65   :  { %1029 = vrot.lane.b32.xlu0 %v4082_v46, %s3760_s23 }
 0xcb2   :  { %v1019_v11 = vpop.permute.xlu1 %1018 }
 0xcb3   :  { %v1021_v12 = vadd.f32 %v1019_v11, %v1004_v51 }
 0xcb5   :  { %3622 = vtanh.f32 %v1021_v12 }
 0xcbf   :  { %v3623_v13 = vpop.eup %3622 }
 0xcc0   :  { %1025 = vrot.lane.b32.xlu1 %v3623_v13, %s3761_s24 }
 0xcd3   :  { %v1055_v14 = vpop.permute.xlu0 %1054 }
 0xcd4   :  { %v1057_v16 = vadd.f32 %v1055_v14, %v1034_v0 }
 0xcd6   :  { %3624 = vtanh.f32 %v1057_v16 }
 0xcd7   :  { %v1030_v18 = vpop.permute.xlu0 %1029 }
 0xcd8   :  { %v1032_v22 = vmul.f32 %v3617_v57, %v1030_v18 }
 0xce0   :  { %v3625_v17 = vpop.eup %3624 }
 0xce1   :  { %1061 = vrot.lane.b32.xlu1 %v3625_v17, %s3761_s24 }
 0xd32   :  { %v1026_v21 = vpop.permute.xlu1 %1025 }
 0xd33   :  { %v1028_v23 = vmul.f32 %v1026_v21, %v1023_v20  ;;  %v1292_v20 = vld [vmem:[#allocation2 + $0x30] sm:$0xff] }
 0xd35   :  { %v1033_v24 = vadd.f32 %v1032_v22, %v1028_v23 }
 0xd37   :  { %1068 = vrot.lane.b32.xlu0 %v1033_v24, %s3761_s24 }
 0xd53   :  { %v1062_v26 = vpop.permute.xlu1 %1061 }
 0xd54   :  { %v1064_v28 = vmul.f32 %v1062_v26, %v1059_v25 }
 0xd56   :  { %v1066_v30 = vadd.f32 %v1065_v27, %v1064_v28 }
 0xd58   :  { %1072 = vst.msk [vmem:[#allocation4 + $0x18] sm:$0xff] %vm495_vm2, %v1066_v30 }
 0xda9   :  { %v1069_v32 = vpop.permute.xlu0 %1068 }
 0xdaa   :  { %1071 = vst.msk [vmem:[#allocation4 + $0x20] sm:$0xff] %vm92_vm0, %v1069_v32  ;;  %v4112_v33 = vsel %vm92_vm0, %v1069_v32, %v1066_v30  ;;  %v1322_v32 = vld [vmem:[#allocation3 + $0x8] sm:$0xff] }
 0xdab   :  { %3015 = vmatmul.mubr.msk.f32.vlgmr.msra.gmra.mrb[12].mxu1 %vm355_vm3, %v4112_v33 }
 0xdac   :  { %3375 = vmatpush1.bf16.msra.mxu1 %v3819_v15  ;;  %1429 = vmatprep.mubr.f32.mxu1 %v3758_v44 }
 0xdad   :  { %3377 = vmatprep.subr.bf16.mxu1 %v3831_v19  ;;  %v1148_v19 = vld [vmem:[#allocation2 + $0x28] sm:$0xff] }
 0xdb0   :  { %3379 = vmatpush1.bf16.msra.mxu1 %v3857_v29 }
 0xdb1   :  { %3381 = vmatprep.subr.bf16.mxu1 %v3863_v31 }
 0xdb4   :  { %3383 = vmatpush1.bf16.msra.mxu1 %v3883_v37 }
 0xdb5   :  { %3385 = vmatprep.subr.bf16.mxu1 %v3889_v39 }
 0xdb8   :  { %3387 = vmatpush1.bf16.msra.mxu1 %v3904_v43 }
 0xe7e   :  { %v1143_v34 = vpop.f32.mrb[12].mxu1 }
 0xe7f   :  { %v1144_v35 = vadd.f32 %v1143_v34, %v3958_v7  ;;  %v1145_v36 = vpop.f32.mrb[13].mxu1 }
 0xe80   :  { %v1146_v15 = vadd.f32 %v1145_v36, %v3963_v10 }
 0xe81   :  { %1180 = vrot.lane.b32.xlu0 %v1144_v35, %s3760_s23  ;;  %1157 = vrot.lane.b32.xlu1 %v1144_v35, %s3759_s22  ;;  %v1149_v29 = vadd.f32 %v1148_v19, %v1144_v35 }
 0xe83   :  { %v3016_v31 = vmul.f32 -1.442695, %v1149_v29 }
 0xe85   :  { %1193 = vrot.lane.b32.xlu0 %v1146_v15, %s3761_s24  ;;  %1182 = vrot.lane.b32.xlu1 %v1146_v15, %s3760_s23  ;;  %3626 = vpow2.f32 %v3016_v31 }
 0xe8f   :  { %v3627_v37 = vpop.eup %3626 }
 0xe90   :  { %v1153_v39 = vadd.f32 1.0, %v3627_v37 }
 0xe92   :  { %3628 = vrcp.f32 %v1153_v39 }
 0xe9c   :  { %v3629_v43 = vpop.eup %3628 }
 0xe9d   :  { %v1167_v0 = vsub.f32 1.0, %v3629_v43 }
 0xef3   :  { %v1158_v38 = vpop.permute.xlu1 %1157  ;;  %v1181_v41 = vpop.permute.xlu0 %1180 }
 0xef4   :  { %v1160_v40 = vmul.f32 %v3629_v43, %v1158_v38 }
 0xef6   :  { %1162 = vrot.lane.b32.xlu1 %v1160_v40, %s3759_s22 }
 0xef7   :  { %v1183_v42 = vpop.permute.xlu1 %1182  ;;  %v1194_v52 = vpop.permute.xlu0 %1193 }
 0xef8   :  { %v1184_v46 = vsel %vm92_vm0, %v1181_v41, %v1183_v42 }
 0xef9   :  { %v1186_v47 = vadd.f32 %v1184_v46, %v1178_v45 }
 0xefb   :  { %v3017_v48 = vmul.f32 -1.442695, %v1186_v47 }
 0xefd   :  { %3630 = vpow2.f32 %v3017_v48 }
 0xf07   :  { %v3631_v49 = vpop.eup %3630 }
 0xf08   :  { %v1190_v50 = vadd.f32 1.0, %v3631_v49 }
 0xf0a   :  { %3632 = vrcp.f32 %v1190_v50 }
 0xf14   :  { %v3633_v51 = vpop.eup %3632 }
 0xf15   :  { %v1196_v53 = vmul.f32 %v3633_v51, %v1194_v52  ;;  %v1203_v4 = vsub.f32 1.0, %v3633_v51  ;;  %v1209_v6 = vmul.f32 %v3633_v51, %v4112_v33 }
 0xf17   :  { %1198 = vrot.lane.b32.xlu0 %v1196_v53, %s3759_s22 }
 0xf1b   :  { %1173 = vrot.lane.b32.xlu0 %v4112_v33, %s3760_s23 }
 0xf68   :  { %v1163_v55 = vpop.permute.xlu1 %1162 }
 0xf69   :  { %v1165_v56 = vadd.f32 %v1163_v55, %v1148_v19 }
 0xf6b   :  { %3634 = vtanh.f32 %v1165_v56 }
 0xf75   :  { %v3635_v57 = vpop.eup %3634 }
 0xf76   :  { %1169 = vrot.lane.b32.xlu1 %v3635_v57, %s3761_s24 }
 0xf89   :  { %v1199_v58 = vpop.permute.xlu0 %1198 }
 0xf8a   :  { %v1201_v59 = vadd.f32 %v1199_v58, %v1178_v45 }
 0xf8c   :  { %3636 = vtanh.f32 %v1201_v59 }
 0xf8d   :  { %v1174_v63 = vpop.permute.xlu0 %1173 }
 0xf8e   :  { %v1176_v2 = vmul.f32 %v3629_v43, %v1174_v63 }
 0xf96   :  { %v3637_v61 = vpop.eup %3636 }
 0xf97   :  { %1205 = vrot.lane.b32.xlu1 %v3637_v61, %s3761_s24 }
 0xfe8   :  { %v1170_v1 = vpop.permute.xlu1 %1169 }
 0xfe9   :  { %v1172_v9 = vmul.f32 %v1170_v1, %v1167_v0  ;;  %v1436_v0 = vld [vmem:[#allocation2 + $0x38] sm:$0xff] }
 0xfeb   :  { %v1177_v3 = vadd.f32 %v1176_v2, %v1172_v9 }
 0xfed   :  { %1212 = vrot.lane.b32.xlu0 %v1177_v3, %s3761_s24 }
0x1009   :  { %v1206_v5 = vpop.permute.xlu1 %1205 }
0x100a   :  { %v1208_v8 = vmul.f32 %v1206_v5, %v1203_v4 }
0x100c   :  { %v1210_v11 = vadd.f32 %v1209_v6, %v1208_v8  ;;  %v1466_v8 = vld [vmem:[#allocation3] sm:$0xff] }
0x100e   :  { %1216 = vst.msk [vmem:[#allocation4 + $0x10] sm:$0xff] %vm495_vm2, %v1210_v11 }
0x105f   :  { %v1213_v12 = vpop.permute.xlu0 %1212 }
0x1060   :  { %1215 = vst.msk [vmem:[#allocation4 + $0x28] sm:$0xff] %vm92_vm0, %v1213_v12  ;;  %v1217_v13 = vsel %vm92_vm0, %v1213_v12, %v1210_v11 }
0x1061   :  { %3018 = vmatmul.mubr.msk.f32.vlgmr.msra.gmra.mrb[14].mxu0 %vm355_vm3, %v1217_v13 }
0x1134   :  { %v1287_v14 = vpop.f32.mrb[14].mxu0 }
0x1135   :  { %v1288_v16 = vadd.f32 %v1287_v14, %v3958_v7  ;;  %v1289_v17 = vpop.f32.mrb[15].mxu0 }
0x1136   :  { %v1290_v18 = vadd.f32 %v1289_v17, %v3963_v10 }
0x1137   :  { %1324 = vrot.lane.b32.xlu0 %v1288_v16, %s3760_s23  ;;  %1301 = vrot.lane.b32.xlu1 %v1288_v16, %s3759_s22  ;;  %v1293_v21 = vadd.f32 %v1292_v20, %v1288_v16 }
0x1139   :  { %v3019_v22 = vmul.f32 -1.442695, %v1293_v21 }
0x113b   :  { %1337 = vrot.lane.b32.xlu0 %v1290_v18, %s3761_s24  ;;  %1326 = vrot.lane.b32.xlu1 %v1290_v18, %s3760_s23  ;;  %3638 = vpow2.f32 %v3019_v22 }
0x1145   :  { %v3639_v23 = vpop.eup %3638 }
0x1146   :  { %v1297_v24 = vadd.f32 1.0, %v3639_v23  ;;  %v35_v23 = vld [vmem:[%s4604_s1 + $0x100] sm:$0xff] }
0x1148   :  { %3640 = vrcp.f32 %v1297_v24  ;;  %v36_v24 = vld [vmem:[%s4604_s1 + $0x110] sm:$0xff] }
0x1152   :  { %v3641_v25 = vpop.eup %3640 }
0x1153   :  { %v1311_v45 = vsub.f32 1.0, %v3641_v25 }
0x11a9   :  { %v1302_v26 = vpop.permute.xlu1 %1301  ;;  %v1325_v28 = vpop.permute.xlu0 %1324 }
0x11aa   :  { %v1304_v27 = vmul.f32 %v3641_v25, %v1302_v26  ;;  %v3388_v26 = vpack.c.bf16 %v36_v24, %v35_v23  ;;  %v1509_v23 = vld [vmem:[#allocation4 + $0x20] sm:$0xff]  ;;  %v64_v24 = vld [vmem:[%s4604_s1 + $0x268] sm:$0xff] }
0x11ac   :  { %1306 = vrot.lane.b32.xlu1 %v1304_v27, %s3759_s22  ;;  %v44_v27 = vld [vmem:[%s4604_s1 + $0x190] sm:$0xff]  ;;  %3389 = vmatprep.subr.bf16.mxu0 %v3388_v26 }
0x11ad   :  { %v1327_v30 = vpop.permute.xlu1 %1326  ;;  %v1338_v29 = vpop.permute.xlu0 %1337  ;;  %3391 = vmatpush3.bf16.msra.mxu0 %v3388_v26 }
0x11ae   :  { %v1328_v33 = vsel %vm92_vm0, %v1325_v28, %v1327_v30 }
0x11af   :  { %v1330_v34 = vadd.f32 %v1328_v33, %v1322_v32  ;;  %v38_v33 = vld [vmem:[%s4604_s1 + $0x130] sm:$0xff] }
0x11b1   :  { %v3020_v35 = vmul.f32 -1.442695, %v1330_v34  ;;  %v45_v34 = vld [vmem:[%s4604_s1 + $0x1a0] sm:$0xff] }
0x11b3   :  { %3642 = vpow2.f32 %v3020_v35 }
0x11bd   :  { %v3643_v36 = vpop.eup %3642 }
0x11be   :  { %v1334_v15 = vadd.f32 1.0, %v3643_v36 }
0x11c0   :  { %3644 = vrcp.f32 %v1334_v15  ;;  %v46_v15 = vld [vmem:[%s4604_s1 + $0x1b0] sm:$0xff] }
0x11ca   :  { %v3645_v19 = vpop.eup %3644 }
0x11cb   :  { %v1340_v31 = vmul.f32 %v3645_v19, %v1338_v29  ;;  %v1347_v50 = vsub.f32 1.0, %v3645_v19  ;;  %v1353_v52 = vmul.f32 %v3645_v19, %v1217_v13  ;;  %v3408_v29 = vpack.c.bf16 %v46_v15, %v45_v34  ;;  %v80_v15 = vld [vmem:[%s4604_s1 + $0x304] ss:$0 sm:$0xff] }
0x11cd   :  { %1342 = vrot.lane.b32.xlu0 %v1340_v31, %s3759_s22  ;;  %v39_v31 = vld [vmem:[%s4604_s1 + $0x140] sm:$0xff] }
0x11d1   :  { %1317 = vrot.lane.b32.xlu0 %v1217_v13, %s3760_s23 }
0x121e   :  { %v1307_v37 = vpop.permute.xlu1 %1306 }
0x121f   :  { %v1309_v39 = vadd.f32 %v1307_v37, %v1292_v20  ;;  %v40_v37 = vld [vmem:[%s4604_s1 + $0x150] sm:$0xff] }
0x1221   :  { %3646 = vtanh.f32 %v1309_v39  ;;  %v47_v39 = vld [vmem:[%s4604_s1 + $0x1c0] sm:$0xff] }
0x122b   :  { %v3647_v43 = vpop.eup %3646 }
0x122c   :  { %1313 = vrot.lane.b32.xlu1 %v3647_v43, %s3761_s24  ;;  %v3396_v43 = vpack.c.bf16 %v40_v37, %v39_v31 }
0x123f   :  { %v1343_v38 = vpop.permute.xlu0 %1342 }
0x1240   :  { %v1345_v40 = vadd.f32 %v1343_v38, %v1322_v32  ;;  %v37_v32 = vld [vmem:[%s4604_s1 + $0x120] sm:$0xff]  ;;  %v48_v38 = vld [vmem:[%s4604_s1 + $0x1d0] sm:$0xff] }
0x1241   :  { %v3392_v36 = vpack.c.bf16 %v38_v33, %v37_v32  ;;  %v65_v32 = vld [vmem:[%s4604_s1 + $0x270] sm:$0xff] }
0x1242   :  { %3648 = vtanh.f32 %v1345_v40  ;;  %v3412_v40 = vpack.c.bf16 %v48_v38, %v47_v39 }
0x1243   :  { %v1318_v42 = vpop.permute.xlu0 %1317  ;;  %3393 = vmatprep.subr.bf16.mxu0 %v3392_v36 }
0x1244   :  { %v1320_v47 = vmul.f32 %v3641_v25, %v1318_v42  ;;  %v43_v25 = vld [vmem:[%s4604_s1 + $0x180] sm:$0xff]  ;;  %3395 = vmatpush3.bf16.msra.mxu0 %v3392_v36  ;;  %v42_v42 = vld [vmem:[%s4604_s1 + $0x170] sm:$0xff] }
0x1245   :  { %v3404_v28 = vpack.c.bf16 %v44_v27, %v43_v25  ;;  %3397 = vmatprep.subr.bf16.mxu0 %v3396_v43  ;;  %v66_v25 = vld [vmem:[%s4604_s1 + $0x278] sm:$0xff]  ;;  %v1510_v27 = vld [vmem:[#allocation4 + $0x28] sm:$0xff] }
0x1247   :  { %3405 = vmatprep.subr.bf16.mxu1 %v3404_v28 }
0x1248   :  { %3399 = vmatpush3.bf16.msra.mxu0 %v3396_v43 }
0x124c   :  { %v3649_v41 = vpop.eup %3648 }
0x124d   :  { %1349 = vrot.lane.b32.xlu1 %v3649_v41, %s3761_s24  ;;  %v41_v41 = vld [vmem:[%s4604_s1 + $0x160] sm:$0xff] }
0x129e   :  { %v1314_v46 = vpop.permute.xlu1 %1313 }
0x129f   :  { %v1316_v48 = vmul.f32 %v1314_v46, %v1311_v45  ;;  %v49_v45 = vld [vmem:[%s4604_s1 + $0x1e0] sm:$0xff]  ;;  %v3400_v46 = vpack.c.bf16 %v42_v42, %v41_v41 }
0x12a1   :  { %v1321_v49 = vadd.f32 %v1320_v47, %v1316_v48  ;;  %v50_v47 = vld [vmem:[%s4604_s1 + $0x1f0] sm:$0xff]  ;;  %3401 = vmatprep.subr.bf16.mxu0 %v3400_v46 }
0x12a2   :  { %v3416_v48 = vpack.c.bf16 %v50_v47, %v49_v45  ;;  %3403 = vmatpush3.bf16.msra.mxu0 %v3400_v46 }
0x12a3   :  { %1356 = vrot.lane.b32.xlu0 %v1321_v49, %s3761_s24 }
0x12bf   :  { %v1350_v51 = vpop.permute.xlu1 %1349 }
0x12c0   :  { %v1352_v53 = vmul.f32 %v1350_v51, %v1347_v50  ;;  %v52_v50 = vld [vmem:[%s4604_s1 + $0x208] sm:$0xff]  ;;  %v54_v51 = vld [vmem:[%s4604_s1 + $0x218] sm:$0xff] }
0x12c2   :  { %v1354_v55 = vadd.f32 %v1353_v52, %v1352_v53  ;;  %v4236_v52 = vpack.c.bf16 %v54_v51, %v52_v50 }
0x12c4   :  { %1360 = vst.msk [vmem:[#allocation4 + $0x8] sm:$0xff] %vm495_vm2, %v1354_v55  ;;  %3421 = vmatprep.subr.bf16.mxu0 %v4236_v52 }
0x1315   :  { %v1357_v56 = vpop.permute.xlu0 %1356 }
0x1316   :  { %1359 = vst.msk [vmem:[#allocation4 + $0x30] sm:$0xff] %vm92_vm0, %v1357_v56  ;;  %v4159_v57 = vsel %vm92_vm0, %v1357_v56, %v1354_v55 }
0x1317   :  { %3021 = vmatmul.mubr.msk.f32.vlgmr.msra.gmra.mrb[14].mxu1 %vm355_vm3, %v4159_v57 }
0x1318   :  { %3407 = vmatpush3.bf16.msra.mxu1 %v3404_v28  ;;  %v4310_v28 = vpack.c.bf16 %v66_v25, %v64_v24 }
0x1319   :  { %3409 = vmatprep.subr.bf16.mxu1 %v3408_v29 }
0x131c   :  { %3411 = vmatpush3.bf16.msra.mxu1 %v3408_v29 }
0x131d   :  { %3413 = vmatprep.subr.bf16.mxu1 %v3412_v40  ;;  %v1511_v33 = vld [vmem:[#allocation4 + $0x30] sm:$0xff] }
0x1320   :  { %3415 = vmatpush3.bf16.msra.mxu1 %v3412_v40 }
0x1321   :  { %3417 = vmatprep.subr.bf16.mxu1 %v3416_v48 }
0x1324   :  { %3419 = vmatpush3.bf16.msra.mxu1 %v3416_v48 }
0x1325   :  { %3437 = vmatprep.subr.bf16.mxu1 %v4236_v52 }
0x13ea   :  { %v1431_v58 = vpop.f32.mrb[14].mxu1 }
0x13eb   :  { %v1432_v59 = vadd.f32 %v1431_v58, %v3958_v7  ;;  %v1433_v61 = vpop.f32.mrb[15].mxu1 }
0x13ec   :  { %v1434_v63 = vadd.f32 %v1433_v61, %v3963_v10 }
0x13ed   :  { %1468 = vrot.lane.b32.xlu0 %v1432_v59, %s3760_s23  ;;  %1445 = vrot.lane.b32.xlu1 %v1432_v59, %s3759_s22  ;;  %v1437_v1 = vadd.f32 %v1436_v0, %v1432_v59 }
0x13ef   :  { %v3022_v2 = vmul.f32 -1.442695, %v1437_v1 }
0x13f1   :  { %1481 = vrot.lane.b32.xlu0 %v1434_v63, %s3761_s24  ;;  %1470 = vrot.lane.b32.xlu1 %v1434_v63, %s3760_s23  ;;  %3650 = vpow2.f32 %v3022_v2 }
0x13fb   :  { %v3651_v9 = vpop.eup %3650 }
0x13fc   :  { %v1441_v3 = vadd.f32 1.0, %v3651_v9 }
0x13fe   :  { %3652 = vrcp.f32 %v1441_v3  ;;  %v51_v3 = vld [vmem:[%s4604_s1 + $0x200] sm:$0xff] }
0x1408   :  { %v4169_v4 = vpop.eup %3652 }
0x1409   :  { %v1455_v55 = vsub.f32 1.0, %v4169_v4 }
0x145f   :  { %v1446_v7 = vpop.permute.xlu1 %1445  ;;  %v1469_v6 = vpop.permute.xlu0 %1468 }
0x1460   :  { %v1448_v5 = vmul.f32 %v4169_v4, %v1446_v7  ;;  %v56_v7 = vld [vmem:[%s4604_s1 + $0x228] sm:$0xff] }
0x1462   :  { %1450 = vrot.lane.b32.xlu1 %v1448_v5, %s3759_s22 }
0x1463   :  { %v1471_v10 = vpop.permute.xlu1 %1470  ;;  %v1482_v18 = vpop.permute.xlu0 %1481 }
0x1464   :  { %v1472_v11 = vsel %vm92_vm0, %v1469_v6, %v1471_v10  ;;  %v1506_v10 = vld [vmem:[#allocation4 + $0x8] sm:$0xff] }
0x1465   :  { %v1474_v12 = vadd.f32 %v1472_v11, %v1466_v8  ;;  %v55_v11 = vld [vmem:[%s4604_s1 + $0x220] sm:$0xff] }
0x1467   :  { %v3023_v13 = vmul.f32 -1.442695, %v1474_v12  ;;  %v57_v12 = vld [vmem:[%s4604_s1 + $0x230] sm:$0xff] }
0x1469   :  { %3654 = vpow2.f32 %v3023_v13  ;;  %v1507_v13 = vld [vmem:[#allocation4 + $0x10] sm:$0xff] }
0x1473   :  { %v3655_v14 = vpop.eup %3654 }
0x1474   :  { %v1478_v16 = vadd.f32 1.0, %v3655_v14  ;;  %v60_v14 = vld [vmem:[%s4604_s1 + $0x248] sm:$0xff] }
0x1476   :  { %3656 = vrcp.f32 %v1478_v16  ;;  %v62_v16 = vld [vmem:[%s4604_s1 + $0x258] sm:$0xff] }
0x1480   :  { %v4174_v17 = vpop.eup %3656 }
0x1481   :  { %v1484_v20 = vmul.f32 %v4174_v17, %v1482_v18  ;;  %v1491_v63 = vsub.f32 1.0, %v4174_v17  ;;  %v1497_v1 = vmul.f32 %v4174_v17, %v4159_v57  ;;  %v4282_v17 = vpack.c.bf16 %v57_v12, %v55_v11  ;;  %v1508_v18 = vld [vmem:[#allocation4 + $0x18] sm:$0xff] }
0x1483   :  { %1486 = vrot.lane.b32.xlu0 %v1484_v20, %s3759_s22  ;;  %v4286_v20 = vpack.c.bf16 %v62_v16, %v60_v14 }
0x1487   :  { %1461 = vrot.lane.b32.xlu0 %v4159_v57, %s3760_s23  ;;  %v58_v57 = vld [vmem:[%s4604_s1 + $0x238] sm:$0xff] }
0x14d4   :  { %v1451_v21 = vpop.permute.xlu1 %1450 }
0x14d5   :  { %v1453_v22 = vadd.f32 %v1451_v21, %v1436_v0  ;;  %v59_v21 = vld [vmem:[%s4604_s1 + $0x240] sm:$0xff] }
0x14d7   :  { %3658 = vtanh.f32 %v1453_v22  ;;  %v61_v22 = vld [vmem:[%s4604_s1 + $0x250] sm:$0xff] }
0x14d8   :  { %v4306_v26 = vpack.c.bf16 %v61_v22, %v59_v21 }
0x14e1   :  { %v3659_v30 = vpop.eup %3658 }
0x14e2   :  { %1457 = vrot.lane.b32.xlu1 %v3659_v30, %s3761_s24  ;;  %v63_v30 = vld [vmem:[%s4604_s1 + $0x260] sm:$0xff] }
0x14e3   :  { %v4324_v34 = vpack.c.bf16 %v65_v32, %v63_v30 }
0x14f5   :  { %v1487_v35 = vpop.permute.xlu0 %1486 }
0x14f6   :  { %v1489_v19 = vadd.f32 %v1487_v35, %v1466_v8  ;;  %v4263_v8 = vpack.c.bf16 %v58_v57, %v56_v7 }
0x14f8   :  { %3660 = vtanh.f32 %v1489_v19  ;;  %v81_v19 = vld [vmem:[%s4604_s1 + $0x305] ss:$0 sm:$0xff] }
0x14f9   :  { %v1462_v53 = vpop.permute.xlu0 %1461 }
0x14fa   :  { %v1464_v58 = vmul.f32 %v4169_v4, %v1462_v53  ;;  %v53_v4 = vld [vmem:[%s4604_s1 + $0x210] sm:$0xff] }
0x14fb   :  { %v4259_v6 = vpack.c.bf16 %v53_v4, %v51_v3 }
0x1502   :  { %v3661_v49 = vpop.eup %3660 }
0x1503   :  { %1493 = vrot.lane.b32.xlu1 %v3661_v49, %s3761_s24 }
0x1554   :  { %v1458_v56 = vpop.permute.xlu1 %1457 }
0x1555   :  { %v1460_v59 = vmul.f32 %v1458_v56, %v1455_v55 }
0x1557   :  { %v1465_v61 = vadd.f32 %v1464_v58, %v1460_v59 }
0x1559   :  { %1500 = vrot.lane.b32.xlu0 %v1465_v61, %s3761_s24 }
0x1575   :  { %v1494_v0 = vpop.permute.xlu1 %1493 }
0x1576   :  { %v1496_v2 = vmul.f32 %v1494_v0, %v1491_v63 }
0x1578   :  { %v1498_v9 = vadd.f32 %v1497_v1, %v1496_v2  ;;  %v2984_v1 = vld [vmem:[%s4604_s1 + $0x306] ss:$8 sm:$0x3] }
0x1579   :  { %v4380_v14 = vrot.slane %v2984_v1, %v351_v62 }
0x157a   :  { %1504 = vst.msk [vmem:[#allocation4] sm:$0xff] %vm495_vm2, %v1498_v9 }
0x1581   :  { %v1505_v5 = vld [vmem:[#allocation4] sm:$0xff] }
0x1582   :  { %3185 = vmatprep.mubr.msk.f32.mxu0 %vm355_vm3, %v1505_v5  ;;  %3213 = vmatprep.mubr.msk.f32.mxu1 %vm355_vm3, %v1505_v5  ;;  %v4371_v5 = vrot.slane %v2984_v1, %v347_v60 }
0x1583   :  { %3186 = vmatmul.mubr.msk.f32.vlgmr.msra.gmra.mrb[16].mxu0 %vm355_vm3, %v1506_v10  ;;  %3214 = vmatmul.mubr.msk.f32.vlgmr.msra.gmra.mrb[16].mxu1 %vm355_vm3, %v1506_v10 }
0x1584   :  { %3188 = vmatprep.mubr.msk.f32.mxu0 %vm355_vm3, %v1507_v13  ;;  %3216 = vmatprep.mubr.msk.f32.mxu1 %vm355_vm3, %v1507_v13 }
0x1585   :  { %3423 = vmatpush1.bf16.msra.mxu0 %v4259_v6  ;;  %3439 = vmatpush1.bf16.msra.mxu1 %v4259_v6 }
0x1586   :  { %3425 = vmatprep.subr.bf16.mxu0 %v4263_v8  ;;  %3441 = vmatprep.subr.bf16.mxu1 %v4263_v8 }
0x1587   :  { %3189 = vmatmul.mubr.msk.f32.gmra.mrb[18].mxu0 %vm355_vm3, %v1508_v18  ;;  %3217 = vmatmul.mubr.msk.f32.gmra.mrb[18].mxu1 %vm355_vm3, %v1508_v18 }
0x1588   :  { %3191 = vmatprep.mubr.msk.f32.mxu0 %vm355_vm3, %v1509_v23  ;;  %3219 = vmatprep.mubr.msk.f32.mxu1 %vm355_vm3, %v1509_v23 }
0x1589   :  { %3427 = vmatpush1.bf16.msra.mxu0 %v4282_v17  ;;  %3443 = vmatpush1.bf16.msra.mxu1 %v4282_v17 }
0x158a   :  { %3429 = vmatprep.subr.bf16.mxu0 %v4286_v20  ;;  %3445 = vmatprep.subr.bf16.mxu1 %v4286_v20 }
0x158b   :  { %3192 = vmatmul.mubr.msk.f32.gmra.mrb[20].mxu0 %vm355_vm3, %v1510_v27  ;;  %3220 = vmatmul.mubr.msk.f32.gmra.mrb[20].mxu1 %vm355_vm3, %v1510_v27 }
0x158c   :  { %3194 = vmatprep.mubr.msk.f32.mxu0 %vm355_vm3, %v1511_v33  ;;  %3222 = vmatprep.mubr.msk.f32.mxu1 %vm355_vm3, %v1511_v33 }
0x158d   :  { %3431 = vmatpush1.bf16.msra.mxu0 %v4306_v26  ;;  %3447 = vmatpush1.bf16.msra.mxu1 %v4306_v26 }
0x158e   :  { %3433 = vmatprep.subr.bf16.mxu0 %v4310_v28  ;;  %3449 = vmatprep.subr.bf16.mxu1 %v4310_v28 }
0x1591   :  { %3435 = vmatpush1.bf16.msra.mxu0 %v4324_v34  ;;  %3451 = vmatpush1.bf16.msra.mxu1 %v4324_v34 }
0x1592   :  { %3453 = vmatprep.subr.bf16.mxu0 %v4236_v52  ;;  %3469 = vmatprep.subr.bf16.mxu1 %v4236_v52 }
0x15cb   :  { %v1501_v35 = vpop.permute.xlu0 %1500 }
0x15cc   :  { %1503 = vst.msk [vmem:[#allocation4 + $0x38] sm:$0xff] %vm92_vm0, %v1501_v35 }
0x15d3   :  { %v1512_v36 = vld [vmem:[#allocation4 + $0x38] sm:$0xff] }
0x15d4   :  { %3195 = vmatmul.mubr.msk.f32.gmra.mrb[22].mxu0 %vm355_vm3, %v1512_v36  ;;  %3223 = vmatmul.mubr.msk.f32.gmra.mrb[22].mxu1 %vm355_vm3, %v1512_v36 }
0x15d5   :  { %1838 = vmatprep.mubr.f32.mxu0 %v3758_v44  ;;  %1977 = vmatprep.mubr.f32.mxu1 %v3758_v44 }
0x15d8   :  { %1839 = vmatmul.mubr.f32.vlgmr.msra.gmra.mrb[24].mxu0 %v3758_v44 }
0x15d9   :  { %3455 = vmatpush1.bf16.msra.mxu0 %v4259_v6  ;;  %2119 = vmatprep.mubr.f32.mxu0 %v3758_v44 }
0x15da   :  { %3457 = vmatprep.subr.bf16.mxu0 %v4263_v8 }
0x15dd   :  { %3459 = vmatpush1.bf16.msra.mxu0 %v4282_v17 }
0x15de   :  { %3461 = vmatprep.subr.bf16.mxu0 %v4286_v20 }
0x15e1   :  { %3463 = vmatpush1.bf16.msra.mxu0 %v4306_v26 }
0x15e2   :  { %3465 = vmatprep.subr.bf16.mxu0 %v4310_v28 }
0x15e5   :  { %3467 = vmatpush1.bf16.msra.mxu0 %v4324_v34 }
0x15e6   :  { %3485 = vmatprep.subr.bf16.mxu0 %v4236_v52 }
0x1656   :  { %v3187_v29 = vpop.f32.mrb[16].mxu0  ;;  %v3215_v31 = vpop.f32.mrb[16].mxu1 }
0x1657   :  { %v1609_v37 = vadd.f32 %v3187_v29, %v80_v15  ;;  %v1722_v39 = vadd.f32 %v3215_v31, %v81_v19  ;;  %v1603_v43 = vpop.f32.mrb[17].mxu0  ;;  %v1716_v38 = vpop.f32.mrb[17].mxu1 }
0x1658   :  { %v1604_v40 = vadd.f32 %v1603_v43, %v80_v15  ;;  %v1717_v41 = vadd.f32 %v1716_v38, %v81_v19 }
0x1659   :  { %1643 = vst.msk [vmem:[#allocation5 + $0x8] sm:$0xff] %vm222_vm1, %v1609_v37  ;;  %1756 = vst.msk [vmem:[#allocation6 + $0x8] sm:$0xff] %vm222_vm1, %v1722_v39 }
0x165a   :  { %1642 = vst.msk [vmem:[#allocation5] sm:$0xff] %vm222_vm1, %v1604_v40  ;;  %1755 = vst.msk [vmem:[#allocation6] sm:$0xff] %vm222_vm1, %v1717_v41  ;;  %v3190_v42 = vpop.f32.mrb[18].mxu0  ;;  %v3218_v45 = vpop.f32.mrb[18].mxu1 }
0x165b   :  { %v1619_v46 = vadd.f32 %v3190_v42, %v80_v15  ;;  %v1732_v47 = vadd.f32 %v3218_v45, %v81_v19  ;;  %v1613_v48 = vpop.f32.mrb[19].mxu0  ;;  %v1726_v49 = vpop.f32.mrb[19].mxu1 }
0x165c   :  { %v1614_v50 = vadd.f32 %v1613_v48, %v80_v15  ;;  %v1727_v51 = vadd.f32 %v1726_v49, %v81_v19 }
0x165d   :  { %1645 = vst.msk [vmem:[#allocation5 + $0x18] sm:$0xff] %vm222_vm1, %v1619_v46  ;;  %1758 = vst.msk [vmem:[#allocation6 + $0x18] sm:$0xff] %vm222_vm1, %v1732_v47 }
0x165e   :  { %1644 = vst.msk [vmem:[#allocation5 + $0x10] sm:$0xff] %vm222_vm1, %v1614_v50  ;;  %1757 = vst.msk [vmem:[#allocation6 + $0x10] sm:$0xff] %vm222_vm1, %v1727_v51  ;;  %v3193_v53 = vpop.f32.mrb[20].mxu0  ;;  %v3221_v55 = vpop.f32.mrb[20].mxu1 }
0x165f   :  { %v1629_v56 = vadd.f32 %v3193_v53, %v80_v15  ;;  %v1742_v58 = vadd.f32 %v3221_v55, %v81_v19  ;;  %v1623_v59 = vpop.f32.mrb[21].mxu0  ;;  %v1736_v61 = vpop.f32.mrb[21].mxu1 }
0x1660   :  { %v1624_v63 = vadd.f32 %v1623_v59, %v80_v15  ;;  %v1737_v0 = vadd.f32 %v1736_v61, %v81_v19 }
0x1661   :  { %1647 = vst.msk [vmem:[#allocation5 + $0x28] sm:$0xff] %vm222_vm1, %v1629_v56  ;;  %1760 = vst.msk [vmem:[#allocation6 + $0x28] sm:$0xff] %vm222_vm1, %v1742_v58  ;;  %v1845_v18 = vld [vmem:[#allocation5] sm:$0xff] }
0x1662   :  { %1646 = vst.msk [vmem:[#allocation5 + $0x20] sm:$0xff] %vm222_vm1, %v1624_v63  ;;  %1759 = vst.msk [vmem:[#allocation6 + $0x20] sm:$0xff] %vm222_vm1, %v1737_v0 }
0x16a7   :  { %v3196_v2 = vpop.f32.mrb[22].mxu0  ;;  %v3224_v9 = vpop.f32.mrb[22].mxu1 }
0x16a8   :  { %v1639_v3 = vadd.f32 %v3196_v2, %v80_v15  ;;  %v1752_v4 = vadd.f32 %v3224_v9, %v81_v19  ;;  %v1633_v7 = vpop.f32.mrb[23].mxu0  ;;  %v1746_v57 = vpop.f32.mrb[23].mxu1  ;;  %v1984_v2 = vld [vmem:[#allocation5 + $0x8] sm:$0xff] }
0x16a9   :  { %v1634_v10 = vadd.f32 %v1633_v7, %v80_v15  ;;  %v1747_v11 = vadd.f32 %v1746_v57, %v81_v19 }
0x16aa   :  { %1649 = vst.msk [vmem:[#allocation5 + $0x38] sm:$0xff] %vm222_vm1, %v1639_v3  ;;  %1762 = vst.msk [vmem:[#allocation6 + $0x38] sm:$0xff] %vm222_vm1, %v1752_v4 }
0x16ab   :  { %1648 = vst.msk [vmem:[#allocation5 + $0x30] sm:$0xff] %vm222_vm1, %v1634_v10  ;;  %1761 = vst.msk [vmem:[#allocation6 + $0x30] sm:$0xff] %vm222_vm1, %v1747_v11  ;;  %v1840_v12 = vpop.f32.mrb[24].mxu0 }
0x16ac   :  { %v1841_v13 = vadd.f32 %v1840_v12, %v4371_v5  ;;  %v1842_v16 = vpop.f32.mrb[25].mxu0 }
0x16ad   :  { %v1843_v60 = vadd.f32 %v1842_v16, %v4380_v14 }
0x16ae   :  { %1874 = vrot.lane.b32.xlu0 %v1841_v13, %s3760_s23  ;;  %1854 = vrot.lane.b32.xlu1 %v1841_v13, %s3759_s22  ;;  %v1846_v21 = vadd.f32 %v1845_v18, %v1841_v13 }
0x16b0   :  { %v3040_v22 = vmul.f32 -1.442695, %v1846_v21 }
0x16b1   :  { %v1872_v32 = vld [vmem:[#allocation6 + $0x38] sm:$0xff] }
0x16b2   :  { %1887 = vrot.lane.b32.xlu0 %v1843_v60, %s3761_s24  ;;  %1876 = vrot.lane.b32.xlu1 %v1843_v60, %s3760_s23  ;;  %3662 = vpow2.f32 %v3040_v22  ;;  %v2014_v16 = vld [vmem:[#allocation6 + $0x30] sm:$0xff] }
0x16bc   :  { %v3663_v23 = vpop.eup %3662 }
0x16bd   :  { %v1850_v24 = vadd.f32 1.0, %v3663_v23 }
0x16bf   :  { %3664 = vrcp.f32 %v1850_v24 }
0x16c9   :  { %v3665_v54 = vpop.eup %3664 }
0x16ca   :  { %v1864_v45 = vsub.f32 1.0, %v3665_v54  ;;  %v1870_v47 = vmul.f32 0.0, %v3665_v54 }
0x1720   :  { %v1855_v62 = vpop.permute.xlu1 %1854  ;;  %v1875_v27 = vpop.permute.xlu0 %1874 }
0x1721   :  { %v1857_v25 = vmul.f32 %v3665_v54, %v1855_v62 }
0x1723   :  { %1859 = vrot.lane.b32.xlu1 %v1857_v25, %s3759_s22 }
0x1724   :  { %v1877_v30 = vpop.permute.xlu1 %1876  ;;  %v1888_v31 = vpop.permute.xlu0 %1887 }
0x1725   :  { %v1878_v33 = vsel %vm92_vm0, %v1875_v27, %v1877_v30 }
0x1726   :  { %v1880_v35 = vadd.f32 %v1878_v33, %v1872_v32 }
0x1728   :  { %v3041_v36 = vmul.f32 -1.442695, %v1880_v35 }
0x172a   :  { %3666 = vpow2.f32 %v3041_v36 }
0x1734   :  { %v3667_v15 = vpop.eup %3666 }
0x1735   :  { %v1884_v19 = vadd.f32 1.0, %v3667_v15 }
0x1737   :  { %3668 = vrcp.f32 %v1884_v19 }
0x1741   :  { %v3669_v29 = vpop.eup %3668 }
0x1742   :  { %v1890_v37 = vmul.f32 %v3669_v29, %v1888_v31  ;;  %v1897_v51 = vsub.f32 1.0, %v3669_v29  ;;  %v1903_v55 = vmul.f32 0.0, %v3669_v29 }
0x1744   :  { %1892 = vrot.lane.b32.xlu0 %v1890_v37, %s3759_s22 }
0x1795   :  { %v1860_v39 = vpop.permute.xlu1 %1859 }
0x1796   :  { %v1862_v43 = vadd.f32 %v1860_v39, %v1845_v18 }
0x1798   :  { %3670 = vtanh.f32 %v1862_v43 }
0x17a2   :  { %v3671_v38 = vpop.eup %3670 }
0x17a3   :  { %1866 = vrot.lane.b32.xlu1 %v3671_v38, %s3761_s24 }
0x17b6   :  { %v1893_v40 = vpop.permute.xlu0 %1892 }
0x17b7   :  { %v1895_v41 = vadd.f32 %v1893_v40, %v1872_v32 }
0x17b9   :  { %3672 = vtanh.f32 %v1895_v41 }
0x17c3   :  { %v3673_v42 = vpop.eup %3672 }
0x17c4   :  { %1899 = vrot.lane.b32.xlu0 %v3673_v42, %s3761_s24 }
0x1815   :  { %v1867_v46 = vpop.permute.xlu1 %1866 }
0x1816   :  { %v1869_v48 = vmul.f32 %v1867_v46, %v1864_v45 }
0x1818   :  { %v1871_v49 = vadd.f32 %v1870_v47, %v1869_v48 }
0x181a   :  { %1906 = vrot.lane.b32.xlu1 %v1871_v49, %s3761_s24 }
0x1836   :  { %v1900_v50 = vpop.permute.xlu0 %1899 }
0x1837   :  { %v1902_v53 = vmul.f32 %v1900_v50, %v1897_v51  ;;  %v2126_v50 = vld [vmem:[#allocation5 + $0x10] sm:$0xff] }
0x1839   :  { %v1904_v56 = vadd.f32 %v1903_v55, %v1902_v53 }
0x188c   :  { %v1907_v58 = vpop.permute.xlu1 %1906 }
0x188d   :  { %v4394_v59 = vsel %vm92_vm0, %v1907_v58, %v1904_v56 }
0x188e   :  { %3042 = vmatmul.mubr.msk.f32.vlgmr.msra.gmra.mrb[24].mxu1 %vm355_vm3, %v4394_v59 }
0x188f   :  { %3471 = vmatpush1.bf16.msra.mxu1 %v4259_v6  ;;  %2261 = vmatprep.mubr.f32.mxu1 %v3758_v44 }
0x1890   :  { %3473 = vmatprep.subr.bf16.mxu1 %v4263_v8 }
0x1893   :  { %3475 = vmatpush1.bf16.msra.mxu1 %v4282_v17 }
0x1894   :  { %3477 = vmatprep.subr.bf16.mxu1 %v4286_v20 }
0x1897   :  { %3479 = vmatpush1.bf16.msra.mxu1 %v4306_v26 }
0x1898   :  { %3481 = vmatprep.subr.bf16.mxu1 %v4310_v28 }
0x189b   :  { %3483 = vmatpush1.bf16.msra.mxu1 %v4324_v34 }
0x189c   :  { %3501 = vmatprep.subr.bf16.mxu1 %v4236_v52 }
0x1961   :  { %v1979_v61 = vpop.f32.mrb[24].mxu1 }
0x1962   :  { %v1980_v63 = vadd.f32 %v1979_v61, %v4371_v5  ;;  %v1981_v0 = vpop.f32.mrb[25].mxu1 }
0x1963   :  { %v1982_v1 = vadd.f32 %v1981_v0, %v4380_v14 }
0x1964   :  { %2016 = vrot.lane.b32.xlu1 %v1980_v63, %s3760_s23  ;;  %1993 = vrot.lane.b32.xlu0 %v1980_v63, %s3759_s22  ;;  %v1985_v9 = vadd.f32 %v1984_v2, %v1980_v63 }
0x1966   :  { %v3043_v3 = vmul.f32 -1.442695, %v1985_v9 }
0x1968   :  { %2029 = vrot.lane.b32.xlu1 %v1982_v1, %s3761_s24  ;;  %2018 = vrot.lane.b32.xlu0 %v1982_v1, %s3760_s23  ;;  %3674 = vpow2.f32 %v3043_v3  ;;  %v2156_v1 = vld [vmem:[#allocation6 + $0x28] sm:$0xff] }
0x1972   :  { %v3675_v4 = vpop.eup %3674 }
0x1973   :  { %v1989_v7 = vadd.f32 1.0, %v3675_v4 }
0x1975   :  { %3676 = vrcp.f32 %v1989_v7 }
0x197f   :  { %v3677_v57 = vpop.eup %3676 }
0x1980   :  { %v2003_v15 = vsub.f32 1.0, %v3677_v57 }
0x19d6   :  { %v1994_v10 = vpop.permute.xlu0 %1993  ;;  %v2017_v12 = vpop.permute.xlu1 %2016 }
0x19d7   :  { %v1996_v11 = vmul.f32 %v3677_v57, %v1994_v10 }
0x19d9   :  { %1998 = vrot.lane.b32.xlu0 %v1996_v11, %s3759_s22 }
0x19da   :  { %v2019_v13 = vpop.permute.xlu0 %2018  ;;  %v2030_v54 = vpop.permute.xlu1 %2029 }
0x19db   :  { %v2020_v60 = vsel %vm92_vm0, %v2017_v12, %v2019_v13 }
0x19dc   :  { %v2022_v18 = vadd.f32 %v2020_v60, %v2014_v16 }
0x19de   :  { %v3044_v21 = vmul.f32 -1.442695, %v2022_v18 }
0x19e0   :  { %3678 = vpow2.f32 %v3044_v21 }
0x19ea   :  { %v3679_v22 = vpop.eup %3678 }
0x19eb   :  { %v2026_v23 = vadd.f32 1.0, %v3679_v22 }
0x19ed   :  { %3680 = vrcp.f32 %v2026_v23 }
0x19f7   :  { %v3681_v24 = vpop.eup %3680 }
0x19f8   :  { %v2032_v62 = vmul.f32 %v3681_v24, %v2030_v54  ;;  %v2039_v43 = vsub.f32 1.0, %v3681_v24  ;;  %v2045_v40 = vmul.f32 %v3681_v24, %v4394_v59 }
0x19fa   :  { %2034 = vrot.lane.b32.xlu1 %v2032_v62, %s3759_s22 }
0x19fe   :  { %2009 = vrot.lane.b32.xlu1 %v4394_v59, %s3760_s23 }
0x1a4b   :  { %v1999_v25 = vpop.permute.xlu0 %1998 }
0x1a4c   :  { %v2001_v27 = vadd.f32 %v1999_v25, %v1984_v2 }
0x1a4e   :  { %3682 = vtanh.f32 %v2001_v27 }
0x1a58   :  { %v3683_v30 = vpop.eup %3682 }
0x1a59   :  { %2005 = vrot.lane.b32.xlu0 %v3683_v30, %s3761_s24 }
0x1a6c   :  { %v2035_v32 = vpop.permute.xlu1 %2034 }
0x1a6d   :  { %v2037_v33 = vadd.f32 %v2035_v32, %v2014_v16 }
0x1a6f   :  { %3684 = vtanh.f32 %v2037_v33 }
0x1a70   :  { %v2010_v36 = vpop.permute.xlu1 %2009 }
0x1a71   :  { %v2012_v29 = vmul.f32 %v3677_v57, %v2010_v36 }
0x1a79   :  { %v3685_v35 = vpop.eup %3684 }
0x1a7a   :  { %2041 = vrot.lane.b32.xlu0 %v3685_v35, %s3761_s24 }
0x1acb   :  { %v2006_v19 = vpop.permute.xlu0 %2005 }
0x1acc   :  { %v2008_v31 = vmul.f32 %v2006_v19, %v2003_v15 }
0x1ace   :  { %v2013_v37 = vadd.f32 %v2012_v29, %v2008_v31 }
0x1ad0   :  { %2048 = vrot.lane.b32.xlu1 %v2013_v37, %s3761_s24 }
0x1aec   :  { %v2042_v39 = vpop.permute.xlu0 %2041 }
0x1aed   :  { %v2044_v38 = vmul.f32 %v2042_v39, %v2039_v43  ;;  %v2268_v39 = vld [vmem:[#allocation5 + $0x18] sm:$0xff] }
0x1aef   :  { %v2046_v41 = vadd.f32 %v2045_v40, %v2044_v38 }
0x1b42   :  { %v2049_v42 = vpop.permute.xlu1 %2048 }
0x1b43   :  { %v4423_v45 = vsel %vm92_vm0, %v2049_v42, %v2046_v41 }
0x1b44   :  { %3045 = vmatmul.mubr.msk.f32.vlgmr.msra.gmra.mrb[26].mxu0 %vm355_vm3, %v4423_v45 }
0x1b45   :  { %3487 = vmatpush1.bf16.msra.mxu0 %v4259_v6  ;;  %2403 = vmatprep.mubr.f32.mxu0 %v3758_v44 }
0x1b46   :  { %3489 = vmatprep.subr.bf16.mxu0 %v4263_v8 }
0x1b49   :  { %3491 = vmatpush1.bf16.msra.mxu0 %v4282_v17 }
0x1b4a   :  { %3493 = vmatprep.subr.bf16.mxu0 %v4286_v20 }
0x1b4d   :  { %3495 = vmatpush1.bf16.msra.mxu0 %v4306_v26 }
0x1b4e   :  { %3497 = vmatprep.subr.bf16.mxu0 %v4310_v28 }
0x1b51   :  { %3499 = vmatpush1.bf16.msra.mxu0 %v4324_v34 }
0x1b52   :  { %3517 = vmatprep.subr.bf16.mxu0 %v4236_v52 }
0x1c17   :  { %v2121_v46 = vpop.f32.mrb[26].mxu0 }
0x1c18   :  { %v2122_v47 = vadd.f32 %v2121_v46, %v4371_v5  ;;  %v2123_v48 = vpop.f32.mrb[27].mxu0 }
0x1c19   :  { %v2124_v49 = vadd.f32 %v2123_v48, %v4380_v14  ;;  %v2298_v48 = vld [vmem:[#allocation6 + $0x20] sm:$0xff] }
0x1c1a   :  { %2158 = vrot.lane.b32.xlu1 %v2122_v47, %s3760_s23  ;;  %2135 = vrot.lane.b32.xlu0 %v2122_v47, %s3759_s22  ;;  %v2127_v51 = vadd.f32 %v2126_v50, %v2122_v47 }
0x1c1c   :  { %v3046_v53 = vmul.f32 -1.442695, %v2127_v51 }
0x1c1e   :  { %2171 = vrot.lane.b32.xlu1 %v2124_v49, %s3761_s24  ;;  %2160 = vrot.lane.b32.xlu0 %v2124_v49, %s3760_s23  ;;  %3686 = vpow2.f32 %v3046_v53 }
0x1c28   :  { %v3687_v55 = vpop.eup %3686 }
0x1c29   :  { %v2131_v56 = vadd.f32 1.0, %v3687_v55 }
0x1c2b   :  { %3688 = vrcp.f32 %v2131_v56 }
0x1c35   :  { %v3689_v58 = vpop.eup %3688 }
0x1c36   :  { %v2145_v23 = vsub.f32 1.0, %v3689_v58 }
0x1c8c   :  { %v2136_v59 = vpop.permute.xlu0 %2135  ;;  %v2159_v63 = vpop.permute.xlu1 %2158 }
0x1c8d   :  { %v2138_v61 = vmul.f32 %v3689_v58, %v2136_v59 }
0x1c8f   :  { %2140 = vrot.lane.b32.xlu0 %v2138_v61, %s3759_s22 }
0x1c90   :  { %v2161_v0 = vpop.permute.xlu0 %2160  ;;  %v2172_v10 = vpop.permute.xlu1 %2171 }
0x1c91   :  { %v2162_v2 = vsel %vm92_vm0, %v2159_v63, %v2161_v0 }
0x1c92   :  { %v2164_v9 = vadd.f32 %v2162_v2, %v2156_v1 }
0x1c94   :  { %v3047_v3 = vmul.f32 -1.442695, %v2164_v9 }
0x1c96   :  { %3690 = vpow2.f32 %v3047_v3 }
0x1ca0   :  { %v3691_v4 = vpop.eup %3690 }
0x1ca1   :  { %v2168_v7 = vadd.f32 1.0, %v3691_v4 }
0x1ca3   :  { %3692 = vrcp.f32 %v2168_v7 }
0x1cad   :  { %v3693_v57 = vpop.eup %3692 }
0x1cae   :  { %v2174_v11 = vmul.f32 %v3693_v57, %v2172_v10  ;;  %v2181_v30 = vsub.f32 1.0, %v3693_v57  ;;  %v2187_v33 = vmul.f32 %v3693_v57, %v4423_v45 }
0x1cb0   :  { %2176 = vrot.lane.b32.xlu1 %v2174_v11, %s3759_s22 }
0x1cb4   :  { %2151 = vrot.lane.b32.xlu1 %v4423_v45, %s3760_s23 }
0x1d01   :  { %v2141_v12 = vpop.permute.xlu0 %2140 }
0x1d02   :  { %v2143_v13 = vadd.f32 %v2141_v12, %v2126_v50 }
0x1d04   :  { %3694 = vtanh.f32 %v2143_v13 }
0x1d0e   :  { %v3695_v16 = vpop.eup %3694 }
0x1d0f   :  { %2147 = vrot.lane.b32.xlu0 %v3695_v16, %s3761_s24 }
0x1d22   :  { %v2177_v60 = vpop.permute.xlu1 %2176 }
0x1d23   :  { %v2179_v18 = vadd.f32 %v2177_v60, %v2156_v1 }
0x1d25   :  { %3696 = vtanh.f32 %v2179_v18 }
0x1d26   :  { %v2152_v22 = vpop.permute.xlu1 %2151 }
0x1d27   :  { %v2154_v54 = vmul.f32 %v3689_v58, %v2152_v22 }
0x1d2f   :  { %v3697_v21 = vpop.eup %3696 }
0x1d30   :  { %2183 = vrot.lane.b32.xlu0 %v3697_v21, %s3761_s24 }
0x1d81   :  { %v2148_v24 = vpop.permute.xlu0 %2147 }
0x1d82   :  { %v2150_v62 = vmul.f32 %v2148_v24, %v2145_v23 }
0x1d84   :  { %v2155_v25 = vadd.f32 %v2154_v54, %v2150_v62 }
0x1d86   :  { %2190 = vrot.lane.b32.xlu1 %v2155_v25, %s3761_s24  ;;  %v2410_v25 = vld [vmem:[#allocation5 + $0x20] sm:$0xff] }
0x1da2   :  { %v2184_v27 = vpop.permute.xlu0 %2183 }
0x1da3   :  { %v2186_v32 = vmul.f32 %v2184_v27, %v2181_v30 }
0x1da5   :  { %v2188_v35 = vadd.f32 %v2187_v33, %v2186_v32 }
0x1df8   :  { %v2191_v36 = vpop.permute.xlu1 %2190 }
0x1df9   :  { %v4452_v15 = vsel %vm92_vm0, %v2191_v36, %v2188_v35 }
0x1dfa   :  { %3048 = vmatmul.mubr.msk.f32.vlgmr.msra.gmra.mrb[26].mxu1 %vm355_vm3, %v4452_v15 }
0x1dfb   :  { %3503 = vmatpush1.bf16.msra.mxu1 %v4259_v6  ;;  %2545 = vmatprep.mubr.f32.mxu1 %v3758_v44 }
0x1dfc   :  { %3505 = vmatprep.subr.bf16.mxu1 %v4263_v8 }
0x1dff   :  { %3507 = vmatpush1.bf16.msra.mxu1 %v4282_v17 }
0x1e00   :  { %3509 = vmatprep.subr.bf16.mxu1 %v4286_v20 }
0x1e03   :  { %3511 = vmatpush1.bf16.msra.mxu1 %v4306_v26 }
0x1e04   :  { %3513 = vmatprep.subr.bf16.mxu1 %v4310_v28 }
0x1e07   :  { %3515 = vmatpush1.bf16.msra.mxu1 %v4324_v34 }
0x1e08   :  { %3533 = vmatprep.subr.bf16.mxu1 %v4236_v52 }
0x1ecd   :  { %v2263_v19 = vpop.f32.mrb[26].mxu1 }
0x1ece   :  { %v2264_v29 = vadd.f32 %v2263_v19, %v4371_v5  ;;  %v2265_v31 = vpop.f32.mrb[27].mxu1 }
0x1ecf   :  { %v2266_v37 = vadd.f32 %v2265_v31, %v4380_v14  ;;  %v2440_v31 = vld [vmem:[#allocation6 + $0x18] sm:$0xff] }
0x1ed0   :  { %2300 = vrot.lane.b32.xlu1 %v2264_v29, %s3760_s23  ;;  %2277 = vrot.lane.b32.xlu0 %v2264_v29, %s3759_s22  ;;  %v2269_v43 = vadd.f32 %v2268_v39, %v2264_v29 }
0x1ed2   :  { %v3049_v38 = vmul.f32 -1.442695, %v2269_v43 }
0x1ed4   :  { %2313 = vrot.lane.b32.xlu1 %v2266_v37, %s3761_s24  ;;  %2302 = vrot.lane.b32.xlu0 %v2266_v37, %s3760_s23  ;;  %3698 = vpow2.f32 %v3049_v38 }
0x1ede   :  { %v3699_v40 = vpop.eup %3698 }
0x1edf   :  { %v2273_v52 = vadd.f32 1.0, %v3699_v40 }
0x1ee1   :  { %3700 = vrcp.f32 %v2273_v52 }
0x1eeb   :  { %v3701_v41 = vpop.eup %3700 }
0x1eec   :  { %v2287_v4 = vsub.f32 1.0, %v3701_v41 }
0x1f42   :  { %v2278_v42 = vpop.permute.xlu0 %2277  ;;  %v2301_v46 = vpop.permute.xlu1 %2300 }
0x1f43   :  { %v2280_v45 = vmul.f32 %v3701_v41, %v2278_v42 }
0x1f45   :  { %2282 = vrot.lane.b32.xlu0 %v2280_v45, %s3759_s22 }
0x1f46   :  { %v2303_v47 = vpop.permute.xlu0 %2302  ;;  %v2314_v58 = vpop.permute.xlu1 %2313 }
0x1f47   :  { %v2304_v49 = vsel %vm92_vm0, %v2301_v46, %v2303_v47 }
0x1f48   :  { %v2306_v50 = vadd.f32 %v2304_v49, %v2298_v48 }
0x1f4a   :  { %v3050_v51 = vmul.f32 -1.442695, %v2306_v50 }
0x1f4c   :  { %3702 = vpow2.f32 %v3050_v51 }
0x1f56   :  { %v3703_v53 = vpop.eup %3702 }
0x1f57   :  { %v2310_v55 = vadd.f32 1.0, %v3703_v53 }
0x1f59   :  { %3704 = vrcp.f32 %v2310_v55 }
0x1f63   :  { %v3705_v56 = vpop.eup %3704 }
0x1f64   :  { %v2316_v59 = vmul.f32 %v3705_v56, %v2314_v58  ;;  %v2323_v13 = vsub.f32 1.0, %v3705_v56  ;;  %v2329_v60 = vmul.f32 %v3705_v56, %v4452_v15 }
0x1f66   :  { %2318 = vrot.lane.b32.xlu1 %v2316_v59, %s3759_s22 }
0x1f6a   :  { %2293 = vrot.lane.b32.xlu1 %v4452_v15, %s3760_s23 }
0x1fb7   :  { %v2283_v61 = vpop.permute.xlu0 %2282 }
0x1fb8   :  { %v2285_v63 = vadd.f32 %v2283_v61, %v2268_v39 }
0x1fba   :  { %3706 = vtanh.f32 %v2285_v63 }
0x1fc4   :  { %v3707_v0 = vpop.eup %3706 }
0x1fc5   :  { %2289 = vrot.lane.b32.xlu0 %v3707_v0, %s3761_s24 }
0x1fd8   :  { %v2319_v1 = vpop.permute.xlu1 %2318 }
0x1fd9   :  { %v2321_v2 = vadd.f32 %v2319_v1, %v2298_v48 }
0x1fdb   :  { %3708 = vtanh.f32 %v2321_v2 }
0x1fdc   :  { %v2294_v3 = vpop.permute.xlu1 %2293 }
0x1fdd   :  { %v2296_v57 = vmul.f32 %v3701_v41, %v2294_v3 }
0x1fe5   :  { %v3709_v9 = vpop.eup %3708 }
0x1fe6   :  { %2325 = vrot.lane.b32.xlu0 %v3709_v9, %s3761_s24 }
0x2037   :  { %v2290_v7 = vpop.permute.xlu0 %2289 }
0x2038   :  { %v2292_v10 = vmul.f32 %v2290_v7, %v2287_v4 }
0x203a   :  { %v2297_v11 = vadd.f32 %v2296_v57, %v2292_v10 }
0x203c   :  { %2332 = vrot.lane.b32.xlu1 %v2297_v11, %s3761_s24 }
0x2058   :  { %v2326_v12 = vpop.permute.xlu0 %2325 }
0x2059   :  { %v2328_v16 = vmul.f32 %v2326_v12, %v2323_v13 }
0x205b   :  { %v2330_v18 = vadd.f32 %v2329_v60, %v2328_v16  ;;  %v2582_v16 = vld [vmem:[#allocation6 + $0x10] sm:$0xff] }
0x20ae   :  { %v2333_v21 = vpop.permute.xlu1 %2332 }
0x20af   :  { %v4481_v22 = vsel %vm92_vm0, %v2333_v21, %v2330_v18 }
0x20b0   :  { %3051 = vmatmul.mubr.msk.f32.vlgmr.msra.gmra.mrb[28].mxu0 %vm355_vm3, %v4481_v22 }
0x20b1   :  { %3519 = vmatpush1.bf16.msra.mxu0 %v4259_v6  ;;  %2687 = vmatprep.mubr.f32.mxu0 %v3758_v44 }
0x20b2   :  { %3521 = vmatprep.subr.bf16.mxu0 %v4263_v8 }
0x20b5   :  { %3523 = vmatpush1.bf16.msra.mxu0 %v4282_v17 }
0x20b6   :  { %3525 = vmatprep.subr.bf16.mxu0 %v4286_v20 }
0x20b9   :  { %3527 = vmatpush1.bf16.msra.mxu0 %v4306_v26 }
0x20ba   :  { %3529 = vmatprep.subr.bf16.mxu0 %v4310_v28 }
0x20bd   :  { %3531 = vmatpush1.bf16.msra.mxu0 %v4324_v34 }
0x2183   :  { %v2405_v23 = vpop.f32.mrb[28].mxu0 }
0x2184   :  { %v2406_v24 = vadd.f32 %v2405_v23, %v4371_v5  ;;  %v2407_v54 = vpop.f32.mrb[29].mxu0 }
0x2185   :  { %v2408_v62 = vadd.f32 %v2407_v54, %v4380_v14 }
0x2186   :  { %2442 = vrot.lane.b32.xlu1 %v2406_v24, %s3760_s23  ;;  %2419 = vrot.lane.b32.xlu0 %v2406_v24, %s3759_s22  ;;  %v2411_v27 = vadd.f32 %v2410_v25, %v2406_v24 }
0x2188   :  { %v3052_v30 = vmul.f32 -1.442695, %v2411_v27 }
0x218a   :  { %2455 = vrot.lane.b32.xlu1 %v2408_v62, %s3761_s24  ;;  %2444 = vrot.lane.b32.xlu0 %v2408_v62, %s3760_s23  ;;  %3710 = vpow2.f32 %v3052_v30 }
0x2194   :  { %v3711_v32 = vpop.eup %3710 }
0x2195   :  { %v2415_v33 = vadd.f32 1.0, %v3711_v32 }
0x2197   :  { %3712 = vrcp.f32 %v2415_v33 }
0x21a1   :  { %v3713_v35 = vpop.eup %3712 }
0x21a2   :  { %v2429_v53 = vsub.f32 1.0, %v3713_v35 }
0x21f8   :  { %v2420_v36 = vpop.permute.xlu0 %2419  ;;  %v2443_v19 = vpop.permute.xlu1 %2442 }
0x21f9   :  { %v2422_v15 = vmul.f32 %v3713_v35, %v2420_v36 }
0x21fb   :  { %2424 = vrot.lane.b32.xlu0 %v2422_v15, %s3759_s22 }
0x21fc   :  { %v2445_v29 = vpop.permute.xlu0 %2444  ;;  %v2456_v41 = vpop.permute.xlu1 %2455 }
0x21fd   :  { %v2446_v37 = vsel %vm92_vm0, %v2443_v19, %v2445_v29 }
0x21fe   :  { %v2448_v39 = vadd.f32 %v2446_v37, %v2440_v31 }
0x2200   :  { %v3053_v43 = vmul.f32 -1.442695, %v2448_v39 }
0x2202   :  { %3714 = vpow2.f32 %v3053_v43 }
0x220c   :  { %v3715_v38 = vpop.eup %3714 }
0x220d   :  { %v2452_v40 = vadd.f32 1.0, %v3715_v38 }
0x220f   :  { %3716 = vrcp.f32 %v2452_v40 }
0x2219   :  { %v3717_v52 = vpop.eup %3716 }
0x221a   :  { %v2458_v42 = vmul.f32 %v3717_v52, %v2456_v41  ;;  %v2465_v63 = vsub.f32 1.0, %v3717_v52  ;;  %v2471_v1 = vmul.f32 %v3717_v52, %v4481_v22 }
0x221c   :  { %2460 = vrot.lane.b32.xlu1 %v2458_v42, %s3759_s22 }
0x2220   :  { %2435 = vrot.lane.b32.xlu1 %v4481_v22, %s3760_s23 }
0x226d   :  { %v2425_v45 = vpop.permute.xlu0 %2424 }
0x226e   :  { %v2427_v46 = vadd.f32 %v2425_v45, %v2410_v25 }
0x2270   :  { %3718 = vtanh.f32 %v2427_v46 }
0x227a   :  { %v3719_v47 = vpop.eup %3718 }
0x227b   :  { %2431 = vrot.lane.b32.xlu0 %v3719_v47, %s3761_s24 }
0x228e   :  { %v2461_v48 = vpop.permute.xlu1 %2460 }
0x228f   :  { %v2463_v49 = vadd.f32 %v2461_v48, %v2440_v31 }
0x2291   :  { %3720 = vtanh.f32 %v2463_v49  ;;  %v2694_v49 = vld [vmem:[#allocation5 + $0x30] sm:$0xff] }
0x2292   :  { %v2436_v51 = vpop.permute.xlu1 %2435 }
0x2293   :  { %v2438_v56 = vmul.f32 %v3713_v35, %v2436_v51 }
0x229b   :  { %v3721_v50 = vpop.eup %3720 }
0x229c   :  { %2467 = vrot.lane.b32.xlu0 %v3721_v50, %s3761_s24 }
0x22ed   :  { %v2432_v55 = vpop.permute.xlu0 %2431 }
0x22ee   :  { %v2434_v58 = vmul.f32 %v2432_v55, %v2429_v53 }
0x22f0   :  { %v2439_v59 = vadd.f32 %v2438_v56, %v2434_v58 }
0x22f2   :  { %2474 = vrot.lane.b32.xlu1 %v2439_v59, %s3761_s24 }
0x230e   :  { %v2468_v61 = vpop.permute.xlu0 %2467 }
0x230f   :  { %v2470_v0 = vmul.f32 %v2468_v61, %v2465_v63 }
0x2311   :  { %v2472_v2 = vadd.f32 %v2471_v1, %v2470_v0  ;;  %v2724_v0 = vld [vmem:[#allocation6 + $0x8] sm:$0xff] }
0x2364   :  { %v2475_v9 = vpop.permute.xlu1 %2474 }
0x2365   :  { %v4509_v3 = vsel %vm92_vm0, %v2475_v9, %v2472_v2 }
0x2366   :  { %3054 = vmatmul.mubr.msk.f32.vlgmr.msra.gmra.mrb[28].mxu1 %vm355_vm3, %v4509_v3 }
0x2367   :  { %3535 = vmatpush1.bf16.msra.mxu1 %v4259_v6  ;;  %2829 = vmatprep.mubr.f32.mxu1 %v3758_v44 }
0x2368   :  { %3537 = vmatprep.subr.bf16.mxu1 %v4263_v8  ;;  %v2552_v8 = vld [vmem:[#allocation5 + $0x28] sm:$0xff] }
0x236b   :  { %3539 = vmatpush1.bf16.msra.mxu1 %v4282_v17 }
0x236c   :  { %3541 = vmatprep.subr.bf16.mxu1 %v4286_v20 }
0x236f   :  { %3543 = vmatpush1.bf16.msra.mxu1 %v4306_v26 }
0x2370   :  { %3545 = vmatprep.subr.bf16.mxu1 %v4310_v28 }
0x2373   :  { %3547 = vmatpush1.bf16.msra.mxu1 %v4324_v34 }
0x2439   :  { %v2547_v4 = vpop.f32.mrb[28].mxu1 }
0x243a   :  { %v2548_v7 = vadd.f32 %v2547_v4, %v4371_v5  ;;  %v2549_v57 = vpop.f32.mrb[29].mxu1 }
0x243b   :  { %v2550_v6 = vadd.f32 %v2549_v57, %v4380_v14 }
0x243c   :  { %2584 = vrot.lane.b32.xlu1 %v2548_v7, %s3760_s23  ;;  %2561 = vrot.lane.b32.xlu0 %v2548_v7, %s3759_s22  ;;  %v2553_v17 = vadd.f32 %v2552_v8, %v2548_v7 }
0x243e   :  { %v3055_v20 = vmul.f32 -1.442695, %v2553_v17 }
0x2440   :  { %2597 = vrot.lane.b32.xlu1 %v2550_v6, %s3761_s24  ;;  %2586 = vrot.lane.b32.xlu0 %v2550_v6, %s3760_s23  ;;  %3722 = vpow2.f32 %v3055_v20 }
0x244a   :  { %v3723_v26 = vpop.eup %3722 }
0x244b   :  { %v2557_v28 = vadd.f32 1.0, %v3723_v26 }
0x244d   :  { %3724 = vrcp.f32 %v2557_v28 }
0x2457   :  { %v3725_v34 = vpop.eup %3724 }
0x2458   :  { %v2571_v15 = vsub.f32 1.0, %v3725_v34 }
0x24ae   :  { %v2562_v10 = vpop.permute.xlu0 %2561  ;;  %v2585_v12 = vpop.permute.xlu1 %2584 }
0x24af   :  { %v2564_v11 = vmul.f32 %v3725_v34, %v2562_v10 }
0x24b1   :  { %2566 = vrot.lane.b32.xlu0 %v2564_v11, %s3759_s22 }
0x24b2   :  { %v2587_v13 = vpop.permute.xlu0 %2586  ;;  %v2598_v54 = vpop.permute.xlu1 %2597 }
0x24b3   :  { %v2588_v60 = vsel %vm92_vm0, %v2585_v12, %v2587_v13 }
0x24b4   :  { %v2590_v18 = vadd.f32 %v2588_v60, %v2582_v16 }
0x24b6   :  { %v3056_v21 = vmul.f32 -1.442695, %v2590_v18 }
0x24b8   :  { %3726 = vpow2.f32 %v3056_v21 }
0x24c2   :  { %v3727_v22 = vpop.eup %3726 }
0x24c3   :  { %v2594_v23 = vadd.f32 1.0, %v3727_v22 }
0x24c5   :  { %3728 = vrcp.f32 %v2594_v23 }
0x24cf   :  { %v3729_v24 = vpop.eup %3728 }
0x24d0   :  { %v2600_v62 = vmul.f32 %v3729_v24, %v2598_v54  ;;  %v2607_v43 = vsub.f32 1.0, %v3729_v24  ;;  %v2613_v40 = vmul.f32 %v3729_v24, %v4509_v3 }
0x24d2   :  { %2602 = vrot.lane.b32.xlu1 %v2600_v62, %s3759_s22 }
0x24d6   :  { %2577 = vrot.lane.b32.xlu1 %v4509_v3, %s3760_s23 }
0x2523   :  { %v2567_v25 = vpop.permute.xlu0 %2566 }
0x2524   :  { %v2569_v27 = vadd.f32 %v2567_v25, %v2552_v8 }
0x2526   :  { %3730 = vtanh.f32 %v2569_v27 }
0x2530   :  { %v3731_v30 = vpop.eup %3730 }
0x2531   :  { %2573 = vrot.lane.b32.xlu0 %v3731_v30, %s3761_s24 }
0x2544   :  { %v2603_v32 = vpop.permute.xlu1 %2602 }
0x2545   :  { %v2605_v33 = vadd.f32 %v2603_v32, %v2582_v16 }
0x2547   :  { %3732 = vtanh.f32 %v2605_v33  ;;  %v2836_v33 = vld [vmem:[#allocation5 + $0x38] sm:$0xff] }
0x2548   :  { %v2578_v36 = vpop.permute.xlu1 %2577 }
0x2549   :  { %v2580_v29 = vmul.f32 %v3725_v34, %v2578_v36 }
0x2551   :  { %v3733_v35 = vpop.eup %3732 }
0x2552   :  { %2609 = vrot.lane.b32.xlu0 %v3733_v35, %s3761_s24 }
0x25a3   :  { %v2574_v19 = vpop.permute.xlu0 %2573 }
0x25a4   :  { %v2576_v31 = vmul.f32 %v2574_v19, %v2571_v15 }
0x25a6   :  { %v2581_v37 = vadd.f32 %v2580_v29, %v2576_v31 }
0x25a8   :  { %2616 = vrot.lane.b32.xlu1 %v2581_v37, %s3761_s24 }
0x25c4   :  { %v2610_v39 = vpop.permute.xlu0 %2609 }
0x25c5   :  { %v2612_v38 = vmul.f32 %v2610_v39, %v2607_v43  ;;  %v2866_v43 = vld [vmem:[#allocation6] sm:$0xff] }
0x25c7   :  { %v2614_v52 = vadd.f32 %v2613_v40, %v2612_v38 }
0x261a   :  { %v2617_v41 = vpop.permute.xlu1 %2616 }
0x261b   :  { %v2619_v42 = vsel %vm92_vm0, %v2617_v41, %v2614_v52 }
0x261c   :  { %3057 = vmatmul.mubr.msk.f32.vlgmr.msra.gmra.mrb[30].mxu0 %vm355_vm3, %v2619_v42 }
0x261d   :  { %3241 = vmatprep.mubr.msk.f32.mxu0 %vm3763_vm4, %v3758_v44  ;;  %v75_v44 = vld [vmem:[%s4604_s1 + $0x300] ss:$0 sm:$0xff] }
0x26ef   :  { %v2689_v45 = vpop.f32.mrb[30].mxu0 }
0x26f0   :  { %v2690_v46 = vadd.f32 %v2689_v45, %v4371_v5  ;;  %v2691_v47 = vpop.f32.mrb[31].mxu0 }
0x26f1   :  { %v2692_v48 = vadd.f32 %v2691_v47, %v4380_v14 }
0x26f2   :  { %2726 = vrot.lane.b32.xlu1 %v2690_v46, %s3760_s23  ;;  %2703 = vrot.lane.b32.xlu0 %v2690_v46, %s3759_s22  ;;  %v2695_v50 = vadd.f32 %v2694_v49, %v2690_v46 }
0x26f4   :  { %v3058_v51 = vmul.f32 -1.442695, %v2695_v50 }
0x26f6   :  { %2739 = vrot.lane.b32.xlu1 %v2692_v48, %s3761_s24  ;;  %2728 = vrot.lane.b32.xlu0 %v2692_v48, %s3760_s23  ;;  %3734 = vpow2.f32 %v3058_v51 }
0x2700   :  { %v3735_v53 = vpop.eup %3734 }
0x2701   :  { %v2699_v55 = vadd.f32 1.0, %v3735_v53  ;;  %v67_v53 = vld [vmem:[%s4604_s1 + $0x280] sm:$0xff] }
0x2703   :  { %3736 = vrcp.f32 %v2699_v55  ;;  %v68_v55 = vld [vmem:[%s4604_s1 + $0x290] sm:$0xff] }
0x270d   :  { %v3737_v56 = vpop.eup %3736 }
0x270e   :  { %v2713_v11 = vsub.f32 1.0, %v3737_v56 }
0x2764   :  { %v2704_v58 = vpop.permute.xlu0 %2703  ;;  %v2727_v61 = vpop.permute.xlu1 %2726 }
0x2765   :  { %v2706_v59 = vmul.f32 %v3737_v56, %v2704_v58  ;;  %v3762_v58 = vmov 0.0|0.0  }
0x2766   :  { %3548 = vmatprep.subr.bf16.mxu0 %v3762_v58 }
0x2767   :  { %2708 = vrot.lane.b32.xlu0 %v2706_v59, %s3759_s22  ;;  %v3549_v59 = vpack.c.bf16 %v68_v55, %v67_v53 }
0x2768   :  { %v2729_v63 = vpop.permute.xlu0 %2728  ;;  %v2740_v57 = vpop.permute.xlu1 %2739 }
0x2769   :  { %v2730_v1 = vsel %vm92_vm0, %v2727_v61, %v2729_v63  ;;  %v70_v61 = vld [vmem:[%s4604_s1 + $0x2b0] sm:$0xff]  ;;  %3550 = vmatpush3.bf16.msra.mxu0 %v3549_v59 }
0x276a   :  { %v2732_v2 = vadd.f32 %v2730_v1, %v2724_v0  ;;  %3551 = vmatprep.subr.bf16.mxu0 %v3762_v58  ;;  %v72_v1 = vld [vmem:[%s4604_s1 + $0x2d0] sm:$0xff] }
0x276c   :  { %v3059_v9 = vmul.f32 -1.442695, %v2732_v2 }
0x276e   :  { %3738 = vpow2.f32 %v3059_v9  ;;  %v73_v9 = vld [vmem:[%s4604_s1 + $0x2e0] sm:$0xff] }
0x2778   :  { %v3739_v3 = vpop.eup %3738 }
0x2779   :  { %v2736_v4 = vadd.f32 1.0, %v3739_v3  ;;  %v74_v3 = vld [vmem:[%s4604_s1 + $0x2f0] sm:$0xff] }
0x277b   :  { %3740 = vrcp.f32 %v2736_v4 }
0x2785   :  { %v3741_v7 = vpop.eup %3740 }
0x2786   :  { %v2742_v6 = vmul.f32 %v3741_v7, %v2740_v57  ;;  %v2749_v21 = vsub.f32 1.0, %v3741_v7  ;;  %v2755_v23 = vmul.f32 %v3741_v7, %v2619_v42  ;;  %v3558_v7 = vpack.c.bf16 %v74_v3, %v73_v9 }
0x2788   :  { %2744 = vrot.lane.b32.xlu1 %v2742_v6, %s3759_s22 }
0x278c   :  { %2719 = vrot.lane.b32.xlu1 %v2619_v42, %s3760_s23 }
0x27d9   :  { %v2709_v8 = vpop.permute.xlu0 %2708 }
0x27da   :  { %v2711_v17 = vadd.f32 %v2709_v8, %v2694_v49 }
0x27dc   :  { %3742 = vtanh.f32 %v2711_v17 }
0x27e6   :  { %v3743_v20 = vpop.eup %3742 }
0x27e7   :  { %2715 = vrot.lane.b32.xlu0 %v3743_v20, %s3761_s24 }
0x27fa   :  { %v2745_v26 = vpop.permute.xlu1 %2744 }
0x27fb   :  { %v2747_v28 = vadd.f32 %v2745_v26, %v2724_v0  ;;  %v71_v0 = vld [vmem:[%s4604_s1 + $0x2c0] sm:$0xff] }
0x27fc   :  { %v3555_v2 = vpack.c.bf16 %v72_v1, %v71_v0 }
0x27fd   :  { %3744 = vtanh.f32 %v2747_v28 }
0x27fe   :  { %v2720_v10 = vpop.permute.xlu1 %2719 }
0x27ff   :  { %v2722_v13 = vmul.f32 %v3737_v56, %v2720_v10  ;;  %v69_v56 = vld [vmem:[%s4604_s1 + $0x2a0] sm:$0xff] }
0x2800   :  { %v3552_v63 = vpack.c.bf16 %v70_v61, %v69_v56 }
0x2802   :  { %3553 = vmatpush3.bf16.msra.mxu0 %v3552_v63 }
0x2803   :  { %3554 = vmatprep.subr.bf16.mxu0 %v3762_v58 }
0x2806   :  { %3556 = vmatpush3.bf16.msra.mxu0 %v3555_v2 }
0x2807   :  { %v3745_v34 = vpop.eup %3744  ;;  %3557 = vmatprep.subr.bf16.mxu0 %v3762_v58 }
0x2808   :  { %2751 = vrot.lane.b32.xlu0 %v3745_v34, %s3761_s24 }
0x280a   :  { %3559 = vmatpush3.bf16.msra.mxu0 %v3558_v7 }
0x2859   :  { %v2716_v12 = vpop.permute.xlu0 %2715 }
0x285a   :  { %v2718_v16 = vmul.f32 %v2716_v12, %v2713_v11 }
0x285c   :  { %v2723_v60 = vadd.f32 %v2722_v13, %v2718_v16 }
0x285e   :  { %2758 = vrot.lane.b32.xlu1 %v2723_v60, %s3761_s24 }
0x287a   :  { %v2752_v18 = vpop.permute.xlu0 %2751 }
0x287b   :  { %v2754_v22 = vmul.f32 %v2752_v18, %v2749_v21 }
0x287d   :  { %v2756_v24 = vadd.f32 %v2755_v23, %v2754_v22 }
0x28d0   :  { %v2759_v54 = vpop.permute.xlu1 %2758 }
0x28d1   :  { %v4552_v62 = vsel %vm92_vm0, %v2759_v54, %v2756_v24 }
0x28d2   :  { %3060 = vmatmul.mubr.msk.f32.vlgmr.msra.gmra.mrb[30].mxu1 %vm355_vm3, %v4552_v62 }
0x29a5   :  { %v2831_v25 = vpop.f32.mrb[30].mxu1 }
0x29a6   :  { %v2832_v27 = vadd.f32 %v2831_v25, %v4371_v5  ;;  %v2833_v30 = vpop.f32.mrb[31].mxu1 }
0x29a7   :  { %v2834_v32 = vadd.f32 %v2833_v30, %v4380_v14 }
0x29a8   :  { %2868 = vrot.lane.b32.xlu1 %v2832_v27, %s3760_s23  ;;  %2845 = vrot.lane.b32.xlu0 %v2832_v27, %s3759_s22  ;;  %v2837_v35 = vadd.f32 %v2836_v33, %v2832_v27 }
0x29aa   :  { %v3061_v36 = vmul.f32 -1.442695, %v2837_v35 }
0x29ac   :  { %2881 = vrot.lane.b32.xlu1 %v2834_v32, %s3761_s24  ;;  %2870 = vrot.lane.b32.xlu0 %v2834_v32, %s3760_s23  ;;  %3746 = vpow2.f32 %v3061_v36 }
0x29b6   :  { %v3747_v15 = vpop.eup %3746 }
0x29b7   :  { %v2841_v19 = vadd.f32 1.0, %v3747_v15 }
0x29b9   :  { %3748 = vrcp.f32 %v2841_v19 }
0x29c3   :  { %v3749_v29 = vpop.eup %3748 }
0x29c4   :  { %v2855_v6 = vsub.f32 1.0, %v3749_v29 }
0x2a1a   :  { %v2846_v5 = vpop.permute.xlu0 %2845  ;;  %v2869_v37 = vpop.permute.xlu1 %2868 }
0x2a1b   :  { %v2848_v31 = vmul.f32 %v3749_v29, %v2846_v5 }
0x2a1d   :  { %2850 = vrot.lane.b32.xlu0 %v2848_v31, %s3759_s22 }
0x2a1e   :  { %v2871_v39 = vpop.permute.xlu0 %2870  ;;  %v2882_v45 = vpop.permute.xlu1 %2881 }
0x2a1f   :  { %v2872_v14 = vsel %vm92_vm0, %v2869_v37, %v2871_v39 }
0x2a20   :  { %v2874_v38 = vadd.f32 %v2872_v14, %v2866_v43 }
0x2a22   :  { %v3062_v40 = vmul.f32 -1.442695, %v2874_v38 }
0x2a24   :  { %3750 = vpow2.f32 %v3062_v40 }
0x2a2e   :  { %v3751_v52 = vpop.eup %3750 }
0x2a2f   :  { %v2878_v41 = vadd.f32 1.0, %v3751_v52 }
0x2a31   :  { %3752 = vrcp.f32 %v2878_v41 }
0x2a3b   :  { %v3753_v42 = vpop.eup %3752 }
0x2a3c   :  { %v2884_v46 = vmul.f32 %v3753_v42, %v2882_v45  ;;  %v2891_v34 = vsub.f32 1.0, %v3753_v42  ;;  %v2897_v11 = vmul.f32 %v3753_v42, %v4552_v62 }
0x2a3e   :  { %2886 = vrot.lane.b32.xlu1 %v2884_v46, %s3759_s22 }
0x2a42   :  { %2861 = vrot.lane.b32.xlu1 %v4552_v62, %s3760_s23 }
0x2a8f   :  { %v2851_v47 = vpop.permute.xlu0 %2850 }
0x2a90   :  { %v2853_v48 = vadd.f32 %v2851_v47, %v2836_v33 }
0x2a92   :  { %3754 = vtanh.f32 %v2853_v48 }
0x2a9c   :  { %v3755_v49 = vpop.eup %3754 }
0x2a9d   :  { %2857 = vrot.lane.b32.xlu0 %v3755_v49, %s3761_s24 }
0x2ab0   :  { %v2887_v50 = vpop.permute.xlu1 %2886 }
0x2ab1   :  { %v2889_v51 = vadd.f32 %v2887_v50, %v2866_v43 }
0x2ab3   :  { %3756 = vtanh.f32 %v2889_v51 }
0x2ab4   :  { %v2862_v57 = vpop.permute.xlu1 %2861 }
0x2ab5   :  { %v2864_v17 = vmul.f32 %v3749_v29, %v2862_v57 }
0x2abd   :  { %v3757_v4 = vpop.eup %3756 }
0x2abe   :  { %2893 = vrot.lane.b32.xlu0 %v3757_v4, %s3761_s24 }
0x2b0f   :  { %v2858_v8 = vpop.permute.xlu0 %2857 }
0x2b10   :  { %v2860_v20 = vmul.f32 %v2858_v8, %v2855_v6 }
0x2b12   :  { %v2865_v26 = vadd.f32 %v2864_v17, %v2860_v20 }
0x2b14   :  { %2900 = vrot.lane.b32.xlu1 %v2865_v26, %s3761_s24 }
0x2b30   :  { %v2894_v28 = vpop.permute.xlu0 %2893 }
0x2b31   :  { %v2896_v10 = vmul.f32 %v2894_v28, %v2891_v34 }
0x2b33   :  { %v2898_v12 = vadd.f32 %v2897_v11, %v2896_v10 }
0x2b86   :  { %v2901_v13 = vpop.permute.xlu1 %2900 }
0x2b87   :  { %v2903_v16 = vsel %vm92_vm0, %v2901_v13, %v2898_v12 }
0x2b88   :  { %3242 = vmatmul.mubr.msk.f32.vlgmr.msra.gmra.mrb[32].mxu0 %vm355_vm3, %v2903_v16 }
0x2c5b   :  { %v2973_v60 = vpop.f32.mrb[32].mxu0 }
0x2c5c   :  { %v2974_v18 = vadd.f32 %v2973_v60, %v75_v44  ;;  %v3243_v21 = vpop.f32.mrb[33].mxu0 }
0x2c5e   :  { %2978 = vst.msk [vmem:[%s4606_s2] sm:$0xff] %vm2977_vm5, %v2974_v18 }

</bundles_post_ra>
